<compile_context>
chip_gen: v7x
topology: tpu7x:2x2x1
jax: 0.10.0
libtpu: 0.0.40
codegen_flags: <defaults>
</compile_context>

<pallas_src>
import jax
import jax.numpy as jnp
from jax.experimental import pallas as pl
from jax.experimental.pallas import tpu as pltpu

# ---------------- small, self-consistent model config ----------------
B = 4                  # batch
N_CLASSES = 4
CHANNELS = 8           # EEG electrodes (H of NCHW)
SAMPLES = 127          # time samples  (W of NCHW)
KERNEL_LENGTH = 16     # temporal conv kernel length (kernelLength)
F1 = 4
D = 2
F2 = 8
G = F1 * D             # depthwise output channels
PAD = KERNEL_LENGTH // 2
T1 = SAMPLES + 2 * PAD - KERNEL_LENGTH + 1   # 128  (after temporal conv)
T2 = T1 // 4                                 # 32   (after AvgPool(1,4))
T3 = T2 // 8                                 # 4    (after AvgPool(1,8))
FEAT = F2 * T3                               # 32   (flattened feature size)
BN_EPS = 1e-3

SP = 128               # padded time axis (127 -> 128, extra column is zero)
CSP = CHANNELS * SP    # 1024  (contraction dim of the first matmul)
GT1 = G * T1           # 1024
F2T2 = F2 * T2         # 256

# packed-constant slab layout (rows of an [8, GT1] f32 array)
_ROW_B2 = 0            # [0, :GT1]          bias after depthwise+BN2
_ROW_B3 = 1            # [1, :F2T2]         BN3 shift
_ROW_WC = 2            # [2:2+N_CLASSES, :FEAT]  classifier weight [K, FEAT]
_ROW_BC = 6            # [6, :N_CLASSES]    classifier bias


# ------------------------- fused kernel -------------------------
def trln_fused_kernel(xoh_ref, wbig_ref, pw_ref, p8_ref, slab_ref,
                      probs_ref, cl_ref):
    # xoh:  [B, CSP + N_CLASSES] f32  -- flattened/padded input, one-hot appended
    # wbig: [CSP, GT1]  bf16  -- (temporal Toeplitz x channel mix), BN1/BN2 folded
    # pw:   [GT1, F2T2] bf16  -- (AvgPool4 x pointwise conv), BN3 scale folded
    # p8:   [F2T2, FEAT] bf16 -- (AvgPool8 x flatten) in torch view(B,-1) order
    # slab: [8, GT1] f32      -- packed small constants (see _ROW_*)
    f32 = jnp.float32
    bf16 = jnp.bfloat16

    def elu(a):
        return jnp.where(a > 0, a, jnp.exp(jnp.minimum(a, 0.0)) - 1.0)

    x = xoh_ref[:, 0:CSP].astype(bf16)                       # [B, 1024]
    oh = xoh_ref[:, CSP:CSP + N_CLASSES]                     # [B, K] one-hot f32

    b2row = slab_ref[_ROW_B2:_ROW_B2 + 1, :]                 # [1, GT1]
    b3row = slab_ref[_ROW_B3:_ROW_B3 + 1, 0:F2T2]            # [1, F2T2]
    wc = slab_ref[_ROW_WC:_ROW_WC + N_CLASSES, 0:FEAT]       # [K, FEAT]
    bc = slab_ref[_ROW_BC:_ROW_BC + 1, 0:N_CLASSES]          # [1, K]

    # (1) temporal conv + BN1 + depthwise channel mix + BN2: ONE matmul
    z = jnp.dot(x, wbig_ref[...], preferred_element_type=f32) + b2row   # [B, GT1]
    a = elu(z)

    # (2) AvgPool(1,4) + pointwise 1x1 conv + BN3: ONE matmul, then ELU
    e3 = elu(jnp.dot(a.astype(bf16), pw_ref[...],
                     preferred_element_type=f32) + b3row)               # [B, F2T2]

    # (3) AvgPool(1,8) + flatten: ONE matmul, columns already (f2, t3) order
    feat = jnp.dot(e3.astype(bf16), p8_ref[...],
                   preferred_element_type=f32)                          # [B, FEAT]

    # (4) centroid loss (PairwiseDistance: eps=1e-6 added to the difference)
    csum = jax.lax.dot_general(oh, feat, (((0,), (0,)), ((), ())),
                               preferred_element_type=f32)              # [K, FEAT]
    cnum = jnp.dot(oh, csum, preferred_element_type=f32)                # [B, FEAT]
    cnt = jnp.sum(oh, axis=0, keepdims=True)                            # [1, K]
    cnt_sel = jnp.sum(oh * cnt, axis=1, keepdims=True)                  # [B, 1]
    diff = feat - cnum / cnt_sel + 1e-6
    dist = jnp.sqrt(jnp.sum(diff * diff, axis=1, keepdims=True))        # [B, 1]
    cl_ref[...] = jnp.sum(dist, axis=0, keepdims=True) / B              # [1, 1]

    # (5) classifier: Linear(FEAT, K) + exact Softmax(dim=1)  (f32 end-to-end)
    logits = jax.lax.dot_general(feat, wc, (((1,), (1,)), ((), ())),
                                 preferred_element_type=f32) + bc       # [B, K]
    m = jnp.max(logits, axis=1, keepdims=True)
    e = jnp.exp(logits - m)
    probs_ref[...] = e / jnp.sum(e, axis=1, keepdims=True)


# ---------------------------- glue ----------------------------
_VMEM = pl.BlockSpec(memory_space=pltpu.MemorySpace.VMEM)

_FLOPS = 2 * B * (CSP * GT1 + GT1 * F2T2 + F2T2 * FEAT + FEAT * N_CLASSES)
_TRANS = B * (GT1 + F2T2 + N_CLASSES)
_BYTES = (4 * B * (CSP + N_CLASSES) + 2 * (CSP * GT1 + GT1 * F2T2 + F2T2 * FEAT)
          + 4 * 8 * GT1 + 4 * (B * N_CLASSES + 1))


def trln_forward(x, y, kp):
    # x: [B, 1, CHANNELS, SAMPLES] f32 (NCHW), y: [B] int class labels
    xs = x[:, 0, :, :]                                          # [B, C, S]
    xpad = jnp.pad(xs, ((0, 0), (0, 0), (0, SP - SAMPLES)))     # [B, C, 128]
    xflat = xpad.reshape(B, CSP)                                # [B, 1024]
    oh = jax.nn.one_hot(y.astype(jnp.int32), N_CLASSES, dtype=jnp.float32)
    xoh = jnp.concatenate([xflat, oh], axis=1)                  # [B, 1028]

    probs, cl = pl.pallas_call(
        trln_fused_kernel,
        out_shape=(jax.ShapeDtypeStruct((B, N_CLASSES), jnp.float32),
                   jax.ShapeDtypeStruct((1, 1), jnp.float32)),
        in_specs=[_VMEM] * 5,
        out_specs=(_VMEM, _VMEM),
        cost_estimate=pl.CostEstimate(flops=_FLOPS, transcendentals=_TRANS,
                                      bytes_accessed=_BYTES),
    )(xoh, kp["wbig"], kp["pw"], kp["p8"], kp["slab"])
    return probs, cl[0, 0]


# -------------------- parameters & folding --------------------
def init_raw_params(key):
    ks = jax.random.split(key, 5)
    w1 = jax.random.normal(ks[0], (F1, KERNEL_LENGTH), jnp.float32) * 0.1
    w2 = jax.random.normal(ks[1], (G, CHANNELS), jnp.float32) * 0.3
    # Conv2dWithConstraint: torch.renorm(w, p=2, dim=0, maxnorm=1)
    norm = jnp.sqrt(jnp.sum(w2 * w2, axis=1, keepdims=True))
    w2 = w2 * jnp.where(norm > 1.0, 1.0 / (norm + 1e-7), 1.0)
    w3 = jax.random.normal(ks[2], (F2, G), jnp.float32) * 0.1
    wc = jax.random.normal(ks[3], (N_CLASSES, FEAT), jnp.float32) * 0.1
    bc = jax.random.normal(ks[4], (N_CLASSES,), jnp.float32) * 0.01

    def fold_bn(n):
        gamma = jnp.ones((n,), jnp.float32)
        beta = jnp.zeros((n,), jnp.float32)
        mean = jnp.zeros((n,), jnp.float32)
        var = jnp.ones((n,), jnp.float32)
        scale = gamma / jnp.sqrt(var + BN_EPS)
        shift = beta - mean * scale
        return scale, shift

    s1, b1 = fold_bn(F1)
    s2, b2 = fold_bn(G)
    s3, b3 = fold_bn(F2)
    return dict(w1=w1, w2=w2, w3=w3, wc=wc, bc=bc,
                s1=s1, b1=b1, s2=s2, b2=b2, s3=s3, b3=b3)


def fold_params(raw):
    w1, w2, w3, wc, bc = raw["w1"], raw["w2"], raw["w3"], raw["wc"], raw["bc"]
    s1, b1 = raw["s1"], raw["b1"]
    s2, b2 = raw["s2"], raw["b2"]
    s3, b3 = raw["s3"], raw["b3"]

    # Per-filter Toeplitz band (temporal conv, zero padding absorbed, BN1 scale
    # folded), then zero-padded 127 -> 128 along the sample axis.
    s_idx = jnp.arange(SAMPLES)[:, None]
    t_idx = jnp.arange(T1)[None, :]
    k_idx = s_idx - t_idx + PAD
    valid = (k_idx >= 0) & (k_idx < KERNEL_LENGTH)
    k_cl = jnp.clip(k_idx, 0, KERNEL_LENGTH - 1)
    toe_f = jnp.where(valid[None, :, :], w1[:, k_cl], 0.0) * s1[:, None, None]
    toe_f = jnp.pad(toe_f, ((0, 0), (0, SP - SAMPLES), (0, 0)))   # [F1, SP, T1]

    f_of_g = jnp.arange(G) // D
    toe_g = toe_f[f_of_g]                                         # [G, SP, T1]
    w2s = w2 * s2[:, None]                                        # [G, C]
    # Fused (channel mix x Toeplitz): wbig[(c,s),(g,t)] = w2s[g,c]*toe[f(g),s,t]
    wbig = jnp.einsum("gc,gst->csgt", w2s, toe_g).reshape(CSP, GT1)
    bias2 = s2 * b1[f_of_g] * jnp.sum(w2, axis=1) + b2            # [G]
    bias2row = jnp.repeat(bias2, T1)                              # [GT1]

    # AvgPool(1,4) then pointwise conv with BN3 scale, fused into one matrix:
    # pw[(g,t),(f2,u)] = s3[f2]*w3[f2,g]*pool4[t,u]
    pool4 = jnp.kron(jnp.eye(T2, dtype=jnp.float32),
                     jnp.ones((4, 1), jnp.float32)) * 0.25        # [T1, T2]
    w3s = w3 * s3[:, None]                                        # [F2, G]
    pw = jnp.einsum("fg,tu->gtfu", w3s, pool4).reshape(GT1, F2T2)
    b3row = jnp.repeat(b3, T2)                                    # [F2T2]

    # AvgPool(1,8) + flatten (output columns already (f2, t3) = torch order)
    pool8 = jnp.kron(jnp.eye(T3, dtype=jnp.float32),
                     jnp.ones((8, 1), jnp.float32)) * 0.125       # [T2, T3]
    p8 = jnp.kron(jnp.eye(F2, dtype=jnp.float32), pool8)          # [F2T2, FEAT]

    # Packed small-constant slab
    slab = jnp.zeros((8, GT1), jnp.float32)
    slab = slab.at[_ROW_B2, :].set(bias2row)
    slab = slab.at[_ROW_B3, :F2T2].set(b3row)
    slab = slab.at[_ROW_WC:_ROW_WC + N_CLASSES, :FEAT].set(wc)
    slab = slab.at[_ROW_BC, :N_CLASSES].set(bc)

    return dict(wbig=wbig.astype(jnp.bfloat16), pw=pw.astype(jnp.bfloat16),
                p8=p8.astype(jnp.bfloat16), slab=slab)


# -------------------- pure-JAX reference (for validation) --------------------
def trln_reference(x, y, raw):
    def elu(a):
        return jnp.where(a > 0, a, jnp.exp(jnp.minimum(a, 0.0)) - 1.0)

    w1, w2, w3, wc, bc = raw["w1"], raw["w2"], raw["w3"], raw["wc"], raw["bc"]
    s1, b1 = raw["s1"], raw["b1"]
    s2, b2 = raw["s2"], raw["b2"]
    s3, b3 = raw["s3"], raw["b3"]

    xs = x[:, 0, :, :]
    xp = jnp.pad(xs, ((0, 0), (0, 0), (PAD, PAD)))
    c1 = jnp.stack([sum(w1[f, k] * xp[:, :, k:k + T1]
                        for k in range(KERNEL_LENGTH)) for f in range(F1)])
    y1 = c1 * s1[:, None, None, None] + b1[:, None, None, None]   # [F1,B,C,T1]
    d = jnp.stack([sum(w2[g, c] * y1[g // D, :, c, :]
                       for c in range(CHANNELS)) for g in range(G)])
    z = elu(d * s2[:, None, None] + b2[:, None, None])            # [G,B,T1]
    p = z.reshape(G, B, T2, 4).mean(axis=-1)                      # [G,B,T2]
    q = jnp.einsum("fg,gbt->fbt", w3, p)
    r = elu(q * s3[:, None, None] + b3[:, None, None])
    o = r.reshape(F2, B, T3, 8).mean(axis=-1)                     # [F2,B,T3]
    feat = jnp.transpose(o, (1, 0, 2)).reshape(B, FEAT)

    oh = jax.nn.one_hot(y, N_CLASSES, dtype=jnp.float32)
    cnt = jnp.sum(oh, axis=0)
    cmean = (oh.T @ feat) / jnp.maximum(cnt, 1.0)[:, None]
    csel = cmean[y]
    dist = jnp.sqrt(jnp.sum((feat - csel + 1e-6) ** 2, axis=1))
    cl = jnp.mean(dist)

    logits = feat @ wc.T + bc
    probs = jax.nn.softmax(logits, axis=1)
    return probs, cl


if __name__ == "__main__":
    key = jax.random.PRNGKey(0)
    kx, kp = jax.random.split(key, 2)
    x = jax.random.normal(kx, (B, 1, CHANNELS, SAMPLES), jnp.float32)
    y = jnp.array([0, 1, 0, 2], dtype=jnp.int32)

    raw = init_raw_params(kp)
    kparams = fold_params(raw)

    probs, cl = jax.jit(trln_forward)(x, y, kparams)
    jax.block_until_ready((probs, cl))

    ref_probs, ref_cl = jax.jit(trln_reference)(x, y, raw)
    jax.block_until_ready((ref_probs, ref_cl))

    assert probs.shape == (B, N_CLASSES)
    assert bool(jnp.all(jnp.isfinite(probs))) and bool(jnp.isfinite(cl))
    assert bool(jnp.allclose(jnp.sum(probs, axis=1), 1.0, atol=1e-5))
    # tolerance covers bf16 MXU operands (f32 accumulation) vs f32 reference
    assert bool(jnp.allclose(probs, ref_probs, atol=3e-2, rtol=3e-2))
    assert bool(jnp.allclose(cl, ref_cl, atol=3e-2, rtol=3e-2))
    print("KERNEL_OK")
</pallas_src>

<mosaic_0001>
module attributes {stable_mosaic.version = 11 : i64} {
  func.func @trln_fused_kernel(%arg0: memref<4x1028xf32, #tpu.memory_space<vmem>>, %arg1: memref<1024x1024xbf16, #tpu.memory_space<vmem>>, %arg2: memref<1024x256xbf16, #tpu.memory_space<vmem>>, %arg3: memref<256x32xbf16, #tpu.memory_space<vmem>>, %arg4: memref<8x1024xf32, #tpu.memory_space<vmem>>, %arg5: memref<4x4xf32, #tpu.memory_space<vmem>>, %arg6: memref<1x1xf32, #tpu.memory_space<vmem>>) attributes {dimension_semantics = [], scalar_prefetch = 0 : i64, scratch_operands = 0 : i64, tpu.core_type = #tpu.core_type<tc>} {
    %c0 = arith.constant 0 : index
    %c0_0 = arith.constant 0 : index
    %0 = vector.load %arg0[%c0, %c0_0] : memref<4x1028xf32, #tpu.memory_space<vmem>>, vector<4x1024xf32>
    %1 = arith.truncf %0 : vector<4x1024xf32> to vector<4x1024xbf16>
    %c0_1 = arith.constant 0 : index
    %c1024 = arith.constant 1024 : index
    %2 = vector.load %arg0[%c0_1, %c1024] : memref<4x1028xf32, #tpu.memory_space<vmem>>, vector<4x4xf32>
    %c0_2 = arith.constant 0 : index
    %c0_3 = arith.constant 0 : index
    %3 = vector.load %arg4[%c0_2, %c0_3] : memref<8x1024xf32, #tpu.memory_space<vmem>>, vector<1x1024xf32>
    %c1 = arith.constant 1 : index
    %c0_4 = arith.constant 0 : index
    %4 = vector.load %arg4[%c1, %c0_4] : memref<8x1024xf32, #tpu.memory_space<vmem>>, vector<1x256xf32>
    %c2 = arith.constant 2 : index
    %c0_5 = arith.constant 0 : index
    %5 = vector.load %arg4[%c2, %c0_5] : memref<8x1024xf32, #tpu.memory_space<vmem>>, vector<4x32xf32>
    %c6 = arith.constant 6 : index
    %c0_6 = arith.constant 0 : index
    %6 = vector.load %arg4[%c6, %c0_6] : memref<8x1024xf32, #tpu.memory_space<vmem>>, vector<1x4xf32>
    %c0_7 = arith.constant 0 : index
    %c0_8 = arith.constant 0 : index
    %7 = vector.load %arg1[%c0_7, %c0_8] : memref<1024x1024xbf16, #tpu.memory_space<vmem>>, vector<1024x1024xbf16>
    %cst = arith.constant dense<0.000000e+00> : vector<4x1024xf32>
    %8 = tpu.matmul %1, %7, %cst {dimension_numbers = #tpu.dot_dimension_numbers<[1], [0], [0], [1], [0, 0, 1, 1], [], []>} : vector<4x1024xbf16>, vector<1024x1024xbf16>, vector<4x1024xf32> -> vector<4x1024xf32>
    %9 = vector.broadcast %3 : vector<1x1024xf32> to vector<4x1024xf32>
    %10 = arith.addf %8, %9 : vector<4x1024xf32>
    %cst_9 = arith.constant 0.000000e+00 : f32
    %11 = vector.broadcast %cst_9 : f32 to vector<4x1024xf32>
    %12 = arith.cmpf ogt, %10, %11 : vector<4x1024xf32>
    %cst_10 = arith.constant 0.000000e+00 : f32
    %13 = vector.broadcast %cst_10 : f32 to vector<4x1024xf32>
    %14 = arith.minimumf %10, %13 : vector<4x1024xf32>
    %15 = math.exp %14 : vector<4x1024xf32>
    %cst_11 = arith.constant 1.000000e+00 : f32
    %16 = vector.broadcast %cst_11 : f32 to vector<4x1024xf32>
    %17 = arith.subf %15, %16 : vector<4x1024xf32>
    %18 = arith.select %12, %10, %17 : vector<4x1024xi1>, vector<4x1024xf32>
    %19 = arith.truncf %18 : vector<4x1024xf32> to vector<4x1024xbf16>
    %c0_12 = arith.constant 0 : index
    %c0_13 = arith.constant 0 : index
    %20 = vector.load %arg2[%c0_12, %c0_13] : memref<1024x256xbf16, #tpu.memory_space<vmem>>, vector<1024x256xbf16>
    %cst_14 = arith.constant dense<0.000000e+00> : vector<4x256xf32>
    %21 = tpu.matmul %19, %20, %cst_14 {dimension_numbers = #tpu.dot_dimension_numbers<[1], [0], [0], [1], [0, 0, 1, 1], [], []>} : vector<4x1024xbf16>, vector<1024x256xbf16>, vector<4x256xf32> -> vector<4x256xf32>
    %22 = vector.broadcast %4 : vector<1x256xf32> to vector<4x256xf32>
    %23 = arith.addf %21, %22 : vector<4x256xf32>
    %cst_15 = arith.constant 0.000000e+00 : f32
    %24 = vector.broadcast %cst_15 : f32 to vector<4x256xf32>
    %25 = arith.cmpf ogt, %23, %24 : vector<4x256xf32>
    %cst_16 = arith.constant 0.000000e+00 : f32
    %26 = vector.broadcast %cst_16 : f32 to vector<4x256xf32>
    %27 = arith.minimumf %23, %26 : vector<4x256xf32>
    %28 = math.exp %27 : vector<4x256xf32>
    %cst_17 = arith.constant 1.000000e+00 : f32
    %29 = vector.broadcast %cst_17 : f32 to vector<4x256xf32>
    %30 = arith.subf %28, %29 : vector<4x256xf32>
    %31 = arith.select %25, %23, %30 : vector<4x256xi1>, vector<4x256xf32>
    %32 = arith.truncf %31 : vector<4x256xf32> to vector<4x256xbf16>
    %c0_18 = arith.constant 0 : index
    %c0_19 = arith.constant 0 : index
    %33 = vector.load %arg3[%c0_18, %c0_19] : memref<256x32xbf16, #tpu.memory_space<vmem>>, vector<256x32xbf16>
    %cst_20 = arith.constant dense<0.000000e+00> : vector<4x32xf32>
    %34 = tpu.matmul %32, %33, %cst_20 {dimension_numbers = #tpu.dot_dimension_numbers<[1], [0], [0], [1], [0, 0, 1, 1], [], []>} : vector<4x256xbf16>, vector<256x32xbf16>, vector<4x32xf32> -> vector<4x32xf32>
    %cst_21 = arith.constant dense<0.000000e+00> : vector<4x32xf32>
    %35 = tpu.matmul %2, %34, %cst_21 {dimension_numbers = #tpu.dot_dimension_numbers<[0], [0], [1], [1], [0, 1, 1, 1], [], []>} : vector<4x4xf32>, vector<4x32xf32>, vector<4x32xf32> -> vector<4x32xf32>
    %cst_22 = arith.constant dense<0.000000e+00> : vector<4x32xf32>
    %36 = tpu.matmul %2, %35, %cst_22 {dimension_numbers = #tpu.dot_dimension_numbers<[1], [0], [0], [1], [0, 0, 1, 1], [], []>} : vector<4x4xf32>, vector<4x32xf32>, vector<4x32xf32> -> vector<4x32xf32>
    %cst_23 = arith.constant dense<0.000000e+00> : vector<4xf32>
    %37 = vector.multi_reduction <add>, %2, %cst_23 [0] : vector<4x4xf32> to vector<4xf32>
    %38 = vector.shape_cast %37 : vector<4xf32> to vector<1x4xf32>
    %39 = vector.broadcast %38 : vector<1x4xf32> to vector<4x4xf32>
    %40 = arith.mulf %2, %39 : vector<4x4xf32>
    %cst_24 = arith.constant dense<0.000000e+00> : vector<4xf32>
    %41 = vector.multi_reduction <add>, %40, %cst_24 [1] : vector<4x4xf32> to vector<4xf32>
    %42 = vector.shape_cast %41 : vector<4xf32> to vector<4x1xf32>
    %43 = vector.broadcast %42 : vector<4x1xf32> to vector<4x32xf32>
    %44 = arith.divf %36, %43 : vector<4x32xf32>
    %45 = arith.subf %34, %44 : vector<4x32xf32>
    %cst_25 = arith.constant 9.99999997E-7 : f32
    %46 = vector.broadcast %cst_25 : f32 to vector<4x32xf32>
    %47 = arith.addf %45, %46 : vector<4x32xf32>
    %48 = arith.mulf %47, %47 : vector<4x32xf32>
    %cst_26 = arith.constant dense<0.000000e+00> : vector<4xf32>
    %49 = vector.multi_reduction <add>, %48, %cst_26 [1] : vector<4x32xf32> to vector<4xf32>
    %50 = vector.shape_cast %49 : vector<4xf32> to vector<4x1xf32>
    %51 = math.sqrt %50 : vector<4x1xf32>
    %cst_27 = arith.constant dense<0.000000e+00> : vector<1xf32>
    %52 = vector.multi_reduction <add>, %51, %cst_27 [0] : vector<4x1xf32> to vector<1xf32>
    %53 = vector.shape_cast %52 : vector<1xf32> to vector<1x1xf32>
    %cst_28 = arith.constant 4.000000e+00 : f32
    %54 = vector.broadcast %cst_28 : f32 to vector<1x1xf32>
    %55 = arith.divf %53, %54 : vector<1x1xf32>
    %c0_29 = arith.constant 0 : index
    %c0_30 = arith.constant 0 : index
    %56 = vector.load %arg6[%c0_29, %c0_30] : memref<1x1xf32, #tpu.memory_space<vmem>>, vector<1x1xf32>
    tpu.vector_store %arg6[%c0_29, %c0_30], %55 {strides = array<i32>} : memref<1x1xf32, #tpu.memory_space<vmem>>, vector<1x1xf32>,
    %cst_31 = arith.constant dense<0.000000e+00> : vector<4x4xf32>
    %57 = tpu.matmul %34, %5, %cst_31 {dimension_numbers = #tpu.dot_dimension_numbers<[1], [1], [0], [0], [0, 0, 1, 0], [], []>} : vector<4x32xf32>, vector<4x32xf32>, vector<4x4xf32> -> vector<4x4xf32>
    %58 = vector.broadcast %6 : vector<1x4xf32> to vector<4x4xf32>
    %59 = arith.addf %57, %58 : vector<4x4xf32>
    %cst_32 = arith.constant dense<0xFF800000> : vector<4xf32>
    %60 = vector.multi_reduction <maximumf>, %59, %cst_32 [1] : vector<4x4xf32> to vector<4xf32>
    %61 = vector.shape_cast %60 : vector<4xf32> to vector<4x1xf32>
    %62 = vector.broadcast %61 : vector<4x1xf32> to vector<4x4xf32>
    %63 = arith.subf %59, %62 : vector<4x4xf32>
    %64 = math.exp %63 : vector<4x4xf32>
    %cst_33 = arith.constant dense<0.000000e+00> : vector<4xf32>
    %65 = vector.multi_reduction <add>, %64, %cst_33 [1] : vector<4x4xf32> to vector<4xf32>
    %66 = vector.shape_cast %65 : vector<4xf32> to vector<4x1xf32>
    %67 = vector.broadcast %66 : vector<4x1xf32> to vector<4x4xf32>
    %68 = arith.divf %64, %67 : vector<4x4xf32>
    %c0_34 = arith.constant 0 : index
    %c0_35 = arith.constant 0 : index
    %69 = vector.load %arg5[%c0_34, %c0_35] : memref<4x4xf32, #tpu.memory_space<vmem>>, vector<4x4xf32>
    tpu.vector_store %arg5[%c0_34, %c0_35], %68 {strides = array<i32>} : memref<4x4xf32, #tpu.memory_space<vmem>>, vector<4x4xf32>,
    return
  }
}

</mosaic_0001>

<bundles_post_ra>
// kernel: trln_forward.1
= control target key start
LH: loop header
LB: loop body
LE: loop exit
PB: predicated region body
PF: predicated region fallthrough
CT: control target
= control target key end

     0   :  { %12 = vsyncpa [#allocation3], 0  ;;  %s6837_s0 = inlined_call_operand.vmem [shape: f32[4,1028], index: 0, kind: input, shape index: {}]   ;;  %s6838_s1 = inlined_call_operand.hbm [shape: bf16[1024,1024], index: 1, kind: input, shape index: {}]   ;;  %s6839_s2 = inlined_call_operand.hbm [shape: bf16[1024,256], index: 2, kind: input, shape index: {}]   ;;  %s6840_s3 = inlined_call_operand.vmem [shape: bf16[256,32], index: 3, kind: input, shape index: {}]   ;;  %s6841_s4 = inlined_call_operand.hbm [shape: f32[8,1024], index: 4, kind: input, shape index: {}]   ;;  %s6842_s5 = inlined_call_operand.hbm [shape: f32[4,4], index: 5, kind: output, shape index: {0}]   ;;  %s6843_s6 = inlined_call_operand.hbm [shape: f32[1,1], index: 6, kind: output, shape index: {1}]  }
   0x1   :  { %13 = vsyncpa [#allocation6], 0 }
   0x2   :  { %14 = vsyncpa [#allocation4], 0 }
   0x3   :  { %15 = vsyncpa [#allocation10], 0  ;;  %s6542_s21 = smov [#allocation5]   ;;  %s6424_s25 = scalar_lea.hbm %s6839_s2, 16384 }
   0x4   :  { %s35_s22 = sshll.u32 %s6542_s21, 4  ;;  %p6425_p0 = scmp.ne.s32.totalorder %s6839_s2, %s6424_s25  ;;  %s36_s22 = int_to_ptr.vmem [resolvable:$true] %s35_s22 }
   0x5   :  { %p6428_p1 = scmp.lt.u32.totalorder %s6424_s25, %s6839_s2 }
   0x7   :  { %p6430_p2 = pnand %p6428_p1, %p6425_p0 }
   0x9   :  { %6433 = shalt.err (!%p6430_p2)
}
   0xa   :  { %s6434_s30 = scalar_lea.vmem %s36_s22, 16384  ;;  %p6439_p4 = scmp.lt.s32.totalorder %s36_s22, %s36_s22 }
   0xb   :  { %p6435_p3 = scmp.ne.s32.totalorder %s36_s22, %s6434_s30  ;;  %p6440_p5 = scmp.lt.s32.totalorder %s6434_s30, %s6434_s30 }
   0xd   :  { %p6441_p6 = por %p6440_p5, %p6439_p4 }
   0xf   :  { %p6442_p7 = pnand %p6441_p6, %p6435_p3 }
  0x11   :  { %6445 = shalt.err (!%p6442_p7)
}
  0x12   :  { %s6543_s7 = smov 128   ;;  %s6544_s8 = smov 8  }
  0x13   :  { %41 = dma.hbm_to_vmem [thread:$0]  %s6839_s2, 16384, %s36_s22, [#allocation6], %s6543_s7, %s6543_s7, %s6544_s8  }
  0x14   :  { %s6545_s11 = smov [#allocation2]   ;;  %s6446_s15 = scalar_lea.hbm %s6838_s1, 65536 }
  0x15   :  { %s23_s12 = sshll.u32 %s6545_s11, 4  ;;  %p6447_p8 = scmp.ne.s32.totalorder %s6838_s1, %s6446_s15  ;;  %s24_s12 = int_to_ptr.vmem [resolvable:$true] %s23_s12 }
  0x16   :  { %p6450_p9 = scmp.lt.u32.totalorder %s6446_s15, %s6838_s1 }
  0x18   :  { %p6452_p10 = pnand %p6450_p9, %p6447_p8 }
  0x1a   :  { %6455 = shalt.err (!%p6452_p10)
}
  0x1b   :  { %s6456_s20 = scalar_lea.vmem %s24_s12, 65536  ;;  %p6461_p12 = scmp.lt.s32.totalorder %s24_s12, %s24_s12 }
  0x1c   :  { %p6457_p11 = scmp.ne.s32.totalorder %s24_s12, %s6456_s20  ;;  %p6462_p13 = scmp.lt.s32.totalorder %s6456_s20, %s6456_s20 }
  0x1e   :  { %p6463_p0 = por %p6462_p13, %p6461_p12 }
  0x20   :  { %p6464_p1 = pnand %p6463_p0, %p6457_p11 }
  0x22   :  { %6467 = shalt.err (!%p6464_p1)
}
  0x23   :  { %s6546_s2 = smov 512   ;;  %s6547_s21 = smov 32  }
  0x24   :  { %29 = dma.hbm_to_vmem [thread:$0]  %s6838_s1, 65536, %s24_s12, [#allocation3], %s6546_s2, %s6546_s2, %s6547_s21  }
  0x25   :  { %s6548_s24 = smov [#allocation7]   ;;  %s6468_s28 = scalar_lea.hbm %s6841_s4, 1024 }
  0x26   :  { %s50_s25 = sshll.u32 %s6548_s24, 4  ;;  %p6469_p2 = scmp.ne.s32.totalorder %s6841_s4, %s6468_s28  ;;  %s51_s25 = int_to_ptr.vmem [resolvable:$true] %s50_s25 }
  0x27   :  { %p6472_p3 = scmp.lt.u32.totalorder %s6468_s28, %s6841_s4 }
  0x29   :  { %p6474_p4 = pnand %p6472_p3, %p6469_p2 }
  0x2b   :  { %6477 = shalt.err (!%p6474_p4)
}
  0x2c   :  { %s6478_s9 = scalar_lea.vmem %s51_s25, 1024  ;;  %p6483_p6 = scmp.lt.s32.totalorder %s51_s25, %s51_s25 }
  0x2d   :  { %p6479_p5 = scmp.ne.s32.totalorder %s51_s25, %s6478_s9  ;;  %p6484_p7 = scmp.lt.s32.totalorder %s6478_s9, %s6478_s9 }
  0x2f   :  { %p6485_p8 = por %p6484_p7, %p6483_p6 }
  0x31   :  { %p6486_p9 = pnand %p6485_p8, %p6479_p5 }
  0x33   :  { %6489 = shalt.err (!%p6486_p9)
}
  0x34   :  { %53 = dma.hbm_to_vmem [thread:$0]  %s6841_s4, 1024, %s51_s25, [#allocation6]  }
  0x35   :  { %6534 = dma.done.wait [#allocation3], 65536  }
  0x36   :  { %6535 = vsyncadd [#allocation3], 4294901760 }
  0x37   :  { %6536 = dma.done.wait [#allocation6], 17408  }
  0x38   :  { %6537 = vsyncadd [#allocation6], 4294949888  ;;  %v96_v0 = vld [vmem:[#allocation2] sm:$0xff]  ;;  %v6634_v58 = vld [vmem:[%s6837_s0 + $0x10] sm:$0xff]  ;;  %vm6550_vm10 = vmmov 0   ;;  %vm5082_vm11 = vcmask 1043456  }
  0x39   :  { %v100_v1 = vld [vmem:[#allocation2 + $0x20] sm:$0xff]  ;;  %v74_v61 = vcombine.high %v6634_v58, %v6634_v58  ;;  %vm5078_vm12 = vcmask 31744   ;;  %vm5232_vm13 = vcmask 27648   ;;  %vm5273_vm14 = vcmask 261120  }
  0x3a   :  { %v352_v2 = vld [vmem:[#allocation2 + $0x800] sm:$0xff]  ;;  %v5391_v3 = vcombine.high %v96_v0, %v100_v1  ;;  %v5390_v5 = vcombine.low %v96_v0, %v100_v1  ;;  %vm5249_vm15 = vcmask 257024  }
  0x3b   :  { %v356_v4 = vld [vmem:[#allocation2 + $0x820] sm:$0xff] }
  0x3c   :  { %v104_v6 = vld [vmem:[#allocation2 + $0x40] sm:$0xff]  ;;  %v5647_v8 = vcombine.high %v352_v2, %v356_v4  ;;  %v5646_v9 = vcombine.low %v352_v2, %v356_v4  ;;  %3209 = vmatprep.subr.bf16.mxu1 %v5391_v3  ;;  %v6640_v2 = vpack.c.bf16 %v74_v61, %v74_v61 }
  0x3d   :  { %v108_v7 = vld [vmem:[#allocation2 + $0x60] sm:$0xff]  ;;  %3210 = vmatpush1.bf16.msra.mxu1 %v5390_v5 }
  0x3e   :  { %v5399_v10 = vcombine.high %v104_v6, %v108_v7  ;;  %v360_v11 = vld [vmem:[#allocation2 + $0x840] sm:$0xff]  ;;  %3291 = vmatprep.subr.bf16.mxu0 %v5647_v8  ;;  %v5398_v18 = vcombine.low %v104_v6, %v108_v7  ;;  %3323 = vmatprep.mubr.bf16.mxu0 %v6640_v2 }
  0x3f   :  { %v364_v12 = vld [vmem:[#allocation2 + $0x860] sm:$0xff]  ;;  %3292 = vmatpush1.bf16.msra.mxu0 %v5646_v9 }
  0x40   :  { %v112_v13 = vld [vmem:[#allocation2 + $0x80] sm:$0xff]  ;;  %v5655_v14 = vcombine.high %v360_v11, %v364_v12  ;;  %3211 = vmatprep.subr.bf16.mxu1 %v5399_v10  ;;  %v5654_v19 = vcombine.low %v360_v11, %v364_v12 }
  0x41   :  { %v116_v15 = vld [vmem:[#allocation2 + $0xa0] sm:$0xff]  ;;  %3212 = vmatpush1.bf16.msra.mxu1 %v5398_v18 }
  0x42   :  { %v368_v16 = vld [vmem:[#allocation2 + $0x880] sm:$0xff]  ;;  %v5407_v20 = vcombine.high %v112_v13, %v116_v15  ;;  %3293 = vmatprep.subr.bf16.mxu0 %v5655_v14  ;;  %v5406_v26 = vcombine.low %v112_v13, %v116_v15 }
  0x43   :  { %v372_v17 = vld [vmem:[#allocation2 + $0x8a0] sm:$0xff]  ;;  %3294 = vmatpush1.bf16.msra.mxu0 %v5654_v19 }
  0x44   :  { %v5663_v21 = vcombine.high %v368_v16, %v372_v17  ;;  %v120_v22 = vld [vmem:[#allocation2 + $0xc0] sm:$0xff]  ;;  %3213 = vmatprep.subr.bf16.mxu1 %v5407_v20  ;;  %v5662_v27 = vcombine.low %v368_v16, %v372_v17 }
  0x45   :  { %v124_v23 = vld [vmem:[#allocation2 + $0xe0] sm:$0xff]  ;;  %3214 = vmatpush1.bf16.msra.mxu1 %v5406_v26 }
  0x46   :  { %v376_v24 = vld [vmem:[#allocation2 + $0x8c0] sm:$0xff]  ;;  %v5415_v28 = vcombine.high %v120_v22, %v124_v23  ;;  %3295 = vmatprep.subr.bf16.mxu0 %v5663_v21  ;;  %v5414_v34 = vcombine.low %v120_v22, %v124_v23 }
  0x47   :  { %v380_v25 = vld [vmem:[#allocation2 + $0x8e0] sm:$0xff]  ;;  %3296 = vmatpush1.bf16.msra.mxu0 %v5662_v27 }
  0x48   :  { %v5671_v29 = vcombine.high %v376_v24, %v380_v25  ;;  %v128_v30 = vld [vmem:[#allocation2 + $0x100] sm:$0xff]  ;;  %3215 = vmatprep.subr.bf16.mxu1 %v5415_v28  ;;  %v5670_v35 = vcombine.low %v376_v24, %v380_v25 }
  0x49   :  { %v132_v31 = vld [vmem:[#allocation2 + $0x120] sm:$0xff]  ;;  %3216 = vmatpush1.bf16.msra.mxu1 %v5414_v34 }
  0x4a   :  { %v384_v32 = vld [vmem:[#allocation2 + $0x900] sm:$0xff]  ;;  %v5423_v36 = vcombine.high %v128_v30, %v132_v31  ;;  %3297 = vmatprep.subr.bf16.mxu0 %v5671_v29  ;;  %v5422_v42 = vcombine.low %v128_v30, %v132_v31 }
  0x4b   :  { %v388_v33 = vld [vmem:[#allocation2 + $0x920] sm:$0xff]  ;;  %3298 = vmatpush1.bf16.msra.mxu0 %v5670_v35 }
  0x4c   :  { %v5679_v37 = vcombine.high %v384_v32, %v388_v33  ;;  %v136_v38 = vld [vmem:[#allocation2 + $0x140] sm:$0xff]  ;;  %3217 = vmatprep.subr.bf16.mxu1 %v5423_v36  ;;  %v5678_v43 = vcombine.low %v384_v32, %v388_v33 }
  0x4d   :  { %v140_v39 = vld [vmem:[#allocation2 + $0x160] sm:$0xff]  ;;  %3218 = vmatpush1.bf16.msra.mxu1 %v5422_v42 }
  0x4e   :  { %v392_v40 = vld [vmem:[#allocation2 + $0x940] sm:$0xff]  ;;  %v5431_v44 = vcombine.high %v136_v38, %v140_v39  ;;  %3299 = vmatprep.subr.bf16.mxu0 %v5679_v37  ;;  %v5430_v50 = vcombine.low %v136_v38, %v140_v39 }
  0x4f   :  { %v396_v41 = vld [vmem:[#allocation2 + $0x960] sm:$0xff]  ;;  %3300 = vmatpush1.bf16.msra.mxu0 %v5678_v43 }
  0x50   :  { %v5687_v45 = vcombine.high %v392_v40, %v396_v41  ;;  %v144_v46 = vld [vmem:[#allocation2 + $0x180] sm:$0xff]  ;;  %3219 = vmatprep.subr.bf16.mxu1 %v5431_v44  ;;  %v5686_v51 = vcombine.low %v392_v40, %v396_v41 }
  0x51   :  { %v148_v47 = vld [vmem:[#allocation2 + $0x1a0] sm:$0xff]  ;;  %3220 = vmatpush1.bf16.msra.mxu1 %v5430_v50 }
  0x52   :  { %v400_v48 = vld [vmem:[#allocation2 + $0x980] sm:$0xff]  ;;  %v5439_v52 = vcombine.high %v144_v46, %v148_v47  ;;  %3301 = vmatprep.subr.bf16.mxu0 %v5687_v45  ;;  %v5438_v62 = vcombine.low %v144_v46, %v148_v47 }
  0x53   :  { %v404_v49 = vld [vmem:[#allocation2 + $0x9a0] sm:$0xff]  ;;  %3302 = vmatpush1.bf16.msra.mxu0 %v5686_v51 }
  0x54   :  { %v6627_v53 = vld [vmem:[%s6837_s0] sm:$0xff]  ;;  %v5695_v54 = vcombine.high %v400_v48, %v404_v49  ;;  %3221 = vmatprep.subr.bf16.mxu1 %v5439_v52  ;;  %v5694_v0 = vcombine.low %v400_v48, %v404_v49 }
  0x55   :  { %v152_v55 = vld [vmem:[#allocation2 + $0x1c0] sm:$0xff]  ;;  %v72_v57 = vcombine.high %v6627_v53, %v6627_v53  ;;  %3222 = vmatpush1.bf16.msra.mxu1 %v5438_v62 }
  0x56   :  { %v156_v56 = vld [vmem:[#allocation2 + $0x1e0] sm:$0xff]  ;;  %3303 = vmatprep.subr.bf16.mxu0 %v5695_v54 }
  0x57   :  { %v408_v59 = vld [vmem:[#allocation2 + $0x9c0] sm:$0xff]  ;;  %v6638_v63 = vpack.c.bf16 %v72_v57, %v72_v57  ;;  %v5447_v1 = vcombine.high %v152_v55, %v156_v56  ;;  %v5446_v8 = vcombine.low %v152_v55, %v156_v56  ;;  %3304 = vmatpush1.bf16.msra.mxu0 %v5694_v0 }
  0x58   :  { %v412_v60 = vld [vmem:[#allocation2 + $0x9e0] sm:$0xff] }
  0x59   :  { %v5703_v3 = vcombine.high %v408_v59, %v412_v60  ;;  %v160_v4 = vld [vmem:[#allocation2 + $0x200] sm:$0xff]  ;;  %3241 = vmatprep.mubr.bf16.mxu1 %v6638_v63  ;;  %3223 = vmatprep.subr.bf16.mxu1 %v5447_v1  ;;  %v5702_v9 = vcombine.low %v408_v59, %v412_v60 }
  0x5a   :  { %v164_v5 = vld [vmem:[#allocation2 + $0x220] sm:$0xff]  ;;  %3224 = vmatpush1.bf16.msra.mxu1 %v5446_v8 }
  0x5b   :  { %v416_v6 = vld [vmem:[#allocation2 + $0xa00] sm:$0xff]  ;;  %v5455_v10 = vcombine.high %v160_v4, %v164_v5  ;;  %3305 = vmatprep.subr.bf16.mxu0 %v5703_v3  ;;  %v5454_v16 = vcombine.low %v160_v4, %v164_v5 }
  0x5c   :  { %v420_v7 = vld [vmem:[#allocation2 + $0xa20] sm:$0xff]  ;;  %3306 = vmatpush1.bf16.msra.mxu0 %v5702_v9 }
  0x5d   :  { %v5711_v11 = vcombine.high %v416_v6, %v420_v7  ;;  %v168_v12 = vld [vmem:[#allocation2 + $0x240] sm:$0xff]  ;;  %3225 = vmatprep.subr.bf16.mxu1 %v5455_v10  ;;  %v5710_v17 = vcombine.low %v416_v6, %v420_v7 }
  0x5e   :  { %v172_v13 = vld [vmem:[#allocation2 + $0x260] sm:$0xff]  ;;  %3226 = vmatpush1.bf16.msra.mxu1 %v5454_v16 }
  0x5f   :  { %v424_v14 = vld [vmem:[#allocation2 + $0xa40] sm:$0xff]  ;;  %v5463_v18 = vcombine.high %v168_v12, %v172_v13  ;;  %3307 = vmatprep.subr.bf16.mxu0 %v5711_v11  ;;  %v5462_v24 = vcombine.low %v168_v12, %v172_v13  ;;  %v6647_v12 = vld [vmem:[%s6837_s0 + $0x8] sm:$0xff] }
  0x60   :  { %v428_v15 = vld [vmem:[#allocation2 + $0xa60] sm:$0xff]  ;;  %3308 = vmatpush1.bf16.msra.mxu0 %v5710_v17 }
  0x61   :  { %v5719_v19 = vcombine.high %v424_v14, %v428_v15  ;;  %v176_v20 = vld [vmem:[#allocation2 + $0x280] sm:$0xff]  ;;  %3227 = vmatprep.subr.bf16.mxu1 %v5463_v18  ;;  %v5718_v25 = vcombine.low %v424_v14, %v428_v15  ;;  %v6652_v14 = vld [vmem:[%s6837_s0 + $0x18] sm:$0xff] }
  0x62   :  { %v180_v21 = vld [vmem:[#allocation2 + $0x2a0] sm:$0xff]  ;;  %3228 = vmatpush1.bf16.msra.mxu1 %v5462_v24  ;;  %v75_v24 = vcombine.high %v6652_v14, %v6652_v14 }
  0x63   :  { %v432_v22 = vld [vmem:[#allocation2 + $0xa80] sm:$0xff]  ;;  %v5471_v26 = vcombine.high %v176_v20, %v180_v21  ;;  %3309 = vmatprep.subr.bf16.mxu0 %v5719_v19  ;;  %v5470_v32 = vcombine.low %v176_v20, %v180_v21  ;;  %v73_v20 = vcombine.high %v6647_v12, %v6647_v12  ;;  %v6658_v21 = vpack.c.bf16 %v6627_v53, %v6627_v53 }
  0x64   :  { %v436_v23 = vld [vmem:[#allocation2 + $0xaa0] sm:$0xff]  ;;  %3310 = vmatpush1.bf16.msra.mxu0 %v5718_v25 }
  0x65   :  { %v5727_v27 = vcombine.high %v432_v22, %v436_v23  ;;  %v184_v28 = vld [vmem:[#allocation2 + $0x2c0] sm:$0xff]  ;;  %3229 = vmatprep.subr.bf16.mxu1 %v5471_v26  ;;  %v5726_v33 = vcombine.low %v432_v22, %v436_v23  ;;  %v6664_v26 = vpack.c.bf16 %v6634_v58, %v6634_v58 }
  0x66   :  { %v188_v29 = vld [vmem:[#allocation2 + $0x2e0] sm:$0xff]  ;;  %3230 = vmatpush1.bf16.msra.mxu1 %v5470_v32 }
  0x67   :  { %v440_v30 = vld [vmem:[#allocation2 + $0xac0] sm:$0xff]  ;;  %v5479_v34 = vcombine.high %v184_v28, %v188_v29  ;;  %3311 = vmatprep.subr.bf16.mxu0 %v5727_v27  ;;  %v5478_v40 = vcombine.low %v184_v28, %v188_v29 }
  0x68   :  { %v444_v31 = vld [vmem:[#allocation2 + $0xae0] sm:$0xff]  ;;  %3312 = vmatpush1.bf16.msra.mxu0 %v5726_v33  ;;  %v6666_v33 = vpack.c.bf16 %v73_v20, %v73_v20 }
  0x69   :  { %v5735_v35 = vcombine.high %v440_v30, %v444_v31  ;;  %v192_v36 = vld [vmem:[#allocation2 + $0x300] sm:$0xff]  ;;  %3231 = vmatprep.subr.bf16.mxu1 %v5479_v34  ;;  %v5734_v41 = vcombine.low %v440_v30, %v444_v31  ;;  %v6669_v34 = vpack.c.bf16 %v75_v24, %v75_v24 }
  0x6a   :  { %v196_v37 = vld [vmem:[#allocation2 + $0x320] sm:$0xff]  ;;  %3232 = vmatpush1.bf16.msra.mxu1 %v5478_v40 }
  0x6b   :  { %v448_v38 = vld [vmem:[#allocation2 + $0xb00] sm:$0xff]  ;;  %v5487_v42 = vcombine.high %v192_v36, %v196_v37  ;;  %3313 = vmatprep.subr.bf16.mxu0 %v5735_v35  ;;  %v5486_v48 = vcombine.low %v192_v36, %v196_v37 }
  0x6c   :  { %v452_v39 = vld [vmem:[#allocation2 + $0xb20] sm:$0xff]  ;;  %3314 = vmatpush1.bf16.msra.mxu0 %v5734_v41 }
  0x6d   :  { %v5743_v43 = vcombine.high %v448_v38, %v452_v39  ;;  %v200_v44 = vld [vmem:[#allocation2 + $0x340] sm:$0xff]  ;;  %3233 = vmatprep.subr.bf16.mxu1 %v5487_v42  ;;  %v5742_v49 = vcombine.low %v448_v38, %v452_v39 }
  0x6e   :  { %v204_v45 = vld [vmem:[#allocation2 + $0x360] sm:$0xff]  ;;  %3234 = vmatpush1.bf16.msra.mxu1 %v5486_v48 }
  0x6f   :  { %v456_v46 = vld [vmem:[#allocation2 + $0xb40] sm:$0xff]  ;;  %v5495_v50 = vcombine.high %v200_v44, %v204_v45  ;;  %3315 = vmatprep.subr.bf16.mxu0 %v5743_v43  ;;  %v5494_v57 = vcombine.low %v200_v44, %v204_v45 }
  0x70   :  { %v460_v47 = vld [vmem:[#allocation2 + $0xb60] sm:$0xff]  ;;  %3316 = vmatpush1.bf16.msra.mxu0 %v5742_v49 }
  0x71   :  { %v5751_v51 = vcombine.high %v456_v46, %v460_v47  ;;  %v208_v52 = vld [vmem:[#allocation2 + $0x380] sm:$0xff]  ;;  %3235 = vmatprep.subr.bf16.mxu1 %v5495_v50  ;;  %v5750_v59 = vcombine.low %v456_v46, %v460_v47 }
  0x72   :  { %v212_v54 = vld [vmem:[#allocation2 + $0x3a0] sm:$0xff]  ;;  %3236 = vmatpush1.bf16.msra.mxu1 %v5494_v57 }
  0x73   :  { %v464_v55 = vld [vmem:[#allocation2 + $0xb80] sm:$0xff]  ;;  %v5503_v60 = vcombine.high %v208_v52, %v212_v54  ;;  %3317 = vmatprep.subr.bf16.mxu0 %v5751_v51  ;;  %v5502_v4 = vcombine.low %v208_v52, %v212_v54 }
  0x74   :  { %v468_v56 = vld [vmem:[#allocation2 + $0xba0] sm:$0xff]  ;;  %3318 = vmatpush1.bf16.msra.mxu0 %v5750_v59 }
  0x75   :  { %v5759_v61 = vcombine.high %v464_v55, %v468_v56  ;;  %v216_v62 = vld [vmem:[#allocation2 + $0x3c0] sm:$0xff]  ;;  %3237 = vmatprep.subr.bf16.mxu1 %v5503_v60  ;;  %v5758_v5 = vcombine.low %v464_v55, %v468_v56 }
  0x76   :  { %v220_v0 = vld [vmem:[#allocation2 + $0x3e0] sm:$0xff]  ;;  %3238 = vmatpush1.bf16.msra.mxu1 %v5502_v4 }
  0x77   :  { %v472_v1 = vld [vmem:[#allocation2 + $0xbc0] sm:$0xff]  ;;  %v5511_v6 = vcombine.high %v216_v62, %v220_v0  ;;  %3319 = vmatprep.subr.bf16.mxu0 %v5759_v61  ;;  %v5510_v13 = vcombine.low %v216_v62, %v220_v0 }
  0x78   :  { %v476_v3 = vld [vmem:[#allocation2 + $0xbe0] sm:$0xff]  ;;  %3320 = vmatpush1.bf16.msra.mxu0 %v5758_v5 }
  0x79   :  { %v5767_v7 = vcombine.high %v472_v1, %v476_v3  ;;  %v224_v8 = vld [vmem:[#allocation2 + $0x400] sm:$0xff]  ;;  %3239 = vmatprep.subr.bf16.mxu1 %v5511_v6  ;;  %v5766_v15 = vcombine.low %v472_v1, %v476_v3 }
  0x7a   :  { %v228_v9 = vld [vmem:[#allocation2 + $0x420] sm:$0xff]  ;;  %3240 = vmatpush1.bf16.msra.mxu1 %v5510_v13 }
  0x7b   :  { %v480_v10 = vld [vmem:[#allocation2 + $0xc00] sm:$0xff]  ;;  %v5519_v16 = vcombine.high %v224_v8, %v228_v9  ;;  %3321 = vmatprep.subr.bf16.mxu0 %v5767_v7  ;;  %v5518_v25 = vcombine.low %v224_v8, %v228_v9 }
  0x7c   :  { %v484_v11 = vld [vmem:[#allocation2 + $0xc20] sm:$0xff]  ;;  %3322 = vmatpush1.bf16.msra.mxu0 %v5766_v15 }
  0x7d   :  { %v5775_v17 = vcombine.high %v480_v10, %v484_v11  ;;  %v232_v18 = vld [vmem:[#allocation2 + $0x440] sm:$0xff]  ;;  %3250 = vmatprep.subr.bf16.mxu1 %v5519_v16  ;;  %v5774_v27 = vcombine.low %v480_v10, %v484_v11  ;;  %3242 = vmatmul.mubr.bf16.vlgmr.msra.gmra.mrb[0].mxu1 %v6658_v21 }
  0x7e   :  { %v236_v19 = vld [vmem:[#allocation2 + $0x460] sm:$0xff]  ;;  %3251 = vmatpush1.bf16.msra.mxu1 %v5518_v25  ;;  %3282 = vmatprep.mubr.bf16.mxu1 %v6666_v33 }
  0x7f   :  { %v488_v22 = vld [vmem:[#allocation2 + $0xc40] sm:$0xff]  ;;  %v5527_v28 = vcombine.high %v232_v18, %v236_v19  ;;  %3332 = vmatprep.subr.bf16.mxu0 %v5775_v17  ;;  %3324 = vmatmul.mubr.bf16.vlgmr.msra.gmra.mrb[0].mxu0 %v6664_v26  ;;  %v5526_v58 = vcombine.low %v232_v18, %v236_v19 }
  0x80   :  { %v492_v23 = vld [vmem:[#allocation2 + $0xc60] sm:$0xff]  ;;  %3333 = vmatpush1.bf16.msra.mxu0 %v5774_v27  ;;  %3364 = vmatprep.mubr.bf16.mxu0 %v6669_v34 }
  0x81   :  { %v240_v29 = vld [vmem:[#allocation2 + $0x480] sm:$0xff]  ;;  %v5783_v53 = vcombine.high %v488_v22, %v492_v23  ;;  %3252 = vmatprep.subr.bf16.mxu1 %v5527_v28  ;;  %v5782_v35 = vcombine.low %v488_v22, %v492_v23 }
  0x82   :  { %v244_v30 = vld [vmem:[#allocation2 + $0x4a0] sm:$0xff]  ;;  %3253 = vmatpush1.bf16.msra.mxu1 %v5526_v58 }
  0x83   :  { %v496_v31 = vld [vmem:[#allocation2 + $0xc80] sm:$0xff]  ;;  %v5535_v36 = vcombine.high %v240_v29, %v244_v30  ;;  %3334 = vmatprep.subr.bf16.mxu0 %v5783_v53  ;;  %v5534_v42 = vcombine.low %v240_v29, %v244_v30 }
  0x84   :  { %v500_v32 = vld [vmem:[#allocation2 + $0xca0] sm:$0xff]  ;;  %3335 = vmatpush1.bf16.msra.mxu0 %v5782_v35 }
  0x85   :  { %v248_v37 = vld [vmem:[#allocation2 + $0x4c0] sm:$0xff]  ;;  %v5791_v40 = vcombine.high %v496_v31, %v500_v32  ;;  %3254 = vmatprep.subr.bf16.mxu1 %v5535_v36  ;;  %v5790_v43 = vcombine.low %v496_v31, %v500_v32 }
  0x86   :  { %v252_v38 = vld [vmem:[#allocation2 + $0x4e0] sm:$0xff]  ;;  %3255 = vmatpush1.bf16.msra.mxu1 %v5534_v42 }
  0x87   :  { %v504_v39 = vld [vmem:[#allocation2 + $0xcc0] sm:$0xff]  ;;  %v5543_v44 = vcombine.high %v248_v37, %v252_v38  ;;  %3336 = vmatprep.subr.bf16.mxu0 %v5791_v40  ;;  %v5542_v50 = vcombine.low %v248_v37, %v252_v38 }
  0x88   :  { %v508_v41 = vld [vmem:[#allocation2 + $0xce0] sm:$0xff]  ;;  %3337 = vmatpush1.bf16.msra.mxu0 %v5790_v43 }
  0x89   :  { %v256_v45 = vld [vmem:[#allocation2 + $0x500] sm:$0xff]  ;;  %v5799_v48 = vcombine.high %v504_v39, %v508_v41  ;;  %3256 = vmatprep.subr.bf16.mxu1 %v5543_v44  ;;  %v5798_v51 = vcombine.low %v504_v39, %v508_v41 }
  0x8a   :  { %v260_v46 = vld [vmem:[#allocation2 + $0x520] sm:$0xff]  ;;  %3257 = vmatpush1.bf16.msra.mxu1 %v5542_v50 }
  0x8b   :  { %v512_v47 = vld [vmem:[#allocation2 + $0xd00] sm:$0xff]  ;;  %v5551_v52 = vcombine.high %v256_v45, %v260_v46  ;;  %3338 = vmatprep.subr.bf16.mxu0 %v5799_v48  ;;  %v5550_v60 = vcombine.low %v256_v45, %v260_v46 }
  0x8c   :  { %v516_v49 = vld [vmem:[#allocation2 + $0xd20] sm:$0xff]  ;;  %3339 = vmatpush1.bf16.msra.mxu0 %v5798_v51 }
  0x8d   :  { %v264_v54 = vld [vmem:[#allocation2 + $0x540] sm:$0xff]  ;;  %v5807_v57 = vcombine.high %v512_v47, %v516_v49  ;;  %3258 = vmatprep.subr.bf16.mxu1 %v5551_v52  ;;  %v5806_v61 = vcombine.low %v512_v47, %v516_v49 }
  0x8e   :  { %v268_v55 = vld [vmem:[#allocation2 + $0x560] sm:$0xff]  ;;  %3259 = vmatpush1.bf16.msra.mxu1 %v5550_v60 }
  0x8f   :  { %v520_v56 = vld [vmem:[#allocation2 + $0xd40] sm:$0xff]  ;;  %v5559_v62 = vcombine.high %v264_v54, %v268_v55  ;;  %3340 = vmatprep.subr.bf16.mxu0 %v5807_v57  ;;  %v5558_v6 = vcombine.low %v264_v54, %v268_v55 }
  0x90   :  { %v524_v59 = vld [vmem:[#allocation2 + $0xd60] sm:$0xff]  ;;  %3341 = vmatpush1.bf16.msra.mxu0 %v5806_v61 }
  0x91   :  { %v272_v0 = vld [vmem:[#allocation2 + $0x580] sm:$0xff]  ;;  %v5815_v4 = vcombine.high %v520_v56, %v524_v59  ;;  %3260 = vmatprep.subr.bf16.mxu1 %v5559_v62  ;;  %v5814_v7 = vcombine.low %v520_v56, %v524_v59 }
  0x92   :  { %v276_v1 = vld [vmem:[#allocation2 + $0x5a0] sm:$0xff]  ;;  %3261 = vmatpush1.bf16.msra.mxu1 %v5558_v6 }
  0x93   :  { %v528_v3 = vld [vmem:[#allocation2 + $0xd80] sm:$0xff]  ;;  %v5567_v8 = vcombine.high %v272_v0, %v276_v1  ;;  %3342 = vmatprep.subr.bf16.mxu0 %v5815_v4  ;;  %v5566_v16 = vcombine.low %v272_v0, %v276_v1 }
  0x94   :  { %v532_v5 = vld [vmem:[#allocation2 + $0xda0] sm:$0xff]  ;;  %3343 = vmatpush1.bf16.msra.mxu0 %v5814_v7 }
  0x95   :  { %v280_v9 = vld [vmem:[#allocation2 + $0x5c0] sm:$0xff]  ;;  %v5823_v13 = vcombine.high %v528_v3, %v532_v5  ;;  %3262 = vmatprep.subr.bf16.mxu1 %v5567_v8  ;;  %v5822_v17 = vcombine.low %v528_v3, %v532_v5 }
  0x96   :  { %v284_v10 = vld [vmem:[#allocation2 + $0x5e0] sm:$0xff]  ;;  %3263 = vmatpush1.bf16.msra.mxu1 %v5566_v16 }
  0x97   :  { %v536_v11 = vld [vmem:[#allocation2 + $0xdc0] sm:$0xff]  ;;  %v5575_v18 = vcombine.high %v280_v9, %v284_v10  ;;  %3344 = vmatprep.subr.bf16.mxu0 %v5823_v13  ;;  %v5574_v25 = vcombine.low %v280_v9, %v284_v10 }
  0x98   :  { %v540_v15 = vld [vmem:[#allocation2 + $0xde0] sm:$0xff]  ;;  %3345 = vmatpush1.bf16.msra.mxu0 %v5822_v17 }
  0x99   :  { %v288_v19 = vld [vmem:[#allocation2 + $0x600] sm:$0xff]  ;;  %v5831_v23 = vcombine.high %v536_v11, %v540_v15  ;;  %3264 = vmatprep.subr.bf16.mxu1 %v5575_v18  ;;  %v5830_v27 = vcombine.low %v536_v11, %v540_v15 }
  0x9a   :  { %v292_v20 = vld [vmem:[#allocation2 + $0x620] sm:$0xff]  ;;  %3265 = vmatpush1.bf16.msra.mxu1 %v5574_v25 }
  0x9b   :  { %v544_v22 = vld [vmem:[#allocation2 + $0xe00] sm:$0xff]  ;;  %v5583_v28 = vcombine.high %v288_v19, %v292_v20  ;;  %3346 = vmatprep.subr.bf16.mxu0 %v5831_v23  ;;  %v5582_v58 = vcombine.low %v288_v19, %v292_v20 }
  0x9c   :  { %v548_v24 = vld [vmem:[#allocation2 + $0xe20] sm:$0xff]  ;;  %3347 = vmatpush1.bf16.msra.mxu0 %v5830_v27 }
  0x9d   :  { %v296_v29 = vld [vmem:[#allocation2 + $0x640] sm:$0xff]  ;;  %v5839_v31 = vcombine.high %v544_v22, %v548_v24  ;;  %3266 = vmatprep.subr.bf16.mxu1 %v5583_v28  ;;  %v5838_v35 = vcombine.low %v544_v22, %v548_v24 }
  0x9e   :  { %v300_v30 = vld [vmem:[#allocation2 + $0x660] sm:$0xff]  ;;  %3267 = vmatpush1.bf16.msra.mxu1 %v5582_v58 }
  0x9f   :  { %v552_v53 = vld [vmem:[#allocation2 + $0xe40] sm:$0xff]  ;;  %v5591_v36 = vcombine.high %v296_v29, %v300_v30  ;;  %3348 = vmatprep.subr.bf16.mxu0 %v5839_v31  ;;  %v5590_v42 = vcombine.low %v296_v29, %v300_v30  ;;  %v97_v29 = vld [vmem:[#allocation2 + $0x8] sm:$0xff] }
  0xa0   :  { %v556_v32 = vld [vmem:[#allocation2 + $0xe60] sm:$0xff]  ;;  %3349 = vmatpush1.bf16.msra.mxu0 %v5838_v35  ;;  %v101_v30 = vld [vmem:[#allocation2 + $0x28] sm:$0xff] }
  0xa1   :  { %v304_v37 = vld [vmem:[#allocation2 + $0x680] sm:$0xff]  ;;  %v5847_v40 = vcombine.high %v552_v53, %v556_v32  ;;  %3268 = vmatprep.subr.bf16.mxu1 %v5591_v36  ;;  %v5846_v43 = vcombine.low %v552_v53, %v556_v32  ;;  %v98_v53 = vld [vmem:[#allocation2 + $0x10] sm:$0xff]  ;;  %v5393_v36 = vcombine.high %v97_v29, %v101_v30 }
  0xa2   :  { %v308_v38 = vld [vmem:[#allocation2 + $0x6a0] sm:$0xff]  ;;  %3269 = vmatpush1.bf16.msra.mxu1 %v5590_v42  ;;  %v102_v32 = vld [vmem:[#allocation2 + $0x30] sm:$0xff]  ;;  %v6676_v42 = vpack.c.bf16 %v6647_v12, %v6647_v12 }
  0xa3   :  { %v560_v39 = vld [vmem:[#allocation2 + $0xe80] sm:$0xff]  ;;  %v5599_v44 = vcombine.high %v304_v37, %v308_v38  ;;  %3350 = vmatprep.subr.bf16.mxu0 %v5847_v40  ;;  %v5598_v50 = vcombine.low %v304_v37, %v308_v38  ;;  %v105_v37 = vld [vmem:[#allocation2 + $0x48] sm:$0xff]  ;;  %v5395_v40 = vcombine.high %v98_v53, %v102_v32 }
  0xa4   :  { %v564_v41 = vld [vmem:[#allocation2 + $0xea0] sm:$0xff]  ;;  %3351 = vmatpush1.bf16.msra.mxu0 %v5846_v43  ;;  %v109_v38 = vld [vmem:[#allocation2 + $0x68] sm:$0xff]  ;;  %v5392_v43 = vcombine.low %v97_v29, %v101_v30 }
  0xa5   :  { %v312_v45 = vld [vmem:[#allocation2 + $0x6c0] sm:$0xff]  ;;  %v5855_v48 = vcombine.high %v560_v39, %v564_v41  ;;  %3270 = vmatprep.subr.bf16.mxu1 %v5599_v44  ;;  %v5854_v51 = vcombine.low %v560_v39, %v564_v41  ;;  %v106_v39 = vld [vmem:[#allocation2 + $0x50] sm:$0xff]  ;;  %v6680_v44 = vpack.c.bf16 %v6652_v14, %v6652_v14  ;;  %v5400_v12 = vcombine.low %v105_v37, %v109_v38  ;;  %v153_v30 = vld [vmem:[#allocation2 + $0x1c8] sm:$0xff] }
  0xa6   :  { %v316_v46 = vld [vmem:[#allocation2 + $0x6e0] sm:$0xff]  ;;  %3271 = vmatpush1.bf16.msra.mxu1 %v5598_v50  ;;  %v110_v41 = vld [vmem:[#allocation2 + $0x70] sm:$0xff] }
  0xa7   :  { %v568_v47 = vld [vmem:[#allocation2 + $0xec0] sm:$0xff]  ;;  %v5607_v52 = vcombine.high %v312_v45, %v316_v46  ;;  %3352 = vmatprep.subr.bf16.mxu0 %v5855_v48  ;;  %v5606_v60 = vcombine.low %v312_v45, %v316_v46  ;;  %v5394_v45 = vcombine.low %v98_v53, %v102_v32  ;;  %v5401_v46 = vcombine.high %v105_v37, %v109_v38  ;;  %v117_v48 = vld [vmem:[#allocation2 + $0xa8] sm:$0xff]  ;;  %v158_v32 = vld [vmem:[#allocation2 + $0x1f0] sm:$0xff] }
  0xa8   :  { %v572_v49 = vld [vmem:[#allocation2 + $0xee0] sm:$0xff]  ;;  %3353 = vmatpush1.bf16.msra.mxu0 %v5854_v51  ;;  %v5403_v50 = vcombine.high %v106_v39, %v110_v41  ;;  %v118_v51 = vld [vmem:[#allocation2 + $0xb0] sm:$0xff]  ;;  %v5402_v14 = vcombine.low %v106_v39, %v110_v41  ;;  %v157_v53 = vld [vmem:[#allocation2 + $0x1e8] sm:$0xff] }
  0xa9   :  { %v320_v54 = vld [vmem:[#allocation2 + $0x700] sm:$0xff]  ;;  %v5863_v57 = vcombine.high %v568_v47, %v572_v49  ;;  %3272 = vmatprep.subr.bf16.mxu1 %v5607_v52  ;;  %v5862_v61 = vcombine.low %v568_v47, %v572_v49  ;;  %v113_v47 = vld [vmem:[#allocation2 + $0x88] sm:$0xff]  ;;  %v114_v49 = vld [vmem:[#allocation2 + $0x90] sm:$0xff] }
  0xaa   :  { %v324_v55 = vld [vmem:[#allocation2 + $0x720] sm:$0xff]  ;;  %3273 = vmatpush1.bf16.msra.mxu1 %v5606_v60  ;;  %v5409_v52 = vcombine.high %v113_v47, %v117_v48  ;;  %v5408_v60 = vcombine.low %v113_v47, %v117_v48  ;;  %v161_v38 = vld [vmem:[#allocation2 + $0x208] sm:$0xff]  ;;  %v166_v41 = vld [vmem:[#allocation2 + $0x230] sm:$0xff] }
  0xab   :  { %v576_v56 = vld [vmem:[#allocation2 + $0xf00] sm:$0xff]  ;;  %v5615_v62 = vcombine.high %v320_v54, %v324_v55  ;;  %3354 = vmatprep.subr.bf16.mxu0 %v5863_v57  ;;  %v5614_v6 = vcombine.low %v320_v54, %v324_v55  ;;  %v121_v54 = vld [vmem:[#allocation2 + $0xc8] sm:$0xff]  ;;  %v5411_v57 = vcombine.high %v114_v49, %v118_v51 }
  0xac   :  { %v580_v59 = vld [vmem:[#allocation2 + $0xf20] sm:$0xff]  ;;  %3355 = vmatpush1.bf16.msra.mxu0 %v5862_v61  ;;  %v125_v55 = vld [vmem:[#allocation2 + $0xe8] sm:$0xff]  ;;  %v5410_v61 = vcombine.low %v114_v49, %v118_v51  ;;  %v174_v51 = vld [vmem:[#allocation2 + $0x270] sm:$0xff] }
  0xad   :  { %v328_v0 = vld [vmem:[#allocation2 + $0x740] sm:$0xff]  ;;  %v5871_v4 = vcombine.high %v576_v56, %v580_v59  ;;  %3274 = vmatprep.subr.bf16.mxu1 %v5615_v62  ;;  %v5870_v7 = vcombine.low %v576_v56, %v580_v59  ;;  %v122_v56 = vld [vmem:[#allocation2 + $0xd0] sm:$0xff]  ;;  %v5417_v62 = vcombine.high %v121_v54, %v125_v55  ;;  %v165_v39 = vld [vmem:[#allocation2 + $0x228] sm:$0xff] }
  0xae   :  { %v332_v1 = vld [vmem:[#allocation2 + $0x760] sm:$0xff]  ;;  %3275 = vmatpush1.bf16.msra.mxu1 %v5614_v6  ;;  %v126_v59 = vld [vmem:[#allocation2 + $0xf0] sm:$0xff]  ;;  %v5416_v6 = vcombine.low %v121_v54, %v125_v55  ;;  %v169_v48 = vld [vmem:[#allocation2 + $0x248] sm:$0xff] }
  0xaf   :  { %v584_v3 = vld [vmem:[#allocation2 + $0xf40] sm:$0xff]  ;;  %v5623_v8 = vcombine.high %v328_v0, %v332_v1  ;;  %3356 = vmatprep.subr.bf16.mxu0 %v5871_v4  ;;  %v5622_v16 = vcombine.low %v328_v0, %v332_v1  ;;  %v129_v0 = vld [vmem:[#allocation2 + $0x108] sm:$0xff]  ;;  %v5419_v4 = vcombine.high %v122_v56, %v126_v59 }
  0xb0   :  { %v588_v5 = vld [vmem:[#allocation2 + $0xf60] sm:$0xff]  ;;  %3357 = vmatpush1.bf16.msra.mxu0 %v5870_v7  ;;  %v133_v1 = vld [vmem:[#allocation2 + $0x128] sm:$0xff]  ;;  %v5418_v7 = vcombine.low %v122_v56, %v126_v59  ;;  %v182_v59 = vld [vmem:[#allocation2 + $0x2b0] sm:$0xff] }
  0xb1   :  { %v336_v9 = vld [vmem:[#allocation2 + $0x780] sm:$0xff]  ;;  %v5879_v13 = vcombine.high %v584_v3, %v588_v5  ;;  %3276 = vmatprep.subr.bf16.mxu1 %v5623_v8  ;;  %v5878_v17 = vcombine.low %v584_v3, %v588_v5  ;;  %v130_v3 = vld [vmem:[#allocation2 + $0x110] sm:$0xff]  ;;  %v5425_v8 = vcombine.high %v129_v0, %v133_v1  ;;  %v173_v49 = vld [vmem:[#allocation2 + $0x268] sm:$0xff] }
  0xb2   :  { %v340_v10 = vld [vmem:[#allocation2 + $0x7a0] sm:$0xff]  ;;  %3277 = vmatpush1.bf16.msra.mxu1 %v5622_v16  ;;  %v134_v5 = vld [vmem:[#allocation2 + $0x130] sm:$0xff]  ;;  %v5424_v16 = vcombine.low %v129_v0, %v133_v1  ;;  %v177_v55 = vld [vmem:[#allocation2 + $0x288] sm:$0xff] }
  0xb3   :  { %v592_v11 = vld [vmem:[#allocation2 + $0xf80] sm:$0xff]  ;;  %v5631_v18 = vcombine.high %v336_v9, %v340_v10  ;;  %3358 = vmatprep.subr.bf16.mxu0 %v5879_v13  ;;  %v5630_v25 = vcombine.low %v336_v9, %v340_v10  ;;  %v137_v9 = vld [vmem:[#allocation2 + $0x148] sm:$0xff]  ;;  %v5427_v13 = vcombine.high %v130_v3, %v134_v5 }
  0xb4   :  { %v596_v15 = vld [vmem:[#allocation2 + $0xfa0] sm:$0xff]  ;;  %3359 = vmatpush1.bf16.msra.mxu0 %v5878_v17  ;;  %v141_v10 = vld [vmem:[#allocation2 + $0x168] sm:$0xff]  ;;  %v5426_v17 = vcombine.low %v130_v3, %v134_v5  ;;  %v190_v5 = vld [vmem:[#allocation2 + $0x2f0] sm:$0xff] }
  0xb5   :  { %v344_v19 = vld [vmem:[#allocation2 + $0x7c0] sm:$0xff]  ;;  %v5887_v23 = vcombine.high %v592_v11, %v596_v15  ;;  %3278 = vmatprep.subr.bf16.mxu1 %v5631_v18  ;;  %v5886_v27 = vcombine.low %v592_v11, %v596_v15  ;;  %v138_v11 = vld [vmem:[#allocation2 + $0x150] sm:$0xff]  ;;  %v5433_v18 = vcombine.high %v137_v9, %v141_v10  ;;  %v181_v56 = vld [vmem:[#allocation2 + $0x2a8] sm:$0xff] }
  0xb6   :  { %v348_v20 = vld [vmem:[#allocation2 + $0x7e0] sm:$0xff]  ;;  %3279 = vmatpush1.bf16.msra.mxu1 %v5630_v25  ;;  %v142_v15 = vld [vmem:[#allocation2 + $0x170] sm:$0xff]  ;;  %v5432_v25 = vcombine.low %v137_v9, %v141_v10  ;;  %v185_v1 = vld [vmem:[#allocation2 + $0x2c8] sm:$0xff] }
  0xb7   :  { %v600_v22 = vld [vmem:[#allocation2 + $0xfc0] sm:$0xff]  ;;  %v5639_v28 = vcombine.high %v344_v19, %v348_v20  ;;  %3360 = vmatprep.subr.bf16.mxu0 %v5887_v23  ;;  %v5638_v58 = vcombine.low %v344_v19, %v348_v20  ;;  %v5435_v19 = vcombine.high %v138_v11, %v142_v15  ;;  %v145_v20 = vld [vmem:[#allocation2 + $0x188] sm:$0xff]  ;;  %v146_v23 = vld [vmem:[#allocation2 + $0x190] sm:$0xff] }
  0xb8   :  { %v604_v24 = vld [vmem:[#allocation2 + $0xfe0] sm:$0xff]  ;;  %3361 = vmatpush1.bf16.msra.mxu0 %v5886_v27  ;;  %v5434_v27 = vcombine.low %v138_v11, %v142_v15  ;;  %v189_v3 = vld [vmem:[#allocation2 + $0x2e8] sm:$0xff]  ;;  %v198_v15 = vld [vmem:[#allocation2 + $0x330] sm:$0xff] }
  0xb9   :  { %v5895_v31 = vcombine.high %v600_v22, %v604_v24  ;;  %3280 = vmatprep.subr.bf16.mxu1 %v5639_v28  ;;  %v5894_v35 = vcombine.low %v600_v22, %v604_v24  ;;  %v149_v22 = vld [vmem:[#allocation2 + $0x1a8] sm:$0xff]  ;;  %v150_v24 = vld [vmem:[#allocation2 + $0x1b0] sm:$0xff] }
  0xba   :  { %3281 = vmatpush1.bf16.msra.mxu1 %v5638_v58  ;;  %v5441_v28 = vcombine.high %v145_v20, %v149_v22  ;;  %v5443_v29 = vcombine.high %v146_v23, %v150_v24  ;;  %v5440_v58 = vcombine.low %v145_v20, %v149_v22  ;;  %v193_v10 = vld [vmem:[#allocation2 + $0x308] sm:$0xff] }
  0xbb   :  { %3362 = vmatprep.subr.bf16.mxu0 %v5895_v31  ;;  %3373 = vmatprep.subr.bf16.mxu1 %v5393_v36  ;;  %v154_v31 = vld [vmem:[#allocation2 + $0x1d0] sm:$0xff]  ;;  %v5449_v36 = vcombine.high %v153_v30, %v157_v53  ;;  %v197_v11 = vld [vmem:[#allocation2 + $0x328] sm:$0xff] }
  0xbc   :  { %3363 = vmatpush1.bf16.msra.mxu0 %v5894_v35  ;;  %v5442_v35 = vcombine.low %v146_v23, %v150_v24  ;;  %v5451_v37 = vcombine.high %v154_v31, %v158_v32  ;;  %v201_v20 = vld [vmem:[#allocation2 + $0x348] sm:$0xff]  ;;  %v202_v23 = vld [vmem:[#allocation2 + $0x350] sm:$0xff] }
  0xbd   :  { %3537 = vmatprep.subr.bf16.mxu0 %v5395_v40  ;;  %3283 = vmatmul.mubr.bf16.vlgmr.msra.gmra.mrb[0].mxu1 %v6676_v42  ;;  %v162_v40 = vld [vmem:[#allocation2 + $0x210] sm:$0xff]  ;;  %v205_v22 = vld [vmem:[#allocation2 + $0x368] sm:$0xff] }
  0xbe   :  { %3374 = vmatpush1.bf16.msra.mxu1 %v5392_v43  ;;  %3405 = vmatprep.mubr.bf16.mxu1 %v6638_v63  ;;  %v5448_v43 = vcombine.low %v153_v30, %v157_v53  ;;  %v5459_v47 = vcombine.high %v162_v40, %v166_v41  ;;  %v206_v24 = vld [vmem:[#allocation2 + $0x370] sm:$0xff]  ;;  %v209_v30 = vld [vmem:[#allocation2 + $0x388] sm:$0xff] }
  0xbf   :  { %3365 = vmatmul.mubr.bf16.vlgmr.msra.gmra.mrb[0].mxu0 %v6680_v44  ;;  %3375 = vmatprep.subr.bf16.mxu1 %v5401_v46  ;;  %v5457_v46 = vcombine.high %v161_v38, %v165_v39  ;;  %v213_v53 = vld [vmem:[#allocation2 + $0x3a8] sm:$0xff] }
  0xc0   :  { %3538 = vmatpush1.bf16.msra.mxu0 %v5394_v45  ;;  %3569 = vmatprep.mubr.bf16.mxu0 %v6638_v63  ;;  %v5450_v45 = vcombine.low %v154_v31, %v158_v32  ;;  %v210_v31 = vld [vmem:[#allocation2 + $0x390] sm:$0xff] }
  0xc1   :  { %3539 = vmatprep.subr.bf16.mxu0 %v5403_v50  ;;  %v170_v50 = vld [vmem:[#allocation2 + $0x250] sm:$0xff] }
  0xc2   :  { %3376 = vmatpush1.bf16.msra.mxu1 %v5400_v12  ;;  %v5456_v12 = vcombine.low %v161_v38, %v165_v39  ;;  %v5467_v54 = vcombine.high %v170_v50, %v174_v51  ;;  %v214_v32 = vld [vmem:[#allocation2 + $0x3b0] sm:$0xff]  ;;  %v217_v38 = vld [vmem:[#allocation2 + $0x3c8] sm:$0xff] }
  0xc3   :  { %3377 = vmatprep.subr.bf16.mxu1 %v5409_v52  ;;  %v5465_v52 = vcombine.high %v169_v48, %v173_v49  ;;  %v221_v39 = vld [vmem:[#allocation2 + $0x3e8] sm:$0xff] }
  0xc4   :  { %3540 = vmatpush1.bf16.msra.mxu0 %v5402_v14  ;;  %v5458_v14 = vcombine.low %v162_v40, %v166_v41  ;;  %v218_v40 = vld [vmem:[#allocation2 + $0x3d0] sm:$0xff] }
  0xc5   :  { %3541 = vmatprep.subr.bf16.mxu0 %v5411_v57  ;;  %v178_v57 = vld [vmem:[#allocation2 + $0x290] sm:$0xff] }
  0xc6   :  { %3378 = vmatpush1.bf16.msra.mxu1 %v5408_v60  ;;  %v5464_v60 = vcombine.low %v169_v48, %v173_v49  ;;  %v5475_v0 = vcombine.high %v178_v57, %v182_v59  ;;  %v222_v41 = vld [vmem:[#allocation2 + $0x3f0] sm:$0xff]  ;;  %v225_v48 = vld [vmem:[#allocation2 + $0x408] sm:$0xff] }
  0xc7   :  { %3379 = vmatprep.subr.bf16.mxu1 %v5417_v62  ;;  %v5473_v62 = vcombine.high %v177_v55, %v181_v56  ;;  %v229_v49 = vld [vmem:[#allocation2 + $0x428] sm:$0xff] }
  0xc8   :  { %3542 = vmatpush1.bf16.msra.mxu0 %v5410_v61  ;;  %v5466_v61 = vcombine.low %v170_v50, %v174_v51  ;;  %v226_v50 = vld [vmem:[#allocation2 + $0x410] sm:$0xff] }
  0xc9   :  { %3543 = vmatprep.subr.bf16.mxu0 %v5419_v4  ;;  %v186_v4 = vld [vmem:[#allocation2 + $0x2d0] sm:$0xff] }
  0xca   :  { %3380 = vmatpush1.bf16.msra.mxu1 %v5416_v6  ;;  %v5472_v6 = vcombine.low %v177_v55, %v181_v56  ;;  %v5483_v9 = vcombine.high %v186_v4, %v190_v5  ;;  %v230_v51 = vld [vmem:[#allocation2 + $0x430] sm:$0xff]  ;;  %v233_v55 = vld [vmem:[#allocation2 + $0x448] sm:$0xff] }
  0xcb   :  { %3381 = vmatprep.subr.bf16.mxu1 %v5425_v8  ;;  %v5481_v8 = vcombine.high %v185_v1, %v189_v3  ;;  %v237_v56 = vld [vmem:[#allocation2 + $0x468] sm:$0xff] }
  0xcc   :  { %3544 = vmatpush1.bf16.msra.mxu0 %v5418_v7  ;;  %v5474_v7 = vcombine.low %v178_v57, %v182_v59  ;;  %v234_v57 = vld [vmem:[#allocation2 + $0x450] sm:$0xff] }
  0xcd   :  { %3545 = vmatprep.subr.bf16.mxu0 %v5427_v13  ;;  %v194_v13 = vld [vmem:[#allocation2 + $0x310] sm:$0xff] }
  0xce   :  { %3382 = vmatpush1.bf16.msra.mxu1 %v5424_v16  ;;  %v5480_v16 = vcombine.low %v185_v1, %v189_v3  ;;  %v238_v59 = vld [vmem:[#allocation2 + $0x470] sm:$0xff]  ;;  %v241_v1 = vld [vmem:[#allocation2 + $0x488] sm:$0xff] }
  0xcf   :  { %3383 = vmatprep.subr.bf16.mxu1 %v5433_v18  ;;  %v5489_v18 = vcombine.high %v193_v10, %v197_v11  ;;  %v245_v3 = vld [vmem:[#allocation2 + $0x4a8] sm:$0xff] }
  0xd0   :  { %3546 = vmatpush1.bf16.msra.mxu0 %v5426_v17  ;;  %v5482_v17 = vcombine.low %v186_v4, %v190_v5  ;;  %v242_v4 = vld [vmem:[#allocation2 + $0x490] sm:$0xff] }
  0xd1   :  { %3547 = vmatprep.subr.bf16.mxu0 %v5435_v19  ;;  %v5491_v19 = vcombine.high %v194_v13, %v198_v15  ;;  %v246_v5 = vld [vmem:[#allocation2 + $0x4b0] sm:$0xff] }
  0xd2   :  { %3384 = vmatpush1.bf16.msra.mxu1 %v5432_v25  ;;  %v5488_v25 = vcombine.low %v193_v10, %v197_v11  ;;  %v249_v10 = vld [vmem:[#allocation2 + $0x4c8] sm:$0xff] }
  0xd3   :  { %3385 = vmatprep.subr.bf16.mxu1 %v5441_v28  ;;  %v5497_v28 = vcombine.high %v201_v20, %v205_v22  ;;  %v253_v11 = vld [vmem:[#allocation2 + $0x4e8] sm:$0xff] }
  0xd4   :  { %3548 = vmatpush1.bf16.msra.mxu0 %v5434_v27  ;;  %v5490_v27 = vcombine.low %v194_v13, %v198_v15  ;;  %v250_v13 = vld [vmem:[#allocation2 + $0x4d0] sm:$0xff] }
  0xd5   :  { %3549 = vmatprep.subr.bf16.mxu0 %v5443_v29  ;;  %v5499_v29 = vcombine.high %v202_v23, %v206_v24  ;;  %v254_v15 = vld [vmem:[#allocation2 + $0x4f0] sm:$0xff] }
  0xd6   :  { %3386 = vmatpush1.bf16.msra.mxu1 %v5440_v58  ;;  %v5496_v58 = vcombine.low %v201_v20, %v205_v22  ;;  %v257_v20 = vld [vmem:[#allocation2 + $0x508] sm:$0xff] }
  0xd7   :  { %3387 = vmatprep.subr.bf16.mxu1 %v5449_v36  ;;  %v5505_v36 = vcombine.high %v209_v30, %v213_v53  ;;  %v261_v22 = vld [vmem:[#allocation2 + $0x528] sm:$0xff] }
  0xd8   :  { %3550 = vmatpush1.bf16.msra.mxu0 %v5442_v35  ;;  %v5498_v35 = vcombine.low %v202_v23, %v206_v24  ;;  %v258_v23 = vld [vmem:[#allocation2 + $0x510] sm:$0xff] }
  0xd9   :  { %3551 = vmatprep.subr.bf16.mxu0 %v5451_v37  ;;  %v5507_v37 = vcombine.high %v210_v31, %v214_v32  ;;  %v262_v24 = vld [vmem:[#allocation2 + $0x530] sm:$0xff] }
  0xda   :  { %3388 = vmatpush1.bf16.msra.mxu1 %v5448_v43  ;;  %v5504_v43 = vcombine.low %v209_v30, %v213_v53  ;;  %v265_v30 = vld [vmem:[#allocation2 + $0x548] sm:$0xff] }
  0xdb   :  { %3389 = vmatprep.subr.bf16.mxu1 %v5457_v46  ;;  %v5513_v46 = vcombine.high %v217_v38, %v221_v39  ;;  %v269_v53 = vld [vmem:[#allocation2 + $0x568] sm:$0xff] }
  0xdc   :  { %3552 = vmatpush1.bf16.msra.mxu0 %v5450_v45  ;;  %v5506_v45 = vcombine.low %v210_v31, %v214_v32  ;;  %v266_v31 = vld [vmem:[#allocation2 + $0x550] sm:$0xff] }
  0xdd   :  { %3553 = vmatprep.subr.bf16.mxu0 %v5459_v47  ;;  %v5515_v47 = vcombine.high %v218_v40, %v222_v41  ;;  %v270_v32 = vld [vmem:[#allocation2 + $0x570] sm:$0xff] }
  0xde   :  { %3390 = vmatpush1.bf16.msra.mxu1 %v5456_v12  ;;  %v5512_v12 = vcombine.low %v217_v38, %v221_v39  ;;  %v273_v38 = vld [vmem:[#allocation2 + $0x588] sm:$0xff] }
  0xdf   :  { %3391 = vmatprep.subr.bf16.mxu1 %v5465_v52  ;;  %v5521_v52 = vcombine.high %v225_v48, %v229_v49  ;;  %v277_v39 = vld [vmem:[#allocation2 + $0x5a8] sm:$0xff] }
  0xe0   :  { %3554 = vmatpush1.bf16.msra.mxu0 %v5458_v14  ;;  %v5514_v14 = vcombine.low %v218_v40, %v222_v41  ;;  %v274_v40 = vld [vmem:[#allocation2 + $0x590] sm:$0xff] }
  0xe1   :  { %3555 = vmatprep.subr.bf16.mxu0 %v5467_v54  ;;  %v5523_v54 = vcombine.high %v226_v50, %v230_v51  ;;  %v278_v41 = vld [vmem:[#allocation2 + $0x5b0] sm:$0xff] }
  0xe2   :  { %3392 = vmatpush1.bf16.msra.mxu1 %v5464_v60  ;;  %v5520_v60 = vcombine.low %v225_v48, %v229_v49  ;;  %v281_v48 = vld [vmem:[#allocation2 + $0x5c8] sm:$0xff] }
  0xe3   :  { %3393 = vmatprep.subr.bf16.mxu1 %v5473_v62  ;;  %v5529_v62 = vcombine.high %v233_v55, %v237_v56  ;;  %v285_v49 = vld [vmem:[#allocation2 + $0x5e8] sm:$0xff] }
  0xe4   :  { %3556 = vmatpush1.bf16.msra.mxu0 %v5466_v61  ;;  %v5522_v61 = vcombine.low %v226_v50, %v230_v51  ;;  %v282_v50 = vld [vmem:[#allocation2 + $0x5d0] sm:$0xff] }
  0xe5   :  { %3557 = vmatprep.subr.bf16.mxu0 %v5475_v0  ;;  %v5531_v0 = vcombine.high %v234_v57, %v238_v59  ;;  %v286_v51 = vld [vmem:[#allocation2 + $0x5f0] sm:$0xff] }
  0xe6   :  { %3394 = vmatpush1.bf16.msra.mxu1 %v5472_v6  ;;  %v5528_v6 = vcombine.low %v233_v55, %v237_v56  ;;  %v289_v55 = vld [vmem:[#allocation2 + $0x608] sm:$0xff] }
  0xe7   :  { %3395 = vmatprep.subr.bf16.mxu1 %v5481_v8  ;;  %v5537_v8 = vcombine.high %v241_v1, %v245_v3  ;;  %v293_v56 = vld [vmem:[#allocation2 + $0x628] sm:$0xff] }
  0xe8   :  { %3558 = vmatpush1.bf16.msra.mxu0 %v5474_v7  ;;  %v5530_v7 = vcombine.low %v234_v57, %v238_v59  ;;  %v290_v57 = vld [vmem:[#allocation2 + $0x610] sm:$0xff] }
  0xe9   :  { %3559 = vmatprep.subr.bf16.mxu0 %v5483_v9  ;;  %v5539_v9 = vcombine.high %v242_v4, %v246_v5  ;;  %v294_v59 = vld [vmem:[#allocation2 + $0x630] sm:$0xff] }
  0xea   :  { %3396 = vmatpush1.bf16.msra.mxu1 %v5480_v16  ;;  %v5536_v16 = vcombine.low %v241_v1, %v245_v3  ;;  %v297_v1 = vld [vmem:[#allocation2 + $0x648] sm:$0xff] }
  0xeb   :  { %3397 = vmatprep.subr.bf16.mxu1 %v5489_v18  ;;  %v5545_v18 = vcombine.high %v249_v10, %v253_v11  ;;  %v301_v3 = vld [vmem:[#allocation2 + $0x668] sm:$0xff] }
  0xec   :  { %3560 = vmatpush1.bf16.msra.mxu0 %v5482_v17  ;;  %v5538_v17 = vcombine.low %v242_v4, %v246_v5  ;;  %v298_v4 = vld [vmem:[#allocation2 + $0x650] sm:$0xff] }
  0xed   :  { %3561 = vmatprep.subr.bf16.mxu0 %v5491_v19  ;;  %v5547_v19 = vcombine.high %v250_v13, %v254_v15  ;;  %v302_v5 = vld [vmem:[#allocation2 + $0x670] sm:$0xff] }
  0xee   :  { %3398 = vmatpush1.bf16.msra.mxu1 %v5488_v25  ;;  %v5544_v25 = vcombine.low %v249_v10, %v253_v11  ;;  %v305_v10 = vld [vmem:[#allocation2 + $0x688] sm:$0xff] }
  0xef   :  { %3399 = vmatprep.subr.bf16.mxu1 %v5497_v28  ;;  %v5553_v28 = vcombine.high %v257_v20, %v261_v22  ;;  %v309_v11 = vld [vmem:[#allocation2 + $0x6a8] sm:$0xff] }
  0xf0   :  { %3562 = vmatpush1.bf16.msra.mxu0 %v5490_v27  ;;  %v5546_v27 = vcombine.low %v250_v13, %v254_v15  ;;  %v306_v13 = vld [vmem:[#allocation2 + $0x690] sm:$0xff] }
  0xf1   :  { %3563 = vmatprep.subr.bf16.mxu0 %v5499_v29  ;;  %v5555_v29 = vcombine.high %v258_v23, %v262_v24  ;;  %v310_v15 = vld [vmem:[#allocation2 + $0x6b0] sm:$0xff] }
  0xf2   :  { %3400 = vmatpush1.bf16.msra.mxu1 %v5496_v58  ;;  %v5552_v58 = vcombine.low %v257_v20, %v261_v22  ;;  %v313_v20 = vld [vmem:[#allocation2 + $0x6c8] sm:$0xff] }
  0xf3   :  { %3401 = vmatprep.subr.bf16.mxu1 %v5505_v36  ;;  %v5561_v36 = vcombine.high %v265_v30, %v269_v53  ;;  %v317_v22 = vld [vmem:[#allocation2 + $0x6e8] sm:$0xff] }
  0xf4   :  { %3564 = vmatpush1.bf16.msra.mxu0 %v5498_v35  ;;  %v5554_v35 = vcombine.low %v258_v23, %v262_v24  ;;  %v314_v23 = vld [vmem:[#allocation2 + $0x6d0] sm:$0xff] }
  0xf5   :  { %3565 = vmatprep.subr.bf16.mxu0 %v5507_v37  ;;  %v5563_v37 = vcombine.high %v266_v31, %v270_v32  ;;  %v318_v24 = vld [vmem:[#allocation2 + $0x6f0] sm:$0xff] }
  0xf6   :  { %3402 = vmatpush1.bf16.msra.mxu1 %v5504_v43  ;;  %v5560_v43 = vcombine.low %v265_v30, %v269_v53  ;;  %v321_v30 = vld [vmem:[#allocation2 + $0x708] sm:$0xff] }
  0xf7   :  { %3403 = vmatprep.subr.bf16.mxu1 %v5513_v46  ;;  %v5569_v46 = vcombine.high %v273_v38, %v277_v39  ;;  %v325_v53 = vld [vmem:[#allocation2 + $0x728] sm:$0xff] }
  0xf8   :  { %3566 = vmatpush1.bf16.msra.mxu0 %v5506_v45  ;;  %v5562_v45 = vcombine.low %v266_v31, %v270_v32  ;;  %v322_v31 = vld [vmem:[#allocation2 + $0x710] sm:$0xff] }
  0xf9   :  { %3567 = vmatprep.subr.bf16.mxu0 %v5515_v47  ;;  %v5571_v47 = vcombine.high %v274_v40, %v278_v41  ;;  %v326_v32 = vld [vmem:[#allocation2 + $0x730] sm:$0xff] }
  0xfa   :  { %3404 = vmatpush1.bf16.msra.mxu1 %v5512_v12  ;;  %v5568_v12 = vcombine.low %v273_v38, %v277_v39  ;;  %v329_v38 = vld [vmem:[#allocation2 + $0x748] sm:$0xff] }
  0xfb   :  { %3414 = vmatprep.subr.bf16.mxu1 %v5521_v52  ;;  %v5577_v52 = vcombine.high %v281_v48, %v285_v49  ;;  %v333_v39 = vld [vmem:[#allocation2 + $0x768] sm:$0xff] }
  0xfc   :  { %3568 = vmatpush1.bf16.msra.mxu0 %v5514_v14  ;;  %v5570_v14 = vcombine.low %v274_v40, %v278_v41  ;;  %v330_v40 = vld [vmem:[#allocation2 + $0x750] sm:$0xff] }
  0xfd   :  { %3578 = vmatprep.subr.bf16.mxu0 %v5523_v54  ;;  %3406 = vmatmul.mubr.bf16.vlgmr.msra.gmra.mrb[4].mxu1 %v6658_v21  ;;  %v5579_v54 = vcombine.high %v282_v50, %v286_v51  ;;  %v334_v41 = vld [vmem:[#allocation2 + $0x770] sm:$0xff] }
  0xfe   :  { %3415 = vmatpush1.bf16.msra.mxu1 %v5520_v60  ;;  %3446 = vmatprep.mubr.bf16.mxu1 %v6666_v33  ;;  %v5576_v60 = vcombine.low %v281_v48, %v285_v49  ;;  %v337_v48 = vld [vmem:[#allocation2 + $0x788] sm:$0xff] }
  0xff   :  { %3570 = vmatmul.mubr.bf16.vlgmr.msra.gmra.mrb[4].mxu0 %v6658_v21  ;;  %3416 = vmatprep.subr.bf16.mxu1 %v5529_v62  ;;  %v5585_v62 = vcombine.high %v289_v55, %v293_v56  ;;  %v341_v49 = vld [vmem:[#allocation2 + $0x7a8] sm:$0xff] }
 0x100   :  { %3579 = vmatpush1.bf16.msra.mxu0 %v5522_v61  ;;  %3610 = vmatprep.mubr.bf16.mxu0 %v6666_v33  ;;  %v5578_v61 = vcombine.low %v282_v50, %v286_v51  ;;  %v338_v50 = vld [vmem:[#allocation2 + $0x790] sm:$0xff] }
 0x101   :  { %3580 = vmatprep.subr.bf16.mxu0 %v5531_v0  ;;  %v5587_v0 = vcombine.high %v290_v57, %v294_v59  ;;  %v342_v51 = vld [vmem:[#allocation2 + $0x7b0] sm:$0xff] }
 0x102   :  { %3417 = vmatpush1.bf16.msra.mxu1 %v5528_v6  ;;  %v5584_v6 = vcombine.low %v289_v55, %v293_v56  ;;  %v345_v55 = vld [vmem:[#allocation2 + $0x7c8] sm:$0xff] }
 0x103   :  { %3418 = vmatprep.subr.bf16.mxu1 %v5537_v8  ;;  %v5593_v8 = vcombine.high %v297_v1, %v301_v3  ;;  %v349_v56 = vld [vmem:[#allocation2 + $0x7e8] sm:$0xff] }
 0x104   :  { %3581 = vmatpush1.bf16.msra.mxu0 %v5530_v7  ;;  %v5586_v7 = vcombine.low %v290_v57, %v294_v59  ;;  %v346_v57 = vld [vmem:[#allocation2 + $0x7d0] sm:$0xff] }
 0x105   :  { %3582 = vmatprep.subr.bf16.mxu0 %v5539_v9  ;;  %v5595_v9 = vcombine.high %v298_v4, %v302_v5  ;;  %v350_v59 = vld [vmem:[#allocation2 + $0x7f0] sm:$0xff] }
 0x106   :  { %3419 = vmatpush1.bf16.msra.mxu1 %v5536_v16  ;;  %v5592_v16 = vcombine.low %v297_v1, %v301_v3  ;;  %v353_v1 = vld [vmem:[#allocation2 + $0x808] sm:$0xff] }
 0x107   :  { %3420 = vmatprep.subr.bf16.mxu1 %v5545_v18  ;;  %v5601_v18 = vcombine.high %v305_v10, %v309_v11  ;;  %v357_v3 = vld [vmem:[#allocation2 + $0x828] sm:$0xff] }
 0x108   :  { %3583 = vmatpush1.bf16.msra.mxu0 %v5538_v17  ;;  %v5594_v17 = vcombine.low %v298_v4, %v302_v5  ;;  %v354_v4 = vld [vmem:[#allocation2 + $0x810] sm:$0xff] }
 0x109   :  { %3584 = vmatprep.subr.bf16.mxu0 %v5547_v19  ;;  %v5603_v19 = vcombine.high %v306_v13, %v310_v15  ;;  %v358_v5 = vld [vmem:[#allocation2 + $0x830] sm:$0xff] }
 0x10a   :  { %3421 = vmatpush1.bf16.msra.mxu1 %v5544_v25  ;;  %v5600_v25 = vcombine.low %v305_v10, %v309_v11  ;;  %v361_v10 = vld [vmem:[#allocation2 + $0x848] sm:$0xff] }
 0x10b   :  { %3422 = vmatprep.subr.bf16.mxu1 %v5553_v28  ;;  %v5609_v28 = vcombine.high %v313_v20, %v317_v22  ;;  %v365_v11 = vld [vmem:[#allocation2 + $0x868] sm:$0xff] }
 0x10c   :  { %3585 = vmatpush1.bf16.msra.mxu0 %v5546_v27  ;;  %v5602_v27 = vcombine.low %v306_v13, %v310_v15  ;;  %v362_v13 = vld [vmem:[#allocation2 + $0x850] sm:$0xff] }
 0x10d   :  { %3586 = vmatprep.subr.bf16.mxu0 %v5555_v29  ;;  %v5611_v29 = vcombine.high %v314_v23, %v318_v24  ;;  %v366_v15 = vld [vmem:[#allocation2 + $0x870] sm:$0xff] }
 0x10e   :  { %3423 = vmatpush1.bf16.msra.mxu1 %v5552_v58  ;;  %v5608_v58 = vcombine.low %v313_v20, %v317_v22  ;;  %v369_v20 = vld [vmem:[#allocation2 + $0x888] sm:$0xff] }
 0x10f   :  { %3424 = vmatprep.subr.bf16.mxu1 %v5561_v36  ;;  %v5617_v36 = vcombine.high %v321_v30, %v325_v53  ;;  %v373_v22 = vld [vmem:[#allocation2 + $0x8a8] sm:$0xff] }
 0x110   :  { %3587 = vmatpush1.bf16.msra.mxu0 %v5554_v35  ;;  %v5610_v35 = vcombine.low %v314_v23, %v318_v24  ;;  %v370_v23 = vld [vmem:[#allocation2 + $0x890] sm:$0xff] }
 0x111   :  { %3588 = vmatprep.subr.bf16.mxu0 %v5563_v37  ;;  %v5619_v37 = vcombine.high %v322_v31, %v326_v32  ;;  %v374_v24 = vld [vmem:[#allocation2 + $0x8b0] sm:$0xff] }
 0x112   :  { %3425 = vmatpush1.bf16.msra.mxu1 %v5560_v43  ;;  %v5616_v43 = vcombine.low %v321_v30, %v325_v53  ;;  %v377_v30 = vld [vmem:[#allocation2 + $0x8c8] sm:$0xff] }
 0x113   :  { %3426 = vmatprep.subr.bf16.mxu1 %v5569_v46  ;;  %v5625_v46 = vcombine.high %v329_v38, %v333_v39  ;;  %v381_v53 = vld [vmem:[#allocation2 + $0x8e8] sm:$0xff] }
 0x114   :  { %3589 = vmatpush1.bf16.msra.mxu0 %v5562_v45  ;;  %v5618_v45 = vcombine.low %v322_v31, %v326_v32  ;;  %v378_v31 = vld [vmem:[#allocation2 + $0x8d0] sm:$0xff] }
 0x115   :  { %3590 = vmatprep.subr.bf16.mxu0 %v5571_v47  ;;  %v5627_v47 = vcombine.high %v330_v40, %v334_v41  ;;  %v382_v32 = vld [vmem:[#allocation2 + $0x8f0] sm:$0xff] }
 0x116   :  { %3427 = vmatpush1.bf16.msra.mxu1 %v5568_v12  ;;  %v5624_v12 = vcombine.low %v329_v38, %v333_v39  ;;  %v385_v38 = vld [vmem:[#allocation2 + $0x908] sm:$0xff] }
 0x117   :  { %3428 = vmatprep.subr.bf16.mxu1 %v5577_v52  ;;  %v5633_v52 = vcombine.high %v337_v48, %v341_v49  ;;  %v389_v39 = vld [vmem:[#allocation2 + $0x928] sm:$0xff] }
 0x118   :  { %3591 = vmatpush1.bf16.msra.mxu0 %v5570_v14  ;;  %v5626_v14 = vcombine.low %v330_v40, %v334_v41  ;;  %v386_v40 = vld [vmem:[#allocation2 + $0x910] sm:$0xff] }
 0x119   :  { %3592 = vmatprep.subr.bf16.mxu0 %v5579_v54  ;;  %v5635_v54 = vcombine.high %v338_v50, %v342_v51  ;;  %v390_v41 = vld [vmem:[#allocation2 + $0x930] sm:$0xff] }
 0x11a   :  { %3429 = vmatpush1.bf16.msra.mxu1 %v5576_v60  ;;  %v5632_v60 = vcombine.low %v337_v48, %v341_v49  ;;  %v393_v48 = vld [vmem:[#allocation2 + $0x948] sm:$0xff] }
 0x11b   :  { %3430 = vmatprep.subr.bf16.mxu1 %v5585_v62  ;;  %v5641_v62 = vcombine.high %v345_v55, %v349_v56  ;;  %v397_v49 = vld [vmem:[#allocation2 + $0x968] sm:$0xff] }
 0x11c   :  { %3593 = vmatpush1.bf16.msra.mxu0 %v5578_v61  ;;  %v5634_v61 = vcombine.low %v338_v50, %v342_v51  ;;  %v394_v50 = vld [vmem:[#allocation2 + $0x950] sm:$0xff] }
 0x11d   :  { %3594 = vmatprep.subr.bf16.mxu0 %v5587_v0  ;;  %v5643_v0 = vcombine.high %v346_v57, %v350_v59  ;;  %v398_v51 = vld [vmem:[#allocation2 + $0x970] sm:$0xff] }
 0x11e   :  { %3431 = vmatpush1.bf16.msra.mxu1 %v5584_v6  ;;  %v5640_v6 = vcombine.low %v345_v55, %v349_v56  ;;  %v401_v55 = vld [vmem:[#allocation2 + $0x988] sm:$0xff] }
 0x11f   :  { %3432 = vmatprep.subr.bf16.mxu1 %v5593_v8  ;;  %v5649_v8 = vcombine.high %v353_v1, %v357_v3  ;;  %v405_v56 = vld [vmem:[#allocation2 + $0x9a8] sm:$0xff] }
 0x120   :  { %3595 = vmatpush1.bf16.msra.mxu0 %v5586_v7  ;;  %v5642_v7 = vcombine.low %v346_v57, %v350_v59  ;;  %v402_v57 = vld [vmem:[#allocation2 + $0x990] sm:$0xff] }
 0x121   :  { %3596 = vmatprep.subr.bf16.mxu0 %v5595_v9  ;;  %v5651_v9 = vcombine.high %v354_v4, %v358_v5  ;;  %v406_v59 = vld [vmem:[#allocation2 + $0x9b0] sm:$0xff] }
 0x122   :  { %3433 = vmatpush1.bf16.msra.mxu1 %v5592_v16  ;;  %v5648_v16 = vcombine.low %v353_v1, %v357_v3  ;;  %v409_v1 = vld [vmem:[#allocation2 + $0x9c8] sm:$0xff] }
 0x123   :  { %3434 = vmatprep.subr.bf16.mxu1 %v5601_v18  ;;  %v5657_v18 = vcombine.high %v361_v10, %v365_v11  ;;  %v413_v3 = vld [vmem:[#allocation2 + $0x9e8] sm:$0xff] }
 0x124   :  { %3597 = vmatpush1.bf16.msra.mxu0 %v5594_v17  ;;  %v5650_v17 = vcombine.low %v354_v4, %v358_v5  ;;  %v410_v4 = vld [vmem:[#allocation2 + $0x9d0] sm:$0xff] }
 0x125   :  { %3598 = vmatprep.subr.bf16.mxu0 %v5603_v19  ;;  %v5659_v19 = vcombine.high %v362_v13, %v366_v15  ;;  %v414_v5 = vld [vmem:[#allocation2 + $0x9f0] sm:$0xff] }
 0x126   :  { %3435 = vmatpush1.bf16.msra.mxu1 %v5600_v25  ;;  %v5656_v25 = vcombine.low %v361_v10, %v365_v11  ;;  %v417_v10 = vld [vmem:[#allocation2 + $0xa08] sm:$0xff] }
 0x127   :  { %3436 = vmatprep.subr.bf16.mxu1 %v5609_v28  ;;  %v5665_v28 = vcombine.high %v369_v20, %v373_v22  ;;  %v421_v11 = vld [vmem:[#allocation2 + $0xa28] sm:$0xff] }
 0x128   :  { %3599 = vmatpush1.bf16.msra.mxu0 %v5602_v27  ;;  %v5658_v27 = vcombine.low %v362_v13, %v366_v15  ;;  %v418_v13 = vld [vmem:[#allocation2 + $0xa10] sm:$0xff] }
 0x129   :  { %3600 = vmatprep.subr.bf16.mxu0 %v5611_v29  ;;  %v5667_v29 = vcombine.high %v370_v23, %v374_v24  ;;  %v422_v15 = vld [vmem:[#allocation2 + $0xa30] sm:$0xff] }
 0x12a   :  { %3437 = vmatpush1.bf16.msra.mxu1 %v5608_v58  ;;  %v5664_v58 = vcombine.low %v369_v20, %v373_v22  ;;  %v425_v20 = vld [vmem:[#allocation2 + $0xa48] sm:$0xff] }
 0x12b   :  { %3438 = vmatprep.subr.bf16.mxu1 %v5617_v36  ;;  %v5673_v36 = vcombine.high %v377_v30, %v381_v53  ;;  %v429_v22 = vld [vmem:[#allocation2 + $0xa68] sm:$0xff] }
 0x12c   :  { %3601 = vmatpush1.bf16.msra.mxu0 %v5610_v35  ;;  %v5666_v35 = vcombine.low %v370_v23, %v374_v24  ;;  %v426_v23 = vld [vmem:[#allocation2 + $0xa50] sm:$0xff] }
 0x12d   :  { %3602 = vmatprep.subr.bf16.mxu0 %v5619_v37  ;;  %v5675_v37 = vcombine.high %v378_v31, %v382_v32  ;;  %v430_v24 = vld [vmem:[#allocation2 + $0xa70] sm:$0xff] }
 0x12e   :  { %3439 = vmatpush1.bf16.msra.mxu1 %v5616_v43  ;;  %v5672_v43 = vcombine.low %v377_v30, %v381_v53  ;;  %v433_v30 = vld [vmem:[#allocation2 + $0xa88] sm:$0xff] }
 0x12f   :  { %3440 = vmatprep.subr.bf16.mxu1 %v5625_v46  ;;  %v5681_v46 = vcombine.high %v385_v38, %v389_v39  ;;  %v437_v53 = vld [vmem:[#allocation2 + $0xaa8] sm:$0xff] }
 0x130   :  { %3603 = vmatpush1.bf16.msra.mxu0 %v5618_v45  ;;  %v5674_v45 = vcombine.low %v378_v31, %v382_v32  ;;  %v434_v31 = vld [vmem:[#allocation2 + $0xa90] sm:$0xff] }
 0x131   :  { %3604 = vmatprep.subr.bf16.mxu0 %v5627_v47  ;;  %v5683_v47 = vcombine.high %v386_v40, %v390_v41  ;;  %v438_v32 = vld [vmem:[#allocation2 + $0xab0] sm:$0xff] }
 0x132   :  { %3441 = vmatpush1.bf16.msra.mxu1 %v5624_v12  ;;  %v5680_v12 = vcombine.low %v385_v38, %v389_v39  ;;  %v441_v38 = vld [vmem:[#allocation2 + $0xac8] sm:$0xff] }
 0x133   :  { %3442 = vmatprep.subr.bf16.mxu1 %v5633_v52  ;;  %v5689_v52 = vcombine.high %v393_v48, %v397_v49  ;;  %v445_v39 = vld [vmem:[#allocation2 + $0xae8] sm:$0xff] }
 0x134   :  { %3605 = vmatpush1.bf16.msra.mxu0 %v5626_v14  ;;  %v5682_v14 = vcombine.low %v386_v40, %v390_v41  ;;  %v442_v40 = vld [vmem:[#allocation2 + $0xad0] sm:$0xff] }
 0x135   :  { %3606 = vmatprep.subr.bf16.mxu0 %v5635_v54  ;;  %v5691_v54 = vcombine.high %v394_v50, %v398_v51  ;;  %v446_v41 = vld [vmem:[#allocation2 + $0xaf0] sm:$0xff] }
 0x136   :  { %3443 = vmatpush1.bf16.msra.mxu1 %v5632_v60  ;;  %v5688_v60 = vcombine.low %v393_v48, %v397_v49  ;;  %v449_v48 = vld [vmem:[#allocation2 + $0xb08] sm:$0xff] }
 0x137   :  { %3444 = vmatprep.subr.bf16.mxu1 %v5641_v62  ;;  %v5697_v62 = vcombine.high %v401_v55, %v405_v56  ;;  %v453_v49 = vld [vmem:[#allocation2 + $0xb28] sm:$0xff] }
 0x138   :  { %3607 = vmatpush1.bf16.msra.mxu0 %v5634_v61  ;;  %v5690_v61 = vcombine.low %v394_v50, %v398_v51  ;;  %v450_v50 = vld [vmem:[#allocation2 + $0xb10] sm:$0xff] }
 0x139   :  { %3608 = vmatprep.subr.bf16.mxu0 %v5643_v0  ;;  %v5699_v0 = vcombine.high %v402_v57, %v406_v59  ;;  %v454_v51 = vld [vmem:[#allocation2 + $0xb30] sm:$0xff] }
 0x13a   :  { %3445 = vmatpush1.bf16.msra.mxu1 %v5640_v6  ;;  %v5696_v6 = vcombine.low %v401_v55, %v405_v56  ;;  %v457_v55 = vld [vmem:[#allocation2 + $0xb48] sm:$0xff] }
 0x13b   :  { %3455 = vmatprep.subr.bf16.mxu1 %v5649_v8  ;;  %v5705_v8 = vcombine.high %v409_v1, %v413_v3  ;;  %v461_v56 = vld [vmem:[#allocation2 + $0xb68] sm:$0xff] }
 0x13c   :  { %3609 = vmatpush1.bf16.msra.mxu0 %v5642_v7  ;;  %v5698_v7 = vcombine.low %v402_v57, %v406_v59  ;;  %v458_v57 = vld [vmem:[#allocation2 + $0xb50] sm:$0xff] }
 0x13d   :  { %3619 = vmatprep.subr.bf16.mxu0 %v5651_v9  ;;  %3447 = vmatmul.mubr.bf16.vlgmr.msra.gmra.mrb[4].mxu1 %v6676_v42  ;;  %v5707_v9 = vcombine.high %v410_v4, %v414_v5  ;;  %v462_v59 = vld [vmem:[#allocation2 + $0xb70] sm:$0xff] }
 0x13e   :  { %3456 = vmatpush1.bf16.msra.mxu1 %v5648_v16  ;;  %3487 = vmatprep.mubr.bf16.mxu1 %v6640_v2  ;;  %v5704_v16 = vcombine.low %v409_v1, %v413_v3  ;;  %v465_v1 = vld [vmem:[#allocation2 + $0xb88] sm:$0xff] }
 0x13f   :  { %3611 = vmatmul.mubr.bf16.vlgmr.msra.gmra.mrb[4].mxu0 %v6676_v42  ;;  %3457 = vmatprep.subr.bf16.mxu1 %v5657_v18  ;;  %v5713_v18 = vcombine.high %v417_v10, %v421_v11  ;;  %v469_v3 = vld [vmem:[#allocation2 + $0xba8] sm:$0xff] }
 0x140   :  { %3620 = vmatpush1.bf16.msra.mxu0 %v5650_v17  ;;  %3651 = vmatprep.mubr.bf16.mxu0 %v6640_v2  ;;  %v5706_v17 = vcombine.low %v410_v4, %v414_v5  ;;  %v466_v4 = vld [vmem:[#allocation2 + $0xb90] sm:$0xff] }
 0x141   :  { %3621 = vmatprep.subr.bf16.mxu0 %v5659_v19  ;;  %v5715_v19 = vcombine.high %v418_v13, %v422_v15  ;;  %v470_v5 = vld [vmem:[#allocation2 + $0xbb0] sm:$0xff] }
 0x142   :  { %3458 = vmatpush1.bf16.msra.mxu1 %v5656_v25  ;;  %v5712_v25 = vcombine.low %v417_v10, %v421_v11  ;;  %v473_v10 = vld [vmem:[#allocation2 + $0xbc8] sm:$0xff] }
 0x143   :  { %3459 = vmatprep.subr.bf16.mxu1 %v5665_v28  ;;  %v5721_v28 = vcombine.high %v425_v20, %v429_v22  ;;  %v477_v11 = vld [vmem:[#allocation2 + $0xbe8] sm:$0xff] }
 0x144   :  { %3622 = vmatpush1.bf16.msra.mxu0 %v5658_v27  ;;  %v5714_v27 = vcombine.low %v418_v13, %v422_v15  ;;  %v474_v13 = vld [vmem:[#allocation2 + $0xbd0] sm:$0xff] }
 0x145   :  { %3623 = vmatprep.subr.bf16.mxu0 %v5667_v29  ;;  %v5723_v29 = vcombine.high %v426_v23, %v430_v24  ;;  %v478_v15 = vld [vmem:[#allocation2 + $0xbf0] sm:$0xff] }
 0x146   :  { %3460 = vmatpush1.bf16.msra.mxu1 %v5664_v58  ;;  %v5720_v58 = vcombine.low %v425_v20, %v429_v22  ;;  %v481_v20 = vld [vmem:[#allocation2 + $0xc08] sm:$0xff] }
 0x147   :  { %3461 = vmatprep.subr.bf16.mxu1 %v5673_v36  ;;  %v5729_v36 = vcombine.high %v433_v30, %v437_v53  ;;  %v485_v22 = vld [vmem:[#allocation2 + $0xc28] sm:$0xff] }
 0x148   :  { %3624 = vmatpush1.bf16.msra.mxu0 %v5666_v35  ;;  %v5722_v35 = vcombine.low %v426_v23, %v430_v24  ;;  %v482_v23 = vld [vmem:[#allocation2 + $0xc10] sm:$0xff] }
 0x149   :  { %3625 = vmatprep.subr.bf16.mxu0 %v5675_v37  ;;  %v5731_v37 = vcombine.high %v434_v31, %v438_v32  ;;  %v486_v24 = vld [vmem:[#allocation2 + $0xc30] sm:$0xff] }
 0x14a   :  { %3462 = vmatpush1.bf16.msra.mxu1 %v5672_v43  ;;  %v5728_v43 = vcombine.low %v433_v30, %v437_v53  ;;  %v489_v30 = vld [vmem:[#allocation2 + $0xc48] sm:$0xff] }
 0x14b   :  { %3463 = vmatprep.subr.bf16.mxu1 %v5681_v46  ;;  %v5737_v46 = vcombine.high %v441_v38, %v445_v39  ;;  %v493_v53 = vld [vmem:[#allocation2 + $0xc68] sm:$0xff] }
 0x14c   :  { %3626 = vmatpush1.bf16.msra.mxu0 %v5674_v45  ;;  %v5730_v45 = vcombine.low %v434_v31, %v438_v32  ;;  %v490_v31 = vld [vmem:[#allocation2 + $0xc50] sm:$0xff] }
 0x14d   :  { %3627 = vmatprep.subr.bf16.mxu0 %v5683_v47  ;;  %v5739_v47 = vcombine.high %v442_v40, %v446_v41  ;;  %v494_v32 = vld [vmem:[#allocation2 + $0xc70] sm:$0xff] }
 0x14e   :  { %3464 = vmatpush1.bf16.msra.mxu1 %v5680_v12  ;;  %v5736_v12 = vcombine.low %v441_v38, %v445_v39  ;;  %v497_v38 = vld [vmem:[#allocation2 + $0xc88] sm:$0xff] }
 0x14f   :  { %3465 = vmatprep.subr.bf16.mxu1 %v5689_v52  ;;  %v5745_v52 = vcombine.high %v449_v48, %v453_v49  ;;  %v501_v39 = vld [vmem:[#allocation2 + $0xca8] sm:$0xff] }
 0x150   :  { %3628 = vmatpush1.bf16.msra.mxu0 %v5682_v14  ;;  %v5738_v14 = vcombine.low %v442_v40, %v446_v41  ;;  %v498_v40 = vld [vmem:[#allocation2 + $0xc90] sm:$0xff] }
 0x151   :  { %3629 = vmatprep.subr.bf16.mxu0 %v5691_v54  ;;  %v5747_v54 = vcombine.high %v450_v50, %v454_v51  ;;  %v502_v41 = vld [vmem:[#allocation2 + $0xcb0] sm:$0xff] }
 0x152   :  { %3466 = vmatpush1.bf16.msra.mxu1 %v5688_v60  ;;  %v5744_v60 = vcombine.low %v449_v48, %v453_v49  ;;  %v505_v48 = vld [vmem:[#allocation2 + $0xcc8] sm:$0xff] }
 0x153   :  { %3467 = vmatprep.subr.bf16.mxu1 %v5697_v62  ;;  %v5753_v62 = vcombine.high %v457_v55, %v461_v56  ;;  %v509_v49 = vld [vmem:[#allocation2 + $0xce8] sm:$0xff] }
 0x154   :  { %3630 = vmatpush1.bf16.msra.mxu0 %v5690_v61  ;;  %v5746_v61 = vcombine.low %v450_v50, %v454_v51  ;;  %v506_v50 = vld [vmem:[#allocation2 + $0xcd0] sm:$0xff] }
 0x155   :  { %3631 = vmatprep.subr.bf16.mxu0 %v5699_v0  ;;  %v5755_v0 = vcombine.high %v458_v57, %v462_v59  ;;  %v510_v51 = vld [vmem:[#allocation2 + $0xcf0] sm:$0xff] }
 0x156   :  { %3468 = vmatpush1.bf16.msra.mxu1 %v5696_v6  ;;  %v5752_v6 = vcombine.low %v457_v55, %v461_v56  ;;  %v5803_v55 = vcombine.high %v506_v50, %v510_v51  ;;  %v513_v56 = vld [vmem:[#allocation2 + $0xd08] sm:$0xff] }
 0x157   :  { %3469 = vmatprep.subr.bf16.mxu1 %v5705_v8  ;;  %v5761_v8 = vcombine.high %v465_v1, %v469_v3 }
 0x158   :  { %3632 = vmatpush1.bf16.msra.mxu0 %v5698_v7  ;;  %v5754_v7 = vcombine.low %v458_v57, %v462_v59  ;;  %v517_v57 = vld [vmem:[#allocation2 + $0xd28] sm:$0xff]  ;;  %v514_v59 = vld [vmem:[#allocation2 + $0xd10] sm:$0xff] }
 0x159   :  { %3633 = vmatprep.subr.bf16.mxu0 %v5707_v9  ;;  %v5763_v9 = vcombine.high %v466_v4, %v470_v5 }
 0x15a   :  { %3470 = vmatpush1.bf16.msra.mxu1 %v5704_v16  ;;  %v5760_v16 = vcombine.low %v465_v1, %v469_v3  ;;  %v90_v1 = vld [vmem:[#allocation7] ss:$8 sm:$0xf0]  ;;  %v5802_v3 = vcombine.low %v506_v50, %v510_v51 }
 0x15b   :  { %3471 = vmatprep.subr.bf16.mxu1 %v5713_v18  ;;  %v5769_v18 = vcombine.high %v473_v10, %v477_v11 }
 0x15c   :  { %3634 = vmatpush1.bf16.msra.mxu0 %v5706_v17  ;;  %v5762_v17 = vcombine.low %v466_v4, %v470_v5  ;;  %v5809_v4 = vcombine.high %v513_v56, %v517_v57 }
 0x15d   :  { %3635 = vmatprep.subr.bf16.mxu0 %v5715_v19  ;;  %v5771_v19 = vcombine.high %v474_v13, %v478_v15 }
 0x15e   :  { %3472 = vmatpush1.bf16.msra.mxu1 %v5712_v25  ;;  %v5768_v25 = vcombine.low %v473_v10, %v477_v11  ;;  %v522_v10 = vld [vmem:[#allocation2 + $0xd50] sm:$0xff] }
 0x15f   :  { %3473 = vmatprep.subr.bf16.mxu1 %v5721_v28  ;;  %v5777_v28 = vcombine.high %v481_v20, %v485_v22  ;;  %v526_v11 = vld [vmem:[#allocation2 + $0xd70] sm:$0xff] }
 0x160   :  { %3636 = vmatpush1.bf16.msra.mxu0 %v5714_v27  ;;  %v5770_v27 = vcombine.low %v474_v13, %v478_v15  ;;  %v5808_v13 = vcombine.low %v513_v56, %v517_v57 }
 0x161   :  { %3637 = vmatprep.subr.bf16.mxu0 %v5723_v29  ;;  %v5779_v29 = vcombine.high %v482_v23, %v486_v24 }
 0x162   :  { %3474 = vmatpush1.bf16.msra.mxu1 %v5720_v58  ;;  %v5776_v58 = vcombine.low %v481_v20, %v485_v22  ;;  %v533_v20 = vld [vmem:[#allocation2 + $0xda8] sm:$0xff] }
 0x163   :  { %3475 = vmatprep.subr.bf16.mxu1 %v5729_v36  ;;  %v5785_v36 = vcombine.high %v489_v30, %v493_v53 }
 0x164   :  { %3638 = vmatpush1.bf16.msra.mxu0 %v5722_v35  ;;  %v5778_v35 = vcombine.low %v482_v23, %v486_v24  ;;  %v530_v23 = vld [vmem:[#allocation2 + $0xd90] sm:$0xff] }
 0x165   :  { %3639 = vmatprep.subr.bf16.mxu0 %v5731_v37  ;;  %v5787_v37 = vcombine.high %v490_v31, %v494_v32  ;;  %v534_v24 = vld [vmem:[#allocation2 + $0xdb0] sm:$0xff] }
 0x166   :  { %3476 = vmatpush1.bf16.msra.mxu1 %v5728_v43  ;;  %v5784_v43 = vcombine.low %v489_v30, %v493_v53  ;;  %v5827_v53 = vcombine.high %v530_v23, %v534_v24 }
 0x167   :  { %3477 = vmatprep.subr.bf16.mxu1 %v5737_v46  ;;  %v5793_v46 = vcombine.high %v497_v38, %v501_v39 }
 0x168   :  { %3640 = vmatpush1.bf16.msra.mxu0 %v5730_v45  ;;  %v5786_v45 = vcombine.low %v490_v31, %v494_v32  ;;  %v537_v31 = vld [vmem:[#allocation2 + $0xdc8] sm:$0xff] }
 0x169   :  { %3641 = vmatprep.subr.bf16.mxu0 %v5739_v47  ;;  %v5795_v47 = vcombine.high %v498_v40, %v502_v41  ;;  %v541_v32 = vld [vmem:[#allocation2 + $0xde8] sm:$0xff] }
 0x16a   :  { %3478 = vmatpush1.bf16.msra.mxu1 %v5736_v12  ;;  %v609_v12 = vlaneseq  ;;  %v5832_v56 = vcombine.low %v537_v31, %v541_v32 }
 0x16b   :  { %3479 = vmatprep.subr.bf16.mxu1 %v5745_v52  ;;  %v5794_v52 = vcombine.low %v498_v40, %v502_v41 }
 0x16c   :  { %3642 = vmatpush1.bf16.msra.mxu0 %v5738_v14  ;;  %v5792_v14 = vcombine.low %v497_v38, %v501_v39  ;;  %v542_v38 = vld [vmem:[#allocation2 + $0xdf0] sm:$0xff] }
 0x16d   :  { %3643 = vmatprep.subr.bf16.mxu0 %v5747_v54  ;;  %v5801_v54 = vcombine.high %v505_v48, %v509_v49 }
 0x16e   :  { %3480 = vmatpush1.bf16.msra.mxu1 %v5744_v60  ;;  %v518_v60 = vld [vmem:[#allocation2 + $0xd30] sm:$0xff] }
 0x16f   :  { %3481 = vmatprep.subr.bf16.mxu1 %v5753_v62  ;;  %v5800_v62 = vcombine.low %v505_v48, %v509_v49  ;;  %v5811_v5 = vcombine.high %v514_v59, %v518_v60  ;;  %v5833_v48 = vcombine.high %v537_v31, %v541_v32  ;;  %v577_v31 = vld [vmem:[#allocation2 + $0xf08] sm:$0xff] }
 0x170   :  { %3644 = vmatpush1.bf16.msra.mxu0 %v5746_v61  ;;  %v6698_v61 = vshrl.u32 %v609_v12, 7  ;;  %v545_v12 = vld [vmem:[#allocation2 + $0xe08] sm:$0xff] }
 0x171   :  { %3645 = vmatprep.subr.bf16.mxu0 %v5755_v0  ;;  %v89_v0 = vld [vmem:[#allocation7] ss:$8 sm:$0xf] }
 0x172   :  { %3482 = vmatpush1.bf16.msra.mxu1 %v5752_v6  ;;  %v521_v6 = vld [vmem:[#allocation2 + $0xd48] sm:$0xff]  ;;  %v615_v15 = vsub.s32 1, %v6698_v61 }
 0x173   :  { %3483 = vmatprep.subr.bf16.mxu1 %v5761_v8  ;;  %v6700_v8 = vor.u32 %v90_v1, %v89_v0  ;;  %v557_v0 = vld [vmem:[#allocation2 + $0xe68] sm:$0xff]  ;;  %v554_v1 = vld [vmem:[#allocation2 + $0xe50] sm:$0xff] }
 0x174   :  { %3646 = vmatpush1.bf16.msra.mxu0 %v5754_v7  ;;  %v525_v7 = vld [vmem:[#allocation2 + $0xd68] sm:$0xff] }
 0x175   :  { %3647 = vmatprep.subr.bf16.mxu0 %v5763_v9  ;;  %v611_v9 = vsub.s32 0, %v6698_v61  ;;  %v581_v32 = vld [vmem:[#allocation2 + $0xf28] sm:$0xff] }
 0x176   :  { %3484 = vmatpush1.bf16.msra.mxu1 %v5760_v16  ;;  %v5810_v16 = vcombine.low %v514_v59, %v518_v60 }
 0x177   :  { %3485 = vmatprep.subr.bf16.mxu1 %v5769_v18  ;;  %v5819_v18 = vcombine.high %v522_v10, %v526_v11  ;;  %v612_v22 = vrot.slane %v6700_v8, %v611_v9 }
 0x178   :  { %3648 = vmatpush1.bf16.msra.mxu0 %v5762_v17  ;;  %v5817_v17 = vcombine.high %v521_v6, %v525_v7 }
 0x179   :  { %3649 = vmatprep.subr.bf16.mxu0 %v5771_v19  ;;  %v529_v19 = vld [vmem:[#allocation2 + $0xd88] sm:$0xff] }
 0x17a   :  { %3486 = vmatpush1.bf16.msra.mxu1 %v5768_v25  ;;  %v616_v25 = vrot.slane %v6700_v8, %v615_v15 }
 0x17b   :  { %3496 = vmatprep.subr.bf16.mxu1 %v5777_v28  ;;  %v5818_v28 = vcombine.low %v522_v10, %v526_v11  ;;  %v561_v10 = vld [vmem:[#allocation2 + $0xe88] sm:$0xff] }
 0x17c   :  { %3650 = vmatpush1.bf16.msra.mxu0 %v5770_v27  ;;  %v5816_v27 = vcombine.low %v521_v6, %v525_v7  ;;  %v565_v11 = vld [vmem:[#allocation2 + $0xea8] sm:$0xff] }
 0x17d   :  { %3660 = vmatprep.subr.bf16.mxu0 %v5779_v29  ;;  %3488 = vmatmul.mubr.bf16.vlgmr.msra.gmra.mrb[4].mxu1 %v6664_v26  ;;  %v5825_v29 = vcombine.high %v529_v19, %v533_v20 }
 0x17e   :  { %3497 = vmatpush1.bf16.msra.mxu1 %v5776_v58  ;;  %3528 = vmatprep.mubr.bf16.mxu1 %v6669_v34 }
 0x17f   :  { %3652 = vmatmul.mubr.bf16.vlgmr.msra.gmra.mrb[4].mxu0 %v6664_v26  ;;  %3498 = vmatprep.subr.bf16.mxu1 %v5785_v36 }
 0x180   :  { %3661 = vmatpush1.bf16.msra.mxu0 %v5778_v35  ;;  %3692 = vmatprep.mubr.bf16.mxu0 %v6669_v34 }
 0x181   :  { %3662 = vmatprep.subr.bf16.mxu0 %v5787_v37  ;;  %v538_v37 = vld [vmem:[#allocation2 + $0xdd0] sm:$0xff] }
 0x182   :  { %3499 = vmatpush1.bf16.msra.mxu1 %v5784_v43  ;;  %v5824_v43 = vcombine.low %v529_v19, %v533_v20  ;;  %v5835_v51 = vcombine.high %v538_v37, %v542_v38  ;;  %v5834_v57 = vcombine.low %v538_v37, %v542_v38  ;;  %v5857_v19 = vcombine.high %v561_v10, %v565_v11 }
 0x183   :  { %3500 = vmatprep.subr.bf16.mxu1 %v5793_v46 }
 0x184   :  { %3663 = vmatpush1.bf16.msra.mxu0 %v5786_v45 }
 0x185   :  { %3664 = vmatprep.subr.bf16.mxu0 %v5795_v47  ;;  %v5826_v47 = vcombine.low %v530_v23, %v534_v24  ;;  %v573_v23 = vld [vmem:[#allocation2 + $0xee8] sm:$0xff] }
 0x186   :  { %3501 = vmatpush1.bf16.msra.mxu1 %v5792_v14  ;;  %v549_v14 = vld [vmem:[#allocation2 + $0xe28] sm:$0xff] }
 0x187   :  { %3502 = vmatprep.subr.bf16.mxu1 %v5801_v54  ;;  %v546_v54 = vld [vmem:[#allocation2 + $0xe10] sm:$0xff]  ;;  %v5841_v59 = vcombine.high %v545_v12, %v549_v14 }
 0x188   :  { %3665 = vmatpush1.bf16.msra.mxu0 %v5794_v52 }
 0x189   :  { %3666 = vmatprep.subr.bf16.mxu0 %v5803_v55  ;;  %v550_v55 = vld [vmem:[#allocation2 + $0xe30] sm:$0xff] }
 0x18a   :  { %3503 = vmatpush1.bf16.msra.mxu1 %v5800_v62  ;;  %v5843_v60 = vcombine.high %v546_v54, %v550_v55  ;;  %v553_v62 = vld [vmem:[#allocation2 + $0xe48] sm:$0xff] }
 0x18b   :  { %3504 = vmatprep.subr.bf16.mxu1 %v5809_v4  ;;  %v5840_v4 = vcombine.low %v545_v12, %v549_v14  ;;  %v5849_v6 = vcombine.high %v553_v62, %v557_v0  ;;  %v593_v14 = vld [vmem:[#allocation2 + $0xf88] sm:$0xff] }
 0x18c   :  { %3667 = vmatpush1.bf16.msra.mxu0 %v5802_v3  ;;  %v558_v3 = vld [vmem:[#allocation2 + $0xe70] sm:$0xff] }
 0x18d   :  { %3668 = vmatprep.subr.bf16.mxu0 %v5811_v5  ;;  %v5842_v5 = vcombine.low %v546_v54, %v550_v55  ;;  %v5851_v7 = vcombine.high %v554_v1, %v558_v3  ;;  %v594_v54 = vld [vmem:[#allocation2 + $0xf90] sm:$0xff] }
 0x18e   :  { %3505 = vmatpush1.bf16.msra.mxu1 %v5808_v13  ;;  %v562_v13 = vld [vmem:[#allocation2 + $0xe90] sm:$0xff] }
 0x18f   :  { %3506 = vmatprep.subr.bf16.mxu1 %v5817_v17  ;;  %v5848_v17 = vcombine.low %v553_v62, %v557_v0  ;;  %v598_v55 = vld [vmem:[#allocation2 + $0xfb0] sm:$0xff]  ;;  %v601_v62 = vld [vmem:[#allocation2 + $0xfc8] sm:$0xff] }
 0x190   :  { %3669 = vmatpush1.bf16.msra.mxu0 %v5810_v16  ;;  %v3284_v30 = vpop.f32.mrb[0].mxu1  ;;  %v566_v16 = vld [vmem:[#allocation2 + $0xeb0] sm:$0xff]  ;;  %v605_v0 = vld [vmem:[#allocation2 + $0xfe8] sm:$0xff] }
 0x191   :  { %3670 = vmatprep.subr.bf16.mxu0 %v5819_v18  ;;  %v6105_v58 = vadd.f32 %v3284_v30, %v612_v22  ;;  %v3286_v35 = vpop.f32.mrb[1].mxu1  ;;  %v5850_v18 = vcombine.low %v554_v1, %v558_v3  ;;  %v5859_v20 = vcombine.high %v562_v13, %v566_v16  ;;  %v569_v22 = vld [vmem:[#allocation2 + $0xec8] sm:$0xff]  ;;  %v602_v1 = vld [vmem:[#allocation2 + $0xfd0] sm:$0xff] }
 0x192   :  { %v3366_v36 = vpop.f32.mrb[0].mxu0  ;;  %v6107_v39 = vadd.f32 %v3286_v35, %v616_v25  ;;  %v3288_v40 = vpop.f32.mrb[2].mxu1  ;;  %3507 = vmatpush1.bf16.msra.mxu1 %v5816_v27  ;;  %v570_v25 = vld [vmem:[#allocation2 + $0xed0] sm:$0xff]  ;;  %v5865_v30 = vcombine.high %v569_v22, %v573_v23  ;;  %v5864_v37 = vcombine.low %v569_v22, %v573_v23  ;;  %v107_v22 = vld [vmem:[#allocation2 + $0x58] sm:$0xff] }
 0x193   :  { %v3368_v41 = vpop.f32.mrb[1].mxu0  ;;  %v6710_v45 = vadd.f32 %v6105_v58, %v3366_v36  ;;  %v3289_v46 = vpop.f32.mrb[3].mxu1  ;;  %3508 = vmatprep.subr.bf16.mxu1 %v5825_v29  ;;  %v574_v27 = vld [vmem:[#allocation2 + $0xef0] sm:$0xff]  ;;  %v5858_v29 = vcombine.low %v562_v13, %v566_v16  ;;  %v103_v13 = vld [vmem:[#allocation2 + $0x38] sm:$0xff]  ;;  %v5896_v16 = vcombine.low %v601_v62, %v605_v0 }
 0x194   :  { %3671 = vmatpush1.bf16.msra.mxu0 %v5818_v28  ;;  %v3370_v49 = vpop.f32.mrb[2].mxu0  ;;  %v6712_v50 = vadd.f32 %v6107_v39, %v3368_v41  ;;  %v5856_v28 = vcombine.low %v561_v10, %v565_v11  ;;  %v578_v35 = vld [vmem:[#allocation2 + $0xf10] sm:$0xff]  ;;  %v5866_v38 = vcombine.low %v570_v25, %v574_v27  ;;  %v5873_v39 = vcombine.high %v577_v31, %v581_v32  ;;  %v585_v41 = vld [vmem:[#allocation2 + $0xf48] sm:$0xff]  ;;  %v99_v11 = vld [vmem:[#allocation2 + $0x18] sm:$0xff] }
 0x195   :  { %3672 = vmatprep.subr.bf16.mxu0 %v5827_v53  ;;  %v3371_v52 = vpop.f32.mrb[3].mxu0  ;;  %v5867_v53 = vcombine.high %v570_v25, %v574_v27  ;;  %v582_v36 = vld [vmem:[#allocation2 + $0xf30] sm:$0xff]  ;;  %v111_v23 = vld [vmem:[#allocation2 + $0x78] sm:$0xff]  ;;  %v6188_v27 = vld [vmem:[#allocation5] ss:$8 sps:$4 sm:$0xff]   ;;  %vm3865_vm1 = vcmp.gt.f32.partialorder %v6710_v45, 0.0 }
 0x196   :  { %3509 = vmatpush1.bf16.msra.mxu1 %v5824_v43  ;;  %v3874_v24 = vmin.f32 %v6712_v50, 0.0  ;;  %v5875_v40 = vcombine.high %v578_v35, %v582_v36  ;;  %v589_v43 = vld [vmem:[#allocation2 + $0xf68] sm:$0xff]  ;;  %v586_v46 = vld [vmem:[#allocation2 + $0xf50] sm:$0xff]  ;;  %v5874_v49 = vcombine.low %v578_v35, %v582_v36  ;;  %vm3866_vm0 = vcmp.gt.f32.partialorder %v6712_v50, 0.0  ;;  %v123_v36 = vld [vmem:[#allocation2 + $0xd8] sm:$0xff] }
 0x197   :  { %3510 = vmatprep.subr.bf16.mxu1 %v5833_v48  ;;  %v5872_v48 = vcombine.low %v577_v31, %v581_v32  ;;  %v597_v52 = vld [vmem:[#allocation2 + $0xfa8] sm:$0xff]  ;;  %v606_v3 = vld [vmem:[#allocation2 + $0xff0] sm:$0xff]  ;;  %v5404_v32 = vcombine.low %v107_v22, %v111_v23 }
 0x198   :  { %3673 = vmatpush1.bf16.msra.mxu0 %v5826_v47  ;;  %v3883_v58 = vmul.f32 1.442695, %v3874_v24  ;;  %v590_v47 = vld [vmem:[#allocation2 + $0xf70] sm:$0xff]  ;;  %v5899_v10 = vcombine.high %v602_v1, %v606_v3  ;;  %v5396_v24 = vcombine.low %v99_v11, %v103_v13 }
 0x199   :  { %3674 = vmatprep.subr.bf16.mxu0 %v5835_v51  ;;  %v5881_v51 = vcombine.high %v585_v41, %v589_v43  ;;  %v5883_v12 = vcombine.high %v586_v46, %v590_v47 }
 0x19a   :  { %3511 = vmatpush1.bf16.msra.mxu1 %v5832_v56  ;;  %6396 = vpow2.f32 %v3883_v58  ;;  %v5880_v56 = vcombine.low %v585_v41, %v589_v43  ;;  %v6191_v58 = vld [vmem:[#allocation5 + $0x10] ss:$8 sps:$4 sm:$0xff]   ;;  %v6199_v41 = vld [vmem:[#allocation5 + $0x34] ss:$8 sps:$4 sm:$0xff]  }
 0x19b   :  { %3512 = vmatprep.subr.bf16.mxu1 %v5841_v59  ;;  %v5889_v59 = vcombine.high %v593_v14, %v597_v52  ;;  %v131_v43 = vld [vmem:[#allocation2 + $0x118] sm:$0xff] }
 0x19c   :  { %3675 = vmatpush1.bf16.msra.mxu0 %v5834_v57  ;;  %v5882_v57 = vcombine.low %v586_v46, %v590_v47  ;;  %v135_v46 = vld [vmem:[#allocation2 + $0x138] sm:$0xff] }
 0x19d   :  { %3676 = vmatprep.subr.bf16.mxu0 %v5843_v60  ;;  %v5891_v60 = vcombine.high %v594_v54, %v598_v55 }
 0x19e   :  { %3513 = vmatpush1.bf16.msra.mxu1 %v5840_v4  ;;  %v5888_v4 = vcombine.low %v593_v14, %v597_v52  ;;  %v5428_v14 = vcombine.low %v131_v43, %v135_v46  ;;  %v6200_v52 = vld [vmem:[#allocation5 + $0x40] ss:$8 sps:$4 sm:$0xff]  }
 0x19f   :  { %3514 = vmatprep.subr.bf16.mxu1 %v5849_v6  ;;  %v5890_v6 = vcombine.low %v594_v54, %v598_v55  ;;  %v6205_v55 = vld [vmem:[#allocation5 + $0x54] ss:$8 sps:$4 sm:$0xff]  }
 0x1a0   :  { %3677 = vmatpush1.bf16.msra.mxu0 %v5842_v5 }
 0x1a1   :  { %3678 = vmatprep.subr.bf16.mxu0 %v5851_v7  ;;  %v5897_v7 = vcombine.high %v601_v62, %v605_v0  ;;  %v6208_v0 = vld [vmem:[#allocation5 + $0x64] ss:$8 sps:$4 sm:$0xff]  }
 0x1a2   :  { %3515 = vmatpush1.bf16.msra.mxu1 %v5848_v17 }
 0x1a3   :  { %3516 = vmatprep.subr.bf16.mxu1 %v5857_v19  ;;  %v5397_v19 = vcombine.high %v99_v11, %v103_v13  ;;  %v167_v11 = vld [vmem:[#allocation2 + $0x238] sm:$0xff] }
 0x1a4   :  { %3679 = vmatpush1.bf16.msra.mxu0 %v5850_v18  ;;  %v6397_v5 = vpop.eup %6396  ;;  %v5898_v18 = vcombine.low %v602_v1, %v606_v3  ;;  %v155_v1 = vld [vmem:[#allocation2 + $0x1d8] sm:$0xff] }
 0x1a5   :  { %3680 = vmatprep.subr.bf16.mxu0 %v5859_v20  ;;  %v5903_v17 = vadd.f32 -1.0, %v6397_v5  ;;  %v6190_v20 = vld [vmem:[#allocation5 + $0x4] ss:$8 sps:$4 sm:$0xff]   ;;  %v159_v3 = vld [vmem:[#allocation2 + $0x1f8] sm:$0xff]  ;;  %v6206_v5 = vld [vmem:[#allocation5 + $0x60] ss:$8 sps:$4 sm:$0xff]  }
 0x1a6   :  { %3517 = vmatpush1.bf16.msra.mxu1 %v5856_v28  ;;  %v5405_v28 = vcombine.high %v107_v22, %v111_v23  ;;  %v5452_v13 = vcombine.low %v155_v1, %v159_v3  ;;  %v6212_v23 = vld [vmem:[#allocation5 + $0x80] ss:$8 sps:$4 sm:$0xff]  }
 0x1a7   :  { %3518 = vmatprep.subr.bf16.mxu1 %v5865_v30  ;;  %v3906_v25 = vsel %vm3866_vm0, %v6712_v50, %v5903_v17  ;;  %v115_v30 = vld [vmem:[#allocation2 + $0x98] sm:$0xff]  ;;  %v6196_v50 = vld [vmem:[#allocation5 + $0x24] ss:$8 sps:$4 sm:$0xff]  }
 0x1a8   :  { %3681 = vmatpush1.bf16.msra.mxu0 %v5858_v29  ;;  %v6193_v29 = vld [vmem:[#allocation5 + $0x14] ss:$8 sps:$4 sm:$0xff]   ;;  %v3914_v31 = vpack.c.bf16 %v3906_v25, %v3906_v25 }
 0x1a9   :  { %3682 = vmatprep.subr.bf16.mxu0 %v5867_v53  ;;  %v119_v53 = vld [vmem:[#allocation2 + $0xb8] sm:$0xff] }
 0x1aa   :  { %3519 = vmatpush1.bf16.msra.mxu1 %v5864_v37  ;;  %v5413_v35 = vcombine.high %v115_v30, %v119_v53  ;;  %v127_v37 = vld [vmem:[#allocation2 + $0xf8] sm:$0xff] }
 0x1ab   :  { %3520 = vmatprep.subr.bf16.mxu1 %v5873_v39  ;;  %v6194_v39 = vld [vmem:[#allocation5 + $0x20] ss:$8 sps:$4 sm:$0xff]   ;;  %v5420_v47 = vcombine.low %v123_v36, %v127_v37  ;;  %v6217_v25 = vld [vmem:[#allocation5 + $0x94] ss:$8 sps:$4 sm:$0xff]  }
 0x1ac   :  { %3683 = vmatpush1.bf16.msra.mxu0 %v5866_v38  ;;  %v5412_v38 = vcombine.low %v115_v30, %v119_v53  ;;  %v6215_v30 = vld [vmem:[#allocation5 + $0x90] ss:$8 sps:$4 sm:$0xff]  }
 0x1ad   :  { %3684 = vmatprep.subr.bf16.mxu0 %v5875_v40  ;;  %v5421_v40 = vcombine.high %v123_v36, %v127_v37  ;;  %v6218_v36 = vld [vmem:[#allocation5 + $0xa0] ss:$8 sps:$4 sm:$0xff]  }
 0x1ae   :  { %3521 = vmatpush1.bf16.msra.mxu1 %v5872_v48  ;;  %v6197_v48 = vld [vmem:[#allocation5 + $0x30] ss:$8 sps:$4 sm:$0xff]  }
 0x1af   :  { %3522 = vmatprep.subr.bf16.mxu1 %v5881_v51  ;;  %v6202_v51 = vld [vmem:[#allocation5 + $0x44] ss:$8 sps:$4 sm:$0xff]  }
 0x1b0   :  { %3685 = vmatpush1.bf16.msra.mxu0 %v5874_v49  ;;  %v5429_v49 = vcombine.high %v131_v43, %v135_v46  ;;  %v6221_v46 = vld [vmem:[#allocation5 + $0xb0] ss:$8 sps:$4 sm:$0xff]  }
 0x1b1   :  { %3686 = vmatprep.subr.bf16.mxu0 %v5883_v12  ;;  %v139_v12 = vld [vmem:[#allocation2 + $0x158] sm:$0xff] }
 0x1b2   :  { %3523 = vmatpush1.bf16.msra.mxu1 %v5880_v56  ;;  %v147_v56 = vld [vmem:[#allocation2 + $0x198] sm:$0xff] }
 0x1b3   :  { %3524 = vmatprep.subr.bf16.mxu1 %v5889_v59 }
 0x1b4   :  { %3687 = vmatpush1.bf16.msra.mxu0 %v5882_v57  ;;  %v151_v57 = vld [vmem:[#allocation2 + $0x1b8] sm:$0xff] }
 0x1b5   :  { %3688 = vmatprep.subr.bf16.mxu0 %v5891_v60  ;;  %v6203_v60 = vld [vmem:[#allocation5 + $0x50] ss:$8 sps:$4 sm:$0xff]   ;;  %v5445_v62 = vcombine.high %v147_v56, %v151_v57 }
 0x1b6   :  { %3525 = vmatpush1.bf16.msra.mxu1 %v5888_v4  ;;  %v5444_v4 = vcombine.low %v147_v56, %v151_v57  ;;  %v6227_v57 = vld [vmem:[#allocation5 + $0xd0] ss:$8 sps:$4 sm:$0xff]  }
 0x1b7   :  { %3526 = vmatprep.subr.bf16.mxu1 %v5897_v7  ;;  %v6211_v7 = vld [vmem:[#allocation5 + $0x74] ss:$8 sps:$4 sm:$0xff]  }
 0x1b8   :  { %3689 = vmatpush1.bf16.msra.mxu0 %v5890_v6  ;;  %v5453_v6 = vcombine.high %v155_v1, %v159_v3 }
 0x1b9   :  { %3690 = vmatprep.subr.bf16.mxu0 %v5899_v10  ;;  %v163_v10 = vld [vmem:[#allocation2 + $0x218] sm:$0xff] }
 0x1ba   :  { %3527 = vmatpush1.bf16.msra.mxu1 %v5896_v16  ;;  %v6209_v16 = vld [vmem:[#allocation5 + $0x70] ss:$8 sps:$4 sm:$0xff]   ;;  %v5461_v17 = vcombine.high %v163_v10, %v167_v11  ;;  %v5460_v22 = vcombine.low %v163_v10, %v167_v11 }
 0x1bb   :  { %3701 = vmatprep.subr.bf16.mxu1 %v5397_v19  ;;  %v171_v19 = vld [vmem:[#allocation2 + $0x258] sm:$0xff] }
 0x1bc   :  { %3691 = vmatpush1.bf16.msra.mxu0 %v5898_v18  ;;  %v6214_v18 = vld [vmem:[#allocation5 + $0x84] ss:$8 sps:$4 sm:$0xff]   ;;  %v231_v10 = vld [vmem:[#allocation2 + $0x438] sm:$0xff] }
 0x1bd   :  { %4700 = vmatprep.subr.bf16.mxu0 %v6190_v20  ;;  %3529 = vmatmul.mubr.bf16.vlgmr.msra.gmra.mrb[4].mxu1 %v6680_v44  ;;  %v175_v20 = vld [vmem:[#allocation2 + $0x278] sm:$0xff] }
 0x1be   :  { %3702 = vmatpush1.bf16.msra.mxu1 %v5396_v24  ;;  %3733 = vmatprep.mubr.bf16.mxu1 %v6638_v63  ;;  %v143_v63 = vld [vmem:[#allocation2 + $0x178] sm:$0xff]  ;;  %v5469_v24 = vcombine.high %v171_v19, %v175_v20 }
 0x1bf   :  { %3693 = vmatmul.mubr.bf16.vlgmr.msra.gmra.mrb[4].mxu0 %v6680_v44  ;;  %3703 = vmatprep.subr.bf16.mxu1 %v5405_v28  ;;  %v5437_v54 = vcombine.high %v139_v12, %v143_v63  ;;  %v5436_v59 = vcombine.low %v139_v12, %v143_v63  ;;  %v183_v28 = vld [vmem:[#allocation2 + $0x2b8] sm:$0xff]  ;;  %v6224_v63 = vld [vmem:[#allocation5 + $0xc0] ss:$8 sps:$4 sm:$0xff]  }
 0x1c0   :  { %4701 = vmatpush1.bf16.msra.mxu0 %v6188_v27  ;;  %4732 = vmatprep.mubr.bf16.mxu0 %v3914_v31  ;;  %v179_v27 = vld [vmem:[#allocation2 + $0x298] sm:$0xff]  ;;  %v3873_v31 = vmin.f32 %v6710_v45, 0.0 }
 0x1c1   :  { %4702 = vmatprep.subr.bf16.mxu0 %v6193_v29  ;;  %v5468_v29 = vcombine.low %v171_v19, %v175_v20  ;;  %v5477_v53 = vcombine.high %v179_v27, %v183_v28  ;;  %v239_v19 = vld [vmem:[#allocation2 + $0x478] sm:$0xff]  ;;  %v6238_v20 = vld [vmem:[#allocation5 + $0x104] ss:$8 sps:$4 sm:$0xff]  }
 0x1c2   :  { %3704 = vmatpush1.bf16.msra.mxu1 %v5404_v32  ;;  %v6220_v32 = vld [vmem:[#allocation5 + $0xa4] ss:$8 sps:$4 sm:$0xff]  }
 0x1c3   :  { %3705 = vmatprep.subr.bf16.mxu1 %v5413_v35  ;;  %v191_v35 = vld [vmem:[#allocation2 + $0x2f8] sm:$0xff] }
 0x1c4   :  { %4703 = vmatpush1.bf16.msra.mxu0 %v6191_v58  ;;  %v187_v58 = vld [vmem:[#allocation2 + $0x2d8] sm:$0xff] }
 0x1c5   :  { %4704 = vmatprep.subr.bf16.mxu0 %v6196_v50  ;;  %v5476_v50 = vcombine.low %v179_v27, %v183_v28  ;;  %v5485_v37 = vcombine.high %v187_v58, %v191_v35  ;;  %v5484_v43 = vcombine.low %v187_v58, %v191_v35  ;;  %v243_v27 = vld [vmem:[#allocation2 + $0x498] sm:$0xff]  ;;  %v6244_v35 = vld [vmem:[#allocation5 + $0x124] ss:$8 sps:$4 sm:$0xff]  }
 0x1c6   :  { %3706 = vmatpush1.bf16.msra.mxu1 %v5412_v38  ;;  %v3881_v38 = vmul.f32 1.442695, %v3873_v31  ;;  %v247_v28 = vld [vmem:[#allocation2 + $0x4b8] sm:$0xff] }
 0x1c7   :  { %3707 = vmatprep.subr.bf16.mxu1 %v5421_v40  ;;  %v195_v40 = vld [vmem:[#allocation2 + $0x318] sm:$0xff]  ;;  %v5541_v31 = vcombine.high %v243_v27, %v247_v28 }
 0x1c8   :  { %4705 = vmatpush1.bf16.msra.mxu0 %v6194_v39  ;;  %v6223_v39 = vld [vmem:[#allocation5 + $0xb4] ss:$8 sps:$4 sm:$0xff]   ;;  %6398 = vpow2.f32 %v3881_v38  ;;  %v6239_v58 = vld [vmem:[#allocation5 + $0x110] ss:$8 sps:$4 sm:$0xff]   ;;  %v6242_v38 = vld [vmem:[#allocation5 + $0x120] ss:$8 sps:$4 sm:$0xff]  }
 0x1c9   :  { %4706 = vmatprep.subr.bf16.mxu0 %v6199_v41  ;;  %v199_v41 = vld [vmem:[#allocation2 + $0x338] sm:$0xff] }
 0x1ca   :  { %3708 = vmatpush1.bf16.msra.mxu1 %v5420_v47  ;;  %v5493_v47 = vcombine.high %v195_v40, %v199_v41  ;;  %v5492_v12 = vcombine.low %v195_v40, %v199_v41  ;;  %v267_v41 = vld [vmem:[#allocation2 + $0x558] sm:$0xff] }
 0x1cb   :  { %3709 = vmatprep.subr.bf16.mxu1 %v5429_v49  ;;  %v203_v49 = vld [vmem:[#allocation2 + $0x358] sm:$0xff] }
 0x1cc   :  { %4707 = vmatpush1.bf16.msra.mxu0 %v6197_v48  ;;  %v6226_v48 = vld [vmem:[#allocation5 + $0xc4] ss:$8 sps:$4 sm:$0xff]  }
 0x1cd   :  { %4708 = vmatprep.subr.bf16.mxu0 %v6202_v51  ;;  %v207_v51 = vld [vmem:[#allocation2 + $0x378] sm:$0xff] }
 0x1ce   :  { %3710 = vmatpush1.bf16.msra.mxu1 %v5428_v14  ;;  %v5501_v14 = vcombine.high %v203_v49, %v207_v51  ;;  %v5500_v56 = vcombine.low %v203_v49, %v207_v51  ;;  %v275_v51 = vld [vmem:[#allocation2 + $0x598] sm:$0xff] }
 0x1cf   :  { %3711 = vmatprep.subr.bf16.mxu1 %v5437_v54  ;;  %v211_v54 = vld [vmem:[#allocation2 + $0x398] sm:$0xff] }
 0x1d0   :  { %4709 = vmatpush1.bf16.msra.mxu0 %v6200_v52  ;;  %v6229_v52 = vld [vmem:[#allocation5 + $0xd4] ss:$8 sps:$4 sm:$0xff]  }
 0x1d1   :  { %4710 = vmatprep.subr.bf16.mxu0 %v6205_v55  ;;  %v215_v55 = vld [vmem:[#allocation2 + $0x3b8] sm:$0xff] }
 0x1d2   :  { %3712 = vmatpush1.bf16.msra.mxu1 %v5436_v59  ;;  %v5509_v59 = vcombine.high %v211_v54, %v215_v55  ;;  %v6399_v1 = vpop.eup %6398  ;;  %v5508_v3 = vcombine.low %v211_v54, %v215_v55  ;;  %v283_v55 = vld [vmem:[#allocation2 + $0x5d8] sm:$0xff] }
 0x1d3   :  { %3713 = vmatprep.subr.bf16.mxu1 %v5445_v62  ;;  %v219_v62 = vld [vmem:[#allocation2 + $0x3d8] sm:$0xff]  ;;  %v5902_v11 = vadd.f32 -1.0, %v6399_v1 }
 0x1d4   :  { %4711 = vmatpush1.bf16.msra.mxu0 %v6203_v60  ;;  %v6232_v60 = vld [vmem:[#allocation5 + $0xe4] ss:$8 sps:$4 sm:$0xff]   ;;  %v295_v1 = vld [vmem:[#allocation2 + $0x638] sm:$0xff] }
 0x1d5   :  { %4712 = vmatprep.subr.bf16.mxu0 %v6208_v0  ;;  %v223_v0 = vld [vmem:[#allocation2 + $0x3f8] sm:$0xff] }
 0x1d6   :  { %3714 = vmatpush1.bf16.msra.mxu1 %v5444_v4  ;;  %v6230_v4 = vld [vmem:[#allocation5 + $0xe0] ss:$8 sps:$4 sm:$0xff]  }
 0x1d7   :  { %3715 = vmatprep.subr.bf16.mxu1 %v5453_v6  ;;  %v6235_v6 = vld [vmem:[#allocation5 + $0xf4] ss:$8 sps:$4 sm:$0xff]  }
 0x1d8   :  { %4713 = vmatpush1.bf16.msra.mxu0 %v6206_v5  ;;  %v5517_v5 = vcombine.high %v219_v62, %v223_v0 }
 0x1d9   :  { %4714 = vmatprep.subr.bf16.mxu0 %v6211_v7  ;;  %v227_v7 = vld [vmem:[#allocation2 + $0x418] sm:$0xff] }
 0x1da   :  { %3716 = vmatpush1.bf16.msra.mxu1 %v5452_v13  ;;  %v5516_v13 = vcombine.low %v219_v62, %v223_v0  ;;  %v291_v0 = vld [vmem:[#allocation2 + $0x618] sm:$0xff] }
 0x1db   :  { %3717 = vmatprep.subr.bf16.mxu1 %v5461_v17  ;;  %v5525_v17 = vcombine.high %v227_v7, %v231_v10 }
 0x1dc   :  { %4715 = vmatpush1.bf16.msra.mxu0 %v6209_v16  ;;  %v6233_v16 = vld [vmem:[#allocation5 + $0xf0] ss:$8 sps:$4 sm:$0xff]  }
 0x1dd   :  { %4716 = vmatprep.subr.bf16.mxu0 %v6214_v18  ;;  %v235_v18 = vld [vmem:[#allocation2 + $0x458] sm:$0xff] }
 0x1de   :  { %3718 = vmatpush1.bf16.msra.mxu1 %v5460_v22  ;;  %v3905_v22 = vsel %vm3865_vm1, %v6710_v45, %v5902_v11  ;;  %v251_v45 = vld [vmem:[#allocation2 + $0x4d8] sm:$0xff] }
 0x1df   :  { %3719 = vmatprep.subr.bf16.mxu1 %v5469_v24  ;;  %v5533_v24 = vcombine.high %v235_v18, %v239_v19  ;;  %v6257_v11 = vld [vmem:[#allocation5 + $0x170] ss:$8 sps:$4 sm:$0xff]  }
 0x1e0   :  { %4717 = vmatpush1.bf16.msra.mxu0 %v6212_v23  ;;  %v5524_v23 = vcombine.low %v227_v7, %v231_v10  ;;  %v299_v7 = vld [vmem:[#allocation2 + $0x658] sm:$0xff] }
 0x1e1   :  { %4718 = vmatprep.subr.bf16.mxu0 %v6217_v25  ;;  %v3913_v25 = vpack.c.bf16 %v3905_v22, %v3905_v22  ;;  %v303_v10 = vld [vmem:[#allocation2 + $0x678] sm:$0xff] }
 0x1e2   :  { %3720 = vmatpush1.bf16.msra.mxu1 %v5468_v29  ;;  %v6236_v29 = vld [vmem:[#allocation5 + $0x100] ss:$8 sps:$4 sm:$0xff]   ;;  %v6265_v22 = vld [vmem:[#allocation5 + $0x194] ss:$8 sps:$4 sm:$0xff]  }
 0x1e3   :  { %3721 = vmatprep.subr.bf16.mxu1 %v5477_v53  ;;  %v5532_v53 = vcombine.low %v235_v18, %v239_v19  ;;  %v307_v18 = vld [vmem:[#allocation2 + $0x698] sm:$0xff] }
 0x1e4   :  { %4719 = vmatpush1.bf16.msra.mxu0 %v6215_v30  ;;  %v6241_v30 = vld [vmem:[#allocation5 + $0x114] ss:$8 sps:$4 sm:$0xff]  }
 0x1e5   :  { %4720 = vmatprep.subr.bf16.mxu0 %v6220_v32  ;;  %v255_v32 = vld [vmem:[#allocation2 + $0x4f8] sm:$0xff] }
 0x1e6   :  { %3722 = vmatpush1.bf16.msra.mxu1 %v5476_v50  ;;  %v5540_v50 = vcombine.low %v243_v27, %v247_v28  ;;  %v5548_v40 = vcombine.low %v251_v45, %v255_v32  ;;  %v311_v19 = vld [vmem:[#allocation2 + $0x6b8] sm:$0xff] }
 0x1e7   :  { %3723 = vmatprep.subr.bf16.mxu1 %v5485_v37  ;;  %v259_v37 = vld [vmem:[#allocation2 + $0x518] sm:$0xff] }
 0x1e8   :  { %4721 = vmatpush1.bf16.msra.mxu0 %v6218_v36  ;;  %v5549_v36 = vcombine.high %v251_v45, %v255_v32  ;;  %v319_v27 = vld [vmem:[#allocation2 + $0x6f8] sm:$0xff]  ;;  %v6266_v32 = vld [vmem:[#allocation5 + $0x1a0] ss:$8 sps:$4 sm:$0xff]  }
 0x1e9   :  { %4722 = vmatprep.subr.bf16.mxu0 %v6223_v39  ;;  %v6247_v39 = vld [vmem:[#allocation5 + $0x134] ss:$8 sps:$4 sm:$0xff]   ;;  %v6263_v28 = vld [vmem:[#allocation5 + $0x190] ss:$8 sps:$4 sm:$0xff]  }
 0x1ea   :  { %3724 = vmatpush1.bf16.msra.mxu1 %v5484_v43  ;;  %v271_v43 = vld [vmem:[#allocation2 + $0x578] sm:$0xff] }
 0x1eb   :  { %3725 = vmatprep.subr.bf16.mxu1 %v5493_v47  ;;  %v6250_v47 = vld [vmem:[#allocation5 + $0x144] ss:$8 sps:$4 sm:$0xff]   ;;  %v5565_v49 = vcombine.high %v267_v41, %v271_v43  ;;  %v327_v45 = vld [vmem:[#allocation2 + $0x738] sm:$0xff] }
 0x1ec   :  { %4723 = vmatpush1.bf16.msra.mxu0 %v6221_v46  ;;  %v6245_v46 = vld [vmem:[#allocation5 + $0x130] ss:$8 sps:$4 sm:$0xff]  }
 0x1ed   :  { %4724 = vmatprep.subr.bf16.mxu0 %v6226_v48 }
 0x1ee   :  { %3726 = vmatpush1.bf16.msra.mxu1 %v5492_v12  ;;  %v279_v12 = vld [vmem:[#allocation2 + $0x5b8] sm:$0xff] }
 0x1ef   :  { %3727 = vmatprep.subr.bf16.mxu1 %v5501_v14  ;;  %v6253_v14 = vld [vmem:[#allocation5 + $0x154] ss:$8 sps:$4 sm:$0xff]   ;;  %v5573_v54 = vcombine.high %v275_v51, %v279_v12 }
 0x1f0   :  { %4725 = vmatpush1.bf16.msra.mxu0 %v6224_v63  ;;  %v6248_v63 = vld [vmem:[#allocation5 + $0x140] ss:$8 sps:$4 sm:$0xff]  }
 0x1f1   :  { %4726 = vmatprep.subr.bf16.mxu0 %v6229_v52  ;;  %v5564_v52 = vcombine.low %v267_v41, %v271_v43  ;;  %v343_v41 = vld [vmem:[#allocation2 + $0x7b8] sm:$0xff]  ;;  %v6272_v43 = vld [vmem:[#allocation5 + $0x1c0] ss:$8 sps:$4 sm:$0xff]  }
 0x1f2   :  { %3728 = vmatpush1.bf16.msra.mxu1 %v5500_v56  ;;  %v287_v56 = vld [vmem:[#allocation2 + $0x5f8] sm:$0xff] }
 0x1f3   :  { %3729 = vmatprep.subr.bf16.mxu1 %v5509_v59  ;;  %v6256_v59 = vld [vmem:[#allocation5 + $0x164] ss:$8 sps:$4 sm:$0xff]   ;;  %v5581_v62 = vcombine.high %v283_v55, %v287_v56 }
 0x1f4   :  { %4727 = vmatpush1.bf16.msra.mxu0 %v6227_v57  ;;  %v6251_v57 = vld [vmem:[#allocation5 + $0x150] ss:$8 sps:$4 sm:$0xff]  }
 0x1f5   :  { %4728 = vmatprep.subr.bf16.mxu0 %v6232_v60  ;;  %v5572_v60 = vcombine.low %v275_v51, %v279_v12  ;;  %v351_v51 = vld [vmem:[#allocation2 + $0x7f8] sm:$0xff] }
 0x1f6   :  { %3730 = vmatpush1.bf16.msra.mxu1 %v5508_v3  ;;  %v6254_v3 = vld [vmem:[#allocation5 + $0x160] ss:$8 sps:$4 sm:$0xff]   ;;  %v6275_v12 = vld [vmem:[#allocation5 + $0x1d0] ss:$8 sps:$4 sm:$0xff]  }
 0x1f7   :  { %3731 = vmatprep.subr.bf16.mxu1 %v5517_v5  ;;  %v5580_v5 = vcombine.low %v283_v55, %v287_v56  ;;  %v359_v55 = vld [vmem:[#allocation2 + $0x838] sm:$0xff]  ;;  %v6278_v56 = vld [vmem:[#allocation5 + $0x1e0] ss:$8 sps:$4 sm:$0xff]  }
 0x1f8   :  { %4729 = vmatpush1.bf16.msra.mxu0 %v6230_v4  ;;  %v6259_v4 = vld [vmem:[#allocation5 + $0x174] ss:$8 sps:$4 sm:$0xff]  }
 0x1f9   :  { %4730 = vmatprep.subr.bf16.mxu0 %v6235_v6  ;;  %v5589_v6 = vcombine.high %v291_v0, %v295_v1 }
 0x1fa   :  { %3732 = vmatpush1.bf16.msra.mxu1 %v5516_v13  ;;  %v6262_v13 = vld [vmem:[#allocation5 + $0x184] ss:$8 sps:$4 sm:$0xff]  }
 0x1fb   :  { %3742 = vmatprep.subr.bf16.mxu1 %v5525_v17  ;;  %v5597_v17 = vcombine.high %v299_v7, %v303_v10 }
 0x1fc   :  { %4731 = vmatpush1.bf16.msra.mxu0 %v6233_v16  ;;  %v5588_v16 = vcombine.low %v291_v0, %v295_v1  ;;  %v367_v0 = vld [vmem:[#allocation2 + $0x878] sm:$0xff] }
 0x1fd   :  { %4741 = vmatprep.subr.bf16.mxu0 %v6238_v20  ;;  %3734 = vmatmul.mubr.bf16.vlgmr.msra.gmra.mrb[8].mxu1 %v6658_v21  ;;  %v263_v21 = vld [vmem:[#allocation2 + $0x538] sm:$0xff]  ;;  %v6260_v20 = vld [vmem:[#allocation5 + $0x180] ss:$8 sps:$4 sm:$0xff]  }
 0x1fe   :  { %3743 = vmatpush1.bf16.msra.mxu1 %v5524_v23  ;;  %3774 = vmatprep.mubr.bf16.mxu1 %v6666_v33  ;;  %v5557_v33 = vcombine.high %v259_v37, %v263_v21  ;;  %v5556_v48 = vcombine.low %v259_v37, %v263_v21  ;;  %v5596_v23 = vcombine.low %v299_v7, %v303_v10  ;;  %v335_v37 = vld [vmem:[#allocation2 + $0x778] sm:$0xff] }
 0x1ff   :  { %4733 = vmatmul.mubr.bf16.vlgmr.msra.gmra.mrb[8].mxu0 %v3913_v25  ;;  %3744 = vmatprep.subr.bf16.mxu1 %v5533_v24  ;;  %v5605_v24 = vcombine.high %v307_v18, %v311_v19  ;;  %v315_v25 = vld [vmem:[#allocation2 + $0x6d8] sm:$0xff] }
 0x200   :  { %4742 = vmatpush1.bf16.msra.mxu0 %v6236_v29  ;;  %v6268_v29 = vld [vmem:[#allocation5 + $0x1a4] ss:$8 sps:$4 sm:$0xff]   ;;  %v6269_v21 = vld [vmem:[#allocation5 + $0x1b0] ss:$8 sps:$4 sm:$0xff]  }
 0x201   :  { %4743 = vmatprep.subr.bf16.mxu0 %v6241_v30  ;;  %v5604_v30 = vcombine.low %v307_v18, %v311_v19  ;;  %v6281_v1 = vld [vmem:[#allocation5 + $0x1f0] ss:$8 sps:$4 sm:$0xff]  }
 0x202   :  { %3745 = vmatpush1.bf16.msra.mxu1 %v5532_v53  ;;  %v5613_v53 = vcombine.high %v315_v25, %v319_v27  ;;  %v375_v7 = vld [vmem:[#allocation2 + $0x8b8] sm:$0xff] }
 0x203   :  { %3746 = vmatprep.subr.bf16.mxu1 %v5541_v31  ;;  %v323_v31 = vld [vmem:[#allocation2 + $0x718] sm:$0xff] }
 0x204   :  { %4744 = vmatpush1.bf16.msra.mxu0 %v6239_v58  ;;  %v6271_v58 = vld [vmem:[#allocation5 + $0x1b4] ss:$8 sps:$4 sm:$0xff]  }
 0x205   :  { %4745 = vmatprep.subr.bf16.mxu0 %v6244_v35  ;;  %v5612_v35 = vcombine.low %v315_v25, %v319_v27  ;;  %v387_v19 = vld [vmem:[#allocation2 + $0x918] sm:$0xff] }
 0x206   :  { %3747 = vmatpush1.bf16.msra.mxu1 %v5540_v50  ;;  %v5621_v50 = vcombine.high %v323_v31, %v327_v45  ;;  %v403_v27 = vld [vmem:[#allocation2 + $0x998] sm:$0xff] }
 0x207   :  { %3748 = vmatprep.subr.bf16.mxu1 %v5549_v36  ;;  %v331_v36 = vld [vmem:[#allocation2 + $0x758] sm:$0xff] }
 0x208   :  { %4746 = vmatpush1.bf16.msra.mxu0 %v6242_v38  ;;  %v6274_v38 = vld [vmem:[#allocation5 + $0x1c4] ss:$8 sps:$4 sm:$0xff]  }
 0x209   :  { %4747 = vmatprep.subr.bf16.mxu0 %v6247_v39  ;;  %v5620_v39 = vcombine.low %v323_v31, %v327_v45  ;;  %v415_v31 = vld [vmem:[#allocation2 + $0x9f8] sm:$0xff] }
 0x20a   :  { %3749 = vmatpush1.bf16.msra.mxu1 %v5548_v40  ;;  %v5629_v40 = vcombine.high %v331_v36, %v335_v37 }
 0x20b   :  { %3750 = vmatprep.subr.bf16.mxu1 %v5557_v33  ;;  %v339_v33 = vld [vmem:[#allocation2 + $0x798] sm:$0xff] }
 0x20c   :  { %4748 = vmatpush1.bf16.msra.mxu0 %v6245_v46  ;;  %v6277_v46 = vld [vmem:[#allocation5 + $0x1d4] ss:$8 sps:$4 sm:$0xff]  }
 0x20d   :  { %4749 = vmatprep.subr.bf16.mxu0 %v6250_v47  ;;  %v5628_v47 = vcombine.low %v331_v36, %v335_v37  ;;  %v427_v37 = vld [vmem:[#allocation2 + $0xa58] sm:$0xff] }
 0x20e   :  { %3751 = vmatpush1.bf16.msra.mxu1 %v5556_v48  ;;  %v5637_v48 = vcombine.high %v339_v33, %v343_v41 }
 0x20f   :  { %3752 = vmatprep.subr.bf16.mxu1 %v5565_v49  ;;  %v347_v49 = vld [vmem:[#allocation2 + $0x7d8] sm:$0xff] }
 0x210   :  { %4750 = vmatpush1.bf16.msra.mxu0 %v6248_v63  ;;  %v6280_v63 = vld [vmem:[#allocation5 + $0x1e4] ss:$8 sps:$4 sm:$0xff]  }
 0x211   :  { %4751 = vmatprep.subr.bf16.mxu0 %v6253_v14  ;;  %v5636_v14 = vcombine.low %v339_v33, %v343_v41  ;;  %v439_v33 = vld [vmem:[#allocation2 + $0xab8] sm:$0xff] }
 0x212   :  { %3753 = vmatpush1.bf16.msra.mxu1 %v5564_v52  ;;  %v5645_v52 = vcombine.high %v347_v49, %v351_v51 }
 0x213   :  { %3754 = vmatprep.subr.bf16.mxu1 %v5573_v54  ;;  %v355_v54 = vld [vmem:[#allocation2 + $0x818] sm:$0xff] }
 0x214   :  { %4752 = vmatpush1.bf16.msra.mxu0 %v6251_v57  ;;  %v6283_v57 = vld [vmem:[#allocation5 + $0x1f4] ss:$8 sps:$4 sm:$0xff]  }
 0x215   :  { %4753 = vmatprep.subr.bf16.mxu0 %v6256_v59  ;;  %v5644_v59 = vcombine.low %v347_v49, %v351_v51  ;;  %v451_v51 = vld [vmem:[#allocation2 + $0xb18] sm:$0xff] }
 0x216   :  { %3755 = vmatpush1.bf16.msra.mxu1 %v5572_v60  ;;  %v5653_v60 = vcombine.high %v355_v54, %v359_v55 }
 0x217   :  { %3756 = vmatprep.subr.bf16.mxu1 %v5581_v62  ;;  %v363_v62 = vld [vmem:[#allocation2 + $0x858] sm:$0xff] }
 0x218   :  { %4754 = vmatpush1.bf16.msra.mxu0 %v6254_v3  ;;  %v6286_v3 = vld [vmem:[#allocation5 + $0x204] ss:$8 sps:$4 sm:$0xff]   ;;  %v5660_v10 = vcombine.low %v363_v62, %v367_v0 }
 0x219   :  { %4755 = vmatprep.subr.bf16.mxu0 %v6259_v4  ;;  %v5652_v4 = vcombine.low %v355_v54, %v359_v55  ;;  %v463_v54 = vld [vmem:[#allocation2 + $0xb78] sm:$0xff] }
 0x21a   :  { %3757 = vmatpush1.bf16.msra.mxu1 %v5580_v5  ;;  %v5661_v5 = vcombine.high %v363_v62, %v367_v0  ;;  %v475_v0 = vld [vmem:[#allocation2 + $0xbd8] sm:$0xff] }
 0x21b   :  { %3758 = vmatprep.subr.bf16.mxu1 %v5589_v6  ;;  %v371_v6 = vld [vmem:[#allocation2 + $0x898] sm:$0xff] }
 0x21c   :  { %4756 = vmatpush1.bf16.msra.mxu0 %v6257_v11  ;;  %v5669_v11 = vcombine.high %v371_v6, %v375_v7 }
 0x21d   :  { %4757 = vmatprep.subr.bf16.mxu0 %v6262_v13  ;;  %v379_v13 = vld [vmem:[#allocation2 + $0x8d8] sm:$0xff] }
 0x21e   :  { %3759 = vmatpush1.bf16.msra.mxu1 %v5588_v16  ;;  %v383_v16 = vld [vmem:[#allocation2 + $0x8f8] sm:$0xff] }
 0x21f   :  { %3760 = vmatprep.subr.bf16.mxu1 %v5597_v17  ;;  %v5668_v17 = vcombine.low %v371_v6, %v375_v7  ;;  %v5677_v18 = vcombine.high %v379_v13, %v383_v16  ;;  %v487_v6 = vld [vmem:[#allocation2 + $0xc38] sm:$0xff] }
 0x220   :  { %4758 = vmatpush1.bf16.msra.mxu0 %v6260_v20  ;;  %v391_v20 = vld [vmem:[#allocation2 + $0x938] sm:$0xff] }
 0x221   :  { %4759 = vmatprep.subr.bf16.mxu0 %v6265_v22  ;;  %v5676_v22 = vcombine.low %v379_v13, %v383_v16  ;;  %v5684_v25 = vcombine.low %v387_v19, %v391_v20  ;;  %v495_v13 = vld [vmem:[#allocation2 + $0xc78] sm:$0xff] }
 0x222   :  { %3761 = vmatpush1.bf16.msra.mxu1 %v5596_v23  ;;  %v5685_v23 = vcombine.high %v387_v19, %v391_v20  ;;  %v503_v19 = vld [vmem:[#allocation2 + $0xcb8] sm:$0xff] }
 0x223   :  { %3762 = vmatprep.subr.bf16.mxu1 %v5605_v24  ;;  %v399_v24 = vld [vmem:[#allocation2 + $0x978] sm:$0xff] }
 0x224   :  { %4760 = vmatpush1.bf16.msra.mxu0 %v6263_v28  ;;  %v407_v28 = vld [vmem:[#allocation2 + $0x9b8] sm:$0xff] }
 0x225   :  { %4761 = vmatprep.subr.bf16.mxu0 %v6268_v29  ;;  %v5700_v45 = vcombine.low %v403_v27, %v407_v28 }
 0x226   :  { %3763 = vmatpush1.bf16.msra.mxu1 %v5604_v30  ;;  %v5701_v30 = vcombine.high %v403_v27, %v407_v28  ;;  %v519_v27 = vld [vmem:[#allocation2 + $0xd38] sm:$0xff] }
 0x227   :  { %3764 = vmatprep.subr.bf16.mxu1 %v5613_v53  ;;  %v411_v53 = vld [vmem:[#allocation2 + $0x9d8] sm:$0xff] }
 0x228   :  { %4762 = vmatpush1.bf16.msra.mxu0 %v6266_v32  ;;  %v5709_v32 = vcombine.high %v411_v53, %v415_v31 }
 0x229   :  { %4763 = vmatprep.subr.bf16.mxu0 %v6271_v58  ;;  %v419_v58 = vld [vmem:[#allocation2 + $0xa18] sm:$0xff] }
 0x22a   :  { %3765 = vmatpush1.bf16.msra.mxu1 %v5612_v35  ;;  %v423_v35 = vld [vmem:[#allocation2 + $0xa38] sm:$0xff] }
 0x22b   :  { %3766 = vmatprep.subr.bf16.mxu1 %v5621_v50  ;;  %v5708_v50 = vcombine.low %v411_v53, %v415_v31  ;;  %v5717_v36 = vcombine.high %v419_v58, %v423_v35  ;;  %v619_v53 = vsub.s32 2, %v6698_v61  ;;  %v623_v31 = vsub.s32 3, %v6698_v61 }
 0x22c   :  { %4764 = vmatpush1.bf16.msra.mxu0 %v6269_v21  ;;  %v431_v21 = vld [vmem:[#allocation2 + $0xa78] sm:$0xff] }
 0x22d   :  { %4765 = vmatprep.subr.bf16.mxu0 %v6274_v38  ;;  %v5716_v38 = vcombine.low %v419_v58, %v423_v35  ;;  %v5724_v41 = vcombine.low %v427_v37, %v431_v21  ;;  %v531_v58 = vld [vmem:[#allocation2 + $0xd98] sm:$0xff] }
 0x22e   :  { %3767 = vmatpush1.bf16.msra.mxu1 %v5620_v39  ;;  %v5725_v39 = vcombine.high %v427_v37, %v431_v21  ;;  %v535_v35 = vld [vmem:[#allocation2 + $0xdb8] sm:$0xff] }
 0x22f   :  { %3768 = vmatprep.subr.bf16.mxu1 %v5629_v40  ;;  %v435_v40 = vld [vmem:[#allocation2 + $0xa98] sm:$0xff] }
 0x230   :  { %4766 = vmatpush1.bf16.msra.mxu0 %v6272_v43  ;;  %v5733_v43 = vcombine.high %v435_v40, %v439_v33 }
 0x231   :  { %4767 = vmatprep.subr.bf16.mxu0 %v6277_v46  ;;  %v443_v46 = vld [vmem:[#allocation2 + $0xad8] sm:$0xff] }
 0x232   :  { %3769 = vmatpush1.bf16.msra.mxu1 %v5628_v47  ;;  %v447_v47 = vld [vmem:[#allocation2 + $0xaf8] sm:$0xff] }
 0x233   :  { %3770 = vmatprep.subr.bf16.mxu1 %v5637_v48  ;;  %v5732_v48 = vcombine.low %v435_v40, %v439_v33  ;;  %v5741_v49 = vcombine.high %v443_v46, %v447_v47  ;;  %v539_v40 = vld [vmem:[#allocation2 + $0xdd8] sm:$0xff] }
 0x234   :  { %4768 = vmatpush1.bf16.msra.mxu0 %v6275_v12  ;;  %v455_v12 = vld [vmem:[#allocation2 + $0xb38] sm:$0xff] }
 0x235   :  { %4769 = vmatprep.subr.bf16.mxu0 %v6280_v63  ;;  %v5740_v63 = vcombine.low %v443_v46, %v447_v47  ;;  %v5748_v55 = vcombine.low %v451_v51, %v455_v12  ;;  %v543_v33 = vld [vmem:[#allocation2 + $0xdf8] sm:$0xff] }
 0x236   :  { %3771 = vmatpush1.bf16.msra.mxu1 %v5636_v14  ;;  %v5749_v14 = vcombine.high %v451_v51, %v455_v12  ;;  %v5828_v51 = vcombine.low %v531_v58, %v535_v35 }
 0x237   :  { %3772 = vmatprep.subr.bf16.mxu1 %v5645_v52  ;;  %v459_v52 = vld [vmem:[#allocation2 + $0xb58] sm:$0xff] }
 0x238   :  { %4770 = vmatpush1.bf16.msra.mxu0 %v6278_v56  ;;  %v5757_v56 = vcombine.high %v459_v52, %v463_v54 }
 0x239   :  { %4771 = vmatprep.subr.bf16.mxu0 %v6283_v57  ;;  %v467_v57 = vld [vmem:[#allocation2 + $0xb98] sm:$0xff] }
 0x23a   :  { %3773 = vmatpush1.bf16.msra.mxu1 %v5644_v59  ;;  %v471_v59 = vld [vmem:[#allocation2 + $0xbb8] sm:$0xff] }
 0x23b   :  { %3783 = vmatprep.subr.bf16.mxu1 %v5653_v60  ;;  %v5756_v60 = vcombine.low %v459_v52, %v463_v54  ;;  %v5765_v62 = vcombine.high %v467_v57, %v471_v59  ;;  %v5837_v54 = vcombine.high %v539_v40, %v543_v33 }
 0x23c   :  { %4772 = vmatpush1.bf16.msra.mxu0 %v6281_v1  ;;  %v479_v1 = vld [vmem:[#allocation2 + $0xbf8] sm:$0xff] }
 0x23d   :  { %3775 = vmatmul.mubr.bf16.vlgmr.msra.gmra.mrb[8].mxu1 %v6676_v42  ;;  %4782 = vmatprep.subr.bf16.mxu0 %v6286_v3  ;;  %v395_v42 = vld [vmem:[#allocation2 + $0x958] sm:$0xff]  ;;  %v5764_v3 = vcombine.low %v467_v57, %v471_v59  ;;  %v5772_v7 = vcombine.low %v475_v0, %v479_v1 }
 0x23e   :  { %3784 = vmatpush1.bf16.msra.mxu1 %v5652_v4  ;;  %3815 = vmatprep.mubr.bf16.mxu1 %v6640_v2  ;;  %v5693_v2 = vcombine.high %v395_v42, %v399_v24  ;;  %v5692_v29 = vcombine.low %v395_v42, %v399_v24  ;;  %v5773_v4 = vcombine.high %v475_v0, %v479_v1  ;;  %v511_v42 = vld [vmem:[#allocation2 + $0xcf8] sm:$0xff] }
 0x23f   :  { %3785 = vmatprep.subr.bf16.mxu1 %v5661_v5  ;;  %v483_v5 = vld [vmem:[#allocation2 + $0xc18] sm:$0xff]  ;;  %v5836_v1 = vcombine.low %v539_v40, %v543_v33  ;;  %v6292_v40 = vld [vmem:[#allocation5 + $0x224] ss:$8 sps:$4 sm:$0xff]  }
 0x240   :  { %v5780_v16 = vcombine.low %v483_v5, %v487_v6  ;;  %v547_v57 = vld [vmem:[#allocation2 + $0xe18] sm:$0xff] }
 0x241   :  { %v551_v59 = vld [vmem:[#allocation2 + $0xe38] sm:$0xff] }
 0x242   :  { %3786 = vmatpush1.bf16.msra.mxu1 %v5660_v10  ;;  %v5781_v10 = vcombine.high %v483_v5, %v487_v6  ;;  %v555_v5 = vld [vmem:[#allocation2 + $0xe58] sm:$0xff] }
 0x243   :  { %3787 = vmatprep.subr.bf16.mxu1 %v5669_v11  ;;  %v491_v11 = vld [vmem:[#allocation2 + $0xc58] sm:$0xff] }
 0x244   :  { %v5788_v20 = vcombine.low %v491_v11, %v495_v13  ;;  %v559_v6 = vld [vmem:[#allocation2 + $0xe78] sm:$0xff] }
 0x245   :  { %v595_v33 = vld [vmem:[#allocation2 + $0xf98] sm:$0xff] }
 0x246   :  { %3788 = vmatpush1.bf16.msra.mxu1 %v5668_v17  ;;  %v5789_v17 = vcombine.high %v491_v11, %v495_v13  ;;  %v563_v11 = vld [vmem:[#allocation2 + $0xe98] sm:$0xff] }
 0x247   :  { %3789 = vmatprep.subr.bf16.mxu1 %v5677_v18  ;;  %v499_v18 = vld [vmem:[#allocation2 + $0xc98] sm:$0xff] }
 0x248   :  { %v5796_v24 = vcombine.low %v499_v18, %v503_v19  ;;  %v567_v13 = vld [vmem:[#allocation2 + $0xeb8] sm:$0xff] }
 0x24a   :  { %3790 = vmatpush1.bf16.msra.mxu1 %v5676_v22  ;;  %v5797_v22 = vcombine.high %v499_v18, %v503_v19  ;;  %v571_v18 = vld [vmem:[#allocation2 + $0xed8] sm:$0xff] }
 0x24b   :  { %3791 = vmatprep.subr.bf16.mxu1 %v5685_v23  ;;  %v507_v23 = vld [vmem:[#allocation2 + $0xcd8] sm:$0xff] }
 0x24c   :  { %v5804_v28 = vcombine.low %v507_v23, %v511_v42  ;;  %v575_v19 = vld [vmem:[#allocation2 + $0xef8] sm:$0xff] }
 0x24e   :  { %3792 = vmatpush1.bf16.msra.mxu1 %v5684_v25  ;;  %v5805_v25 = vcombine.high %v507_v23, %v511_v42  ;;  %v5860_v23 = vcombine.low %v563_v11, %v567_v13 }
 0x24f   :  { %3793 = vmatprep.subr.bf16.mxu1 %v5693_v2  ;;  %v515_v2 = vld [vmem:[#allocation2 + $0xd18] sm:$0xff] }
 0x252   :  { %3794 = vmatpush1.bf16.msra.mxu1 %v5692_v29  ;;  %v5813_v29 = vcombine.high %v515_v2, %v519_v27 }
 0x253   :  { %3795 = vmatprep.subr.bf16.mxu1 %v5701_v30  ;;  %v523_v30 = vld [vmem:[#allocation2 + $0xd58] sm:$0xff] }
 0x256   :  { %3796 = vmatpush1.bf16.msra.mxu1 %v5700_v45  ;;  %v631_v45 = vsub.s32 5, %v6698_v61 }
 0x257   :  { %3797 = vmatprep.subr.bf16.mxu1 %v5709_v32 }
 0x258   :  { %v632_v21 = vrot.slane %v6700_v8, %v631_v45 }
 0x25a   :  { %3798 = vmatpush1.bf16.msra.mxu1 %v5708_v50  ;;  %v620_v50 = vrot.slane %v6700_v8, %v619_v53  ;;  %v5868_v53 = vcombine.low %v571_v18, %v575_v19 }
 0x25b   :  { %3799 = vmatprep.subr.bf16.mxu1 %v5717_v36  ;;  %v624_v36 = vrot.slane %v6700_v8, %v623_v31  ;;  %v6284_v31 = vld [vmem:[#allocation5 + $0x200] ss:$8 sps:$4 sm:$0xff]  }
 0x25e   :  { %3800 = vmatpush1.bf16.msra.mxu1 %v5716_v38  ;;  %v5829_v38 = vcombine.high %v531_v58, %v535_v35  ;;  %v6289_v58 = vld [vmem:[#allocation5 + $0x214] ss:$8 sps:$4 sm:$0xff]  }
 0x25f   :  { %3801 = vmatprep.subr.bf16.mxu1 %v5725_v39 }
 0x262   :  { %3802 = vmatpush1.bf16.msra.mxu1 %v5724_v41 }
 0x263   :  { %3803 = vmatprep.subr.bf16.mxu1 %v5733_v43 }
 0x266   :  { %3804 = vmatpush1.bf16.msra.mxu1 %v5732_v48 }
 0x267   :  { %3805 = vmatprep.subr.bf16.mxu1 %v5741_v49 }
 0x26a   :  { %3806 = vmatpush1.bf16.msra.mxu1 %v5740_v63 }
 0x26b   :  { %3807 = vmatprep.subr.bf16.mxu1 %v5749_v14 }
 0x26e   :  { %3808 = vmatpush1.bf16.msra.mxu1 %v5748_v55 }
 0x26f   :  { %3809 = vmatprep.subr.bf16.mxu1 %v5757_v56 }
 0x272   :  { %3810 = vmatpush1.bf16.msra.mxu1 %v5756_v60 }
 0x273   :  { %3811 = vmatprep.subr.bf16.mxu1 %v5765_v62 }
 0x276   :  { %3812 = vmatpush1.bf16.msra.mxu1 %v5764_v3 }
 0x277   :  { %3813 = vmatprep.subr.bf16.mxu1 %v5773_v4  ;;  %v5845_v4 = vcombine.high %v547_v57, %v551_v59 }
 0x27a   :  { %3814 = vmatpush1.bf16.msra.mxu1 %v5772_v7  ;;  %v5844_v7 = vcombine.low %v547_v57, %v551_v59  ;;  %v6301_v57 = vld [vmem:[#allocation5 + $0x254] ss:$8 sps:$4 sm:$0xff]   ;;  %v6299_v59 = vld [vmem:[#allocation5 + $0x250] ss:$8 sps:$4 sm:$0xff]  }
 0x27b   :  { %3824 = vmatprep.subr.bf16.mxu1 %v5781_v10  ;;  %v5853_v10 = vcombine.high %v555_v5, %v559_v6 }
 0x27d   :  { %3816 = vmatmul.mubr.bf16.vlgmr.msra.gmra.mrb[8].mxu1 %v6664_v26  ;;  %v527_v26 = vld [vmem:[#allocation2 + $0xd78] sm:$0xff] }
 0x27e   :  { %3825 = vmatpush1.bf16.msra.mxu1 %v5780_v16  ;;  %3856 = vmatprep.mubr.bf16.mxu1 %v6669_v34  ;;  %v5812_v34 = vcombine.low %v515_v2, %v519_v27  ;;  %v5821_v32 = vcombine.high %v523_v30, %v527_v26  ;;  %v5820_v37 = vcombine.low %v523_v30, %v527_v26  ;;  %v583_v30 = vld [vmem:[#allocation2 + $0xf38] sm:$0xff] }
 0x27f   :  { %3826 = vmatprep.subr.bf16.mxu1 %v5789_v17  ;;  %v5852_v16 = vcombine.low %v555_v5, %v559_v6  ;;  %v5861_v17 = vcombine.high %v563_v11, %v567_v13  ;;  %v6310_v5 = vld [vmem:[#allocation5 + $0x284] ss:$8 sps:$4 sm:$0xff]   ;;  %v6308_v6 = vld [vmem:[#allocation5 + $0x280] ss:$8 sps:$4 sm:$0xff]  }
 0x280   :  { %v6316_v13 = vld [vmem:[#allocation5 + $0x2a4] ss:$8 sps:$4 sm:$0xff]  }
 0x282   :  { %3827 = vmatpush1.bf16.msra.mxu1 %v5788_v20 }
 0x283   :  { %3828 = vmatprep.subr.bf16.mxu1 %v5797_v22 }
 0x286   :  { %3829 = vmatpush1.bf16.msra.mxu1 %v5796_v24  ;;  %v5869_v24 = vcombine.high %v571_v18, %v575_v19  ;;  %v6319_v18 = vld [vmem:[#allocation5 + $0x2b4] ss:$8 sps:$4 sm:$0xff]   ;;  %v6317_v19 = vld [vmem:[#allocation5 + $0x2b0] ss:$8 sps:$4 sm:$0xff]  }
 0x287   :  { %3830 = vmatprep.subr.bf16.mxu1 %v5805_v25 }
 0x28a   :  { %3831 = vmatpush1.bf16.msra.mxu1 %v5804_v28 }
 0x28b   :  { %3832 = vmatprep.subr.bf16.mxu1 %v5813_v29  ;;  %v579_v29 = vld [vmem:[#allocation2 + $0xf18] sm:$0xff] }
 0x28c   :  { %v5877_v35 = vcombine.high %v579_v29, %v583_v30 }
 0x28e   :  { %3833 = vmatpush1.bf16.msra.mxu1 %v5812_v34 }
 0x28f   :  { %3834 = vmatprep.subr.bf16.mxu1 %v5821_v32 }
 0x290   :  { %v3530_v39 = vpop.f32.mrb[4].mxu1 }
 0x291   :  { %v6109_v41 = vadd.f32 %v3530_v39, %v620_v50  ;;  %v3532_v46 = vpop.f32.mrb[5].mxu1  ;;  %v587_v50 = vld [vmem:[#allocation2 + $0xf58] sm:$0xff] }
 0x292   :  { %v6735_v43 = vpop.f32.mrb[4].mxu0  ;;  %v6110_v47 = vadd.f32 %v3532_v46, %v624_v36  ;;  %v3534_v49 = vpop.f32.mrb[6].mxu1  ;;  %3835 = vmatpush1.bf16.msra.mxu1 %v5820_v37  ;;  %v591_v36 = vld [vmem:[#allocation2 + $0xf78] sm:$0xff] }
 0x293   :  { %v3696_v48 = vpop.f32.mrb[5].mxu0  ;;  %v3875_v12 = vmin.f32 %v6109_v41, 0.0  ;;  %v3535_v52 = vpop.f32.mrb[7].mxu1  ;;  %3836 = vmatprep.subr.bf16.mxu1 %v5829_v38  ;;  %vm3867_vm2 = vcmp.gt.f32.partialorder %v6109_v41, 0.0  ;;  %v6287_v38 = vld [vmem:[#allocation5 + $0x210] ss:$8 sps:$4 sm:$0xff]   ;;  %v5885_v39 = vcombine.high %v587_v50, %v591_v36  ;;  %v5884_v46 = vcombine.low %v587_v50, %v591_v36 }
 0x294   :  { %v6112_v63 = vadd.f32 %v3696_v48, %v632_v21  ;;  %v3698_v14 = vpop.f32.mrb[6].mxu0  ;;  %v3876_v55 = vmin.f32 %v6110_v47, 0.0  ;;  %vm3868_vm3 = vcmp.gt.f32.partialorder %v6110_v47, 0.0  ;;  %v5876_v21 = vcombine.low %v579_v29, %v583_v30  ;;  %v6295_v49 = vld [vmem:[#allocation5 + $0x234] ss:$8 sps:$4 sm:$0xff]  }
 0x295   :  { %v3699_v56 = vpop.f32.mrb[7].mxu0  ;;  %v3885_v60 = vmul.f32 1.442695, %v3875_v12  ;;  %v607_v12 = vld [vmem:[#allocation2 + $0xff8] sm:$0xff]  ;;  %v6334_v29 = vld [vmem:[#allocation5 + $0x304] ss:$8 sps:$4 sm:$0xff]  }
 0x296   :  { %v3878_v62 = vmin.f32 %v6112_v63, 0.0  ;;  %v3887_v0 = vmul.f32 1.442695, %v3876_v55  ;;  %3837 = vmatpush1.bf16.msra.mxu1 %v5828_v51  ;;  %vm3870_vm4 = vcmp.gt.f32.partialorder %v6112_v63, 0.0  ;;  %v603_v51 = vld [vmem:[#allocation2 + $0xfd8] sm:$0xff] }
 0x297   :  { %6400 = vpow2.f32 %v3885_v60  ;;  %3838 = vmatprep.subr.bf16.mxu1 %v5837_v54  ;;  %v6293_v14 = vld [vmem:[#allocation5 + $0x230] ss:$8 sps:$4 sm:$0xff]   ;;  %v5901_v52 = vcombine.high %v603_v51, %v607_v12  ;;  %v6298_v54 = vld [vmem:[#allocation5 + $0x244] ss:$8 sps:$4 sm:$0xff]   ;;  %v5900_v55 = vcombine.low %v603_v51, %v607_v12  ;;  %v6296_v56 = vld [vmem:[#allocation5 + $0x240] ss:$8 sps:$4 sm:$0xff]  }
 0x298   :  { %v3891_v3 = vmul.f32 1.442695, %v3878_v62  ;;  %6402 = vpow2.f32 %v3887_v0  ;;  %v6304_v60 = vld [vmem:[#allocation5 + $0x264] ss:$8 sps:$4 sm:$0xff]   ;;  %v6302_v62 = vld [vmem:[#allocation5 + $0x260] ss:$8 sps:$4 sm:$0xff]  }
 0x299   :  { %v627_v0 = vsub.s32 4, %v6698_v61  ;;  %v6346_v50 = vld [vmem:[#allocation5 + $0x344] ss:$8 sps:$4 sm:$0xff]   ;;  %v6344_v36 = vld [vmem:[#allocation5 + $0x340] ss:$8 sps:$4 sm:$0xff]  }
 0x29a   :  { %6404 = vpow2.f32 %v3891_v3  ;;  %3839 = vmatpush1.bf16.msra.mxu1 %v5836_v1  ;;  %v6307_v1 = vld [vmem:[#allocation5 + $0x274] ss:$8 sps:$4 sm:$0xff]   ;;  %v6305_v3 = vld [vmem:[#allocation5 + $0x270] ss:$8 sps:$4 sm:$0xff]   ;;  %v6362_v51 = vld [vmem:[#allocation5 + $0x3a0] ss:$8 sps:$4 sm:$0xff]  }
 0x29b   :  { %3840 = vmatprep.subr.bf16.mxu1 %v5845_v4  ;;  %v628_v4 = vrot.slane %v6700_v8, %v627_v0  ;;  %v6367_v12 = vld [vmem:[#allocation5 + $0x3b4] ss:$8 sps:$4 sm:$0xff]   ;;  %v635_v0 = vsub.s32 6, %v6698_v61 }
 0x29e   :  { %3841 = vmatpush1.bf16.msra.mxu1 %v5844_v7  ;;  %v6111_v7 = vadd.f32 %v6735_v43, %v628_v4  ;;  %v6325_v43 = vld [vmem:[#allocation5 + $0x2d4] ss:$8 sps:$4 sm:$0xff]  }
 0x29f   :  { %3842 = vmatprep.subr.bf16.mxu1 %v5853_v10  ;;  %v6313_v10 = vld [vmem:[#allocation5 + $0x294] ss:$8 sps:$4 sm:$0xff]  }
 0x2a0   :  { %v3877_v11 = vmin.f32 %v6111_v7, 0.0  ;;  %vm3869_vm5 = vcmp.gt.f32.partialorder %v6111_v7, 0.0 }
 0x2a1   :  { %v6401_v20 = vpop.eup %6400 }
 0x2a2   :  { %v5904_v22 = vadd.f32 -1.0, %v6401_v20  ;;  %3843 = vmatpush1.bf16.msra.mxu1 %v5852_v16  ;;  %v6403_v42 = vpop.eup %6402  ;;  %v6314_v16 = vld [vmem:[#allocation5 + $0x2a0] ss:$8 sps:$4 sm:$0xff]   ;;  %v6322_v20 = vld [vmem:[#allocation5 + $0x2c4] ss:$8 sps:$4 sm:$0xff]  }
 0x2a3   :  { %3844 = vmatprep.subr.bf16.mxu1 %v5861_v17  ;;  %v5905_v2 = vadd.f32 -1.0, %v6403_v42  ;;  %v3889_v17 = vmul.f32 1.442695, %v3877_v11  ;;  %v6328_v42 = vld [vmem:[#allocation5 + $0x2e4] ss:$8 sps:$4 sm:$0xff]  }
 0x2a4   :  { %v6405_v25 = vpop.eup %6404  ;;  %v3907_v27 = vsel %vm3867_vm2, %v6109_v41, %v5904_v22  ;;  %v599_v41 = vld [vmem:[#allocation2 + $0xfb8] sm:$0xff]  ;;  %v6320_v22 = vld [vmem:[#allocation5 + $0x2c0] ss:$8 sps:$4 sm:$0xff]   ;;  %vm5269_vm2 = vcmask 0  }
 0x2a5   :  { %v5907_v28 = vadd.f32 -1.0, %v6405_v25  ;;  %v3908_v26 = vsel %vm3868_vm3, %v6110_v47, %v5905_v2  ;;  %v3915_v32 = vpack.c.bf16 %v3907_v27, %v3907_v27  ;;  %v6290_v47 = vld [vmem:[#allocation5 + $0x220] ss:$8 sps:$4 sm:$0xff]   ;;  %v5893_v48 = vcombine.high %v595_v33, %v599_v41  ;;  %v6331_v2 = vld [vmem:[#allocation5 + $0x2f4] ss:$8 sps:$4 sm:$0xff]  }
 0x2a6   :  { %3845 = vmatpush1.bf16.msra.mxu1 %v5860_v23  ;;  %v3916_v34 = vpack.c.bf16 %v3908_v26, %v3908_v26  ;;  %6406 = vpow2.f32 %v3889_v17  ;;  %v6323_v23 = vld [vmem:[#allocation5 + $0x2d0] ss:$8 sps:$4 sm:$0xff]   ;;  %v6326_v25 = vld [vmem:[#allocation5 + $0x2e0] ss:$8 sps:$4 sm:$0xff]  }
 0x2a7   :  { %3846 = vmatprep.subr.bf16.mxu1 %v5869_v24  ;;  %v3910_v45 = vsel %vm3870_vm4, %v6112_v63, %v5907_v28  ;;  %v5892_v63 = vcombine.low %v595_v33, %v599_v41  ;;  %v6329_v28 = vld [vmem:[#allocation5 + $0x2f0] ss:$8 sps:$4 sm:$0xff]   ;;  %v6332_v26 = vld [vmem:[#allocation5 + $0x300] ss:$8 sps:$4 sm:$0xff]   ;;  %v6358_v41 = vld [vmem:[#allocation5 + $0x384] ss:$8 sps:$4 sm:$0xff]  }
 0x2a8   :  { %4773 = vmatprep.mubr.bf16.mxu0 %v3916_v34  ;;  %v3918_v37 = vpack.c.bf16 %v3910_v45, %v3910_v45  ;;  %v6337_v34 = vld [vmem:[#allocation5 + $0x314] ss:$8 sps:$4 sm:$0xff]   ;;  %v6340_v45 = vld [vmem:[#allocation5 + $0x324] ss:$8 sps:$4 sm:$0xff]   ;;  %v6353_v33 = vld [vmem:[#allocation5 + $0x370] ss:$8 sps:$4 sm:$0xff]  }
 0x2a9   :  { %4774 = vmatmul.mubr.bf16.vlgmr.msra.gmra.mrb[8].mxu0 %v3915_v32  ;;  %v6338_v32 = vld [vmem:[#allocation5 + $0x320] ss:$8 sps:$4 sm:$0xff]  }
 0x2aa   :  { %3847 = vmatpush1.bf16.msra.mxu1 %v5868_v53  ;;  %4783 = vmatpush1.bf16.msra.mxu0 %v6284_v31  ;;  %v6335_v31 = vld [vmem:[#allocation5 + $0x310] ss:$8 sps:$4 sm:$0xff]  }
 0x2ab   :  { %4814 = vmatprep.mubr.bf16.mxu0 %v3918_v37  ;;  %4784 = vmatprep.subr.bf16.mxu0 %v6289_v58  ;;  %v6343_v58 = vld [vmem:[#allocation5 + $0x334] ss:$8 sps:$4 sm:$0xff]  }
 0x2ac   :  { %3848 = vmatprep.subr.bf16.mxu1 %v5877_v35  ;;  %v6341_v35 = vld [vmem:[#allocation5 + $0x330] ss:$8 sps:$4 sm:$0xff]   ;;  %v6349_v37 = vld [vmem:[#allocation5 + $0x354] ss:$8 sps:$4 sm:$0xff]  }
 0x2ae   :  { %3849 = vmatpush1.bf16.msra.mxu1 %v5876_v21  ;;  %4785 = vmatpush1.bf16.msra.mxu0 %v6287_v38  ;;  %v6347_v21 = vld [vmem:[#allocation5 + $0x350] ss:$8 sps:$4 sm:$0xff]   ;;  %v6352_v38 = vld [vmem:[#allocation5 + $0x364] ss:$8 sps:$4 sm:$0xff]  }
 0x2af   :  { %3850 = vmatprep.subr.bf16.mxu1 %v5885_v39  ;;  %4786 = vmatprep.subr.bf16.mxu0 %v6292_v40  ;;  %v6350_v39 = vld [vmem:[#allocation5 + $0x360] ss:$8 sps:$4 sm:$0xff]   ;;  %v6355_v40 = vld [vmem:[#allocation5 + $0x374] ss:$8 sps:$4 sm:$0xff]  }
 0x2b0   :  { %v6407_v24 = vpop.eup %6406 }
 0x2b1   :  { %v5906_v27 = vadd.f32 -1.0, %v6407_v24  ;;  %v6381_v24 = vld [vmem:[%s6840_s3] sm:$0xff]  }
 0x2b2   :  { %3851 = vmatpush1.bf16.msra.mxu1 %v5884_v46  ;;  %4787 = vmatpush1.bf16.msra.mxu0 %v6290_v47  ;;  %v6356_v46 = vld [vmem:[#allocation5 + $0x380] ss:$8 sps:$4 sm:$0xff]   ;;  %v6361_v47 = vld [vmem:[#allocation5 + $0x394] ss:$8 sps:$4 sm:$0xff]  }
 0x2b3   :  { %3852 = vmatprep.subr.bf16.mxu1 %v5893_v48  ;;  %4788 = vmatprep.subr.bf16.mxu0 %v6295_v49  ;;  %v3909_v30 = vsel %vm3869_vm5, %v6111_v7, %v5906_v27  ;;  %v6359_v48 = vld [vmem:[#allocation5 + $0x390] ss:$8 sps:$4 sm:$0xff]   ;;  %v6364_v49 = vld [vmem:[#allocation5 + $0x3a4] ss:$8 sps:$4 sm:$0xff]  }
 0x2b4   :  { %v3917_v53 = vpack.c.bf16 %v3909_v30, %v3909_v30  ;;  %v6383_v27 = vld [vmem:[%s6840_s3 + $0x8] sm:$0xff]   ;;  %v6386_v30 = vld [vmem:[%s6840_s3 + $0x58] sm:$0xff]  }
 0x2b6   :  { %3853 = vmatpush1.bf16.msra.mxu1 %v5892_v63  ;;  %4789 = vmatpush1.bf16.msra.mxu0 %v6293_v14  ;;  %v6365_v63 = vld [vmem:[#allocation5 + $0x3b0] ss:$8 sps:$4 sm:$0xff]   ;;  %v6370_v14 = vld [vmem:[#allocation5 + $0x3c4] ss:$8 sps:$4 sm:$0xff]  }
 0x2b7   :  { %3854 = vmatprep.subr.bf16.mxu1 %v5901_v52  ;;  %4790 = vmatprep.subr.bf16.mxu0 %v6298_v54  ;;  %v6368_v52 = vld [vmem:[#allocation5 + $0x3c0] ss:$8 sps:$4 sm:$0xff]   ;;  %v6373_v54 = vld [vmem:[#allocation5 + $0x3d4] ss:$8 sps:$4 sm:$0xff]  }
 0x2ba   :  { %3855 = vmatpush1.bf16.msra.mxu1 %v5900_v55  ;;  %4791 = vmatpush1.bf16.msra.mxu0 %v6296_v56  ;;  %v6371_v55 = vld [vmem:[#allocation5 + $0x3d0] ss:$8 sps:$4 sm:$0xff]   ;;  %v6376_v56 = vld [vmem:[#allocation5 + $0x3e4] ss:$8 sps:$4 sm:$0xff]  }
 0x2bb   :  { %4792 = vmatprep.subr.bf16.mxu0 %v6301_v57  ;;  %v6374_v57 = vld [vmem:[#allocation5 + $0x3e0] ss:$8 sps:$4 sm:$0xff]  }
 0x2bd   :  { %3857 = vmatmul.mubr.bf16.vlgmr.msra.gmra.mrb[8].mxu1 %v6680_v44  ;;  %v6311_v44 = vld [vmem:[#allocation5 + $0x290] ss:$8 sps:$4 sm:$0xff]  }
 0x2be   :  { %4793 = vmatpush1.bf16.msra.mxu0 %v6299_v59  ;;  %v6377_v59 = vld [vmem:[#allocation5 + $0x3f0] ss:$8 sps:$4 sm:$0xff]  }
 0x2bf   :  { %4794 = vmatprep.subr.bf16.mxu0 %v6304_v60  ;;  %v6379_v60 = vld [vmem:[#allocation5 + $0x3f4] ss:$8 sps:$4 sm:$0xff]  }
 0x2c2   :  { %4795 = vmatpush1.bf16.msra.mxu0 %v6302_v62  ;;  %v6380_v62 = vld [vmem:[%s6840_s3 + $0x40] sm:$0xff]  }
 0x2c3   :  { %4796 = vmatprep.subr.bf16.mxu0 %v6307_v1  ;;  %v639_v1 = vsub.s32 7, %v6698_v61 }
 0x2c5   :  { %v640_v4 = vrot.slane %v6700_v8, %v639_v1 }
 0x2c6   :  { %4797 = vmatpush1.bf16.msra.mxu0 %v6305_v3  ;;  %v636_v3 = vrot.slane %v6700_v8, %v635_v0 }
 0x2c7   :  { %4798 = vmatprep.subr.bf16.mxu0 %v6310_v5 }
 0x2ca   :  { %4799 = vmatpush1.bf16.msra.mxu0 %v6308_v6 }
 0x2cb   :  { %4800 = vmatprep.subr.bf16.mxu0 %v6313_v10 }
 0x2ce   :  { %4801 = vmatpush1.bf16.msra.mxu0 %v6311_v44 }
 0x2cf   :  { %4802 = vmatprep.subr.bf16.mxu0 %v6316_v13 }
 0x2d2   :  { %4803 = vmatpush1.bf16.msra.mxu0 %v6314_v16 }
 0x2d3   :  { %4804 = vmatprep.subr.bf16.mxu0 %v6319_v18 }
 0x2d6   :  { %4805 = vmatpush1.bf16.msra.mxu0 %v6317_v19 }
 0x2d7   :  { %4806 = vmatprep.subr.bf16.mxu0 %v6322_v20 }
 0x2da   :  { %4807 = vmatpush1.bf16.msra.mxu0 %v6320_v22 }
 0x2db   :  { %4808 = vmatprep.subr.bf16.mxu0 %v6325_v43 }
 0x2de   :  { %4809 = vmatpush1.bf16.msra.mxu0 %v6323_v23 }
 0x2df   :  { %4810 = vmatprep.subr.bf16.mxu0 %v6328_v42 }
 0x2e2   :  { %4811 = vmatpush1.bf16.msra.mxu0 %v6326_v25 }
 0x2e3   :  { %4812 = vmatprep.subr.bf16.mxu0 %v6331_v2  ;;  %v6382_v2 = vld [vmem:[%s6840_s3 + $0x48] sm:$0xff]  }
 0x2e6   :  { %4813 = vmatpush1.bf16.msra.mxu0 %v6329_v28  ;;  %v6384_v28 = vld [vmem:[%s6840_s3 + $0x50] sm:$0xff]  }
 0x2e7   :  { %4823 = vmatprep.subr.bf16.mxu0 %v6334_v29  ;;  %v6385_v29 = vld [vmem:[%s6840_s3 + $0x10] sm:$0xff]  }
 0x2e9   :  { %4815 = vmatmul.mubr.bf16.vlgmr.msra.gmra.mrb[8].mxu0 %v3917_v53  ;;  %v6388_v53 = vld [vmem:[%s6840_s3 + $0x60] sm:$0xff]  }
 0x2ea   :  { %4824 = vmatpush1.bf16.msra.mxu0 %v6332_v26  ;;  %v6387_v26 = vld [vmem:[%s6840_s3 + $0x18] sm:$0xff]  }
 0x2eb   :  { %4825 = vmatprep.subr.bf16.mxu0 %v6337_v34  ;;  %v6389_v34 = vld [vmem:[%s6840_s3 + $0x20] sm:$0xff]  }
 0x2ee   :  { %4826 = vmatpush1.bf16.msra.mxu0 %v6335_v31  ;;  %v6390_v31 = vld [vmem:[%s6840_s3 + $0x68] sm:$0xff]  }
 0x2ef   :  { %4827 = vmatprep.subr.bf16.mxu0 %v6340_v45  ;;  %v6391_v45 = vld [vmem:[%s6840_s3 + $0x28] sm:$0xff]  }
 0x2f2   :  { %4828 = vmatpush1.bf16.msra.mxu0 %v6338_v32  ;;  %v6392_v32 = vld [vmem:[%s6840_s3 + $0x70] sm:$0xff]  }
 0x2f3   :  { %4829 = vmatprep.subr.bf16.mxu0 %v6343_v58  ;;  %v6393_v58 = vld [vmem:[%s6840_s3 + $0x30] sm:$0xff]  }
 0x2f6   :  { %4830 = vmatpush1.bf16.msra.mxu0 %v6341_v35  ;;  %v6394_v35 = vld [vmem:[%s6840_s3 + $0x78] sm:$0xff]  }
 0x2f7   :  { %4831 = vmatprep.subr.bf16.mxu0 %v6346_v50  ;;  %v6395_v50 = vld [vmem:[%s6840_s3 + $0x38] sm:$0xff]  }
 0x2fa   :  { %4832 = vmatpush1.bf16.msra.mxu0 %v6344_v36  ;;  %v88_v36 = vld [vmem:[%s6837_s0 + $0x20] sm:$0xf]  ;;  %s6551_s0 = smov [#allocation9]  }
 0x2fb   :  { %4833 = vmatprep.subr.bf16.mxu0 %v6349_v37  ;;  %5046 = vxpose.xlu0.b32.start.end [1/1] (short) (narrow) %v88_v36, 8  ;;  %v93_v37 = vld [vmem:[#allocation7 + $0x1] ss:$8 sm:$0x3]  ;;  %s5376_s3 = sshll.u32 %s6551_s0, 4  ;;  %s5377_s3 = int_to_ptr.vmem [resolvable:$true] %s5376_s3 }
 0x2fc   :  { %s6490_s24 = scalar_lea.vmem %s5377_s3, 16  ;;  %s6494_s25 = scalar_lea.vmem %s5377_s3, 32 }
 0x2fd   :  { %p6491_p10 = scmp.ne.s32.totalorder %s5377_s3, %s6490_s24  ;;  %p6495_p11 = scmp.lt.s32.totalorder %s5377_s3, %s5377_s3 }
 0x2fe   :  { %4834 = vmatpush1.bf16.msra.mxu0 %v6347_v21  ;;  %v4053_v21 = vrot.slane %v93_v37, %v611_v9  ;;  %p6496_p12 = scmp.lt.s32.totalorder %s6494_s25, %s6490_s24 }
 0x2ff   :  { %4835 = vmatprep.subr.bf16.mxu0 %v6352_v38  ;;  %v4057_v38 = vrot.slane %v93_v37, %v615_v15 }
 0x300   :  { %p6497_p13 = por %p6496_p12, %p6495_p11 }
 0x302   :  { %4836 = vmatpush1.bf16.msra.mxu0 %v6350_v39  ;;  %p6498_p0 = pnand %p6497_p13, %p6491_p10 }
 0x303   :  { %4837 = vmatprep.subr.bf16.mxu0 %v6355_v40 }
 0x306   :  { %4838 = vmatpush1.bf16.msra.mxu0 %v6353_v33 }
 0x307   :  { %4839 = vmatprep.subr.bf16.mxu0 %v6358_v41 }
 0x30a   :  { %4840 = vmatpush1.bf16.msra.mxu0 %v6356_v46 }
 0x30b   :  { %4841 = vmatprep.subr.bf16.mxu0 %v6361_v47 }
 0x30e   :  { %4842 = vmatpush1.bf16.msra.mxu0 %v6359_v48 }
 0x30f   :  { %4843 = vmatprep.subr.bf16.mxu0 %v6364_v49 }
 0x312   :  { %4844 = vmatpush1.bf16.msra.mxu0 %v6362_v51 }
 0x313   :  { %4845 = vmatprep.subr.bf16.mxu0 %v6367_v12 }
 0x316   :  { %4846 = vmatpush1.bf16.msra.mxu0 %v6365_v63 }
 0x317   :  { %4847 = vmatprep.subr.bf16.mxu0 %v6370_v14 }
 0x31a   :  { %4848 = vmatpush1.bf16.msra.mxu0 %v6368_v52 }
 0x31b   :  { %4849 = vmatprep.subr.bf16.mxu0 %v6373_v54 }
 0x31e   :  { %4850 = vmatpush1.bf16.msra.mxu0 %v6371_v55 }
 0x31f   :  { %4851 = vmatprep.subr.bf16.mxu0 %v6376_v56  ;;  %v6549_v56 = vmov 0.0  }
 0x320   :  { %6090 = vmatprep.subr.mxu1 %v6549_v56  ;;  %6092 = vmatprep.mubr.msk.f32.mxu1 %vm6550_vm10, %v6549_v56 }
 0x322   :  { %4852 = vmatpush1.bf16.msra.mxu0 %v6374_v57 }
 0x323   :  { %4853 = vmatprep.subr.bf16.mxu0 %v6379_v60 }
 0x326   :  { %4854 = vmatpush1.bf16.msra.mxu0 %v6377_v59 }
 0x327   :  { %6062 = vmatprep.subr.bf16.mxu0 %v6380_v62 }
 0x37b   :  { %v5062_v0 = vpop.trf.xlu0 }
 0x390   :  { %v3858_v5 = vpop.f32.mrb[8].mxu1 }
 0x391   :  { %v6113_v6 = vadd.f32 %v3858_v5, %v636_v3  ;;  %v3860_v7 = vpop.f32.mrb[9].mxu1  ;;  %v5233_v3 = vsel %vm5232_vm13, %v88_v36, 0.0 }
 0x392   :  { %v6114_v10 = vadd.f32 %v3860_v7, %v640_v4  ;;  %v3862_v44 = vpop.f32.mrb[10].mxu1  ;;  %v5234_v4 = vrot.slane %v5233_v3, 4 }
 0x393   :  { %v3879_v11 = vmin.f32 %v6113_v6, 0.0  ;;  %v3863_v13 = vpop.f32.mrb[11].mxu1  ;;  %vm3871_vm6 = vcmp.gt.f32.partialorder %v6113_v6, 0.0 }
 0x394   :  { %v3880_v16 = vmin.f32 %v6114_v10, 0.0  ;;  %vm3872_vm7 = vcmp.gt.f32.partialorder %v6114_v10, 0.0  ;;  %v5235_v5 = vadd.f32 %v5234_v4, %v5233_v3 }
 0x395   :  { %v3893_v17 = vmul.f32 1.442695, %v3879_v11 }
 0x396   :  { %v3895_v18 = vmul.f32 1.442695, %v3880_v16 }
 0x397   :  { %6408 = vpow2.f32 %v3893_v17 }
 0x398   :  { %6410 = vpow2.f32 %v3895_v18  ;;  %v94_v18 = vld [vmem:[#allocation7] sm:$0x3c] }
 0x3a1   :  { %v6409_v19 = vpop.eup %6408 }
 0x3a2   :  { %v6411_v20 = vpop.eup %6410  ;;  %v5908_v22 = vadd.f32 -1.0, %v6409_v19  ;;  %v5272_v19 = vrot.slane %v94_v18, 2 }
 0x3a3   :  { %v5909_v43 = vadd.f32 -1.0, %v6411_v20 }
 0x3a4   :  { %v3911_v23 = vsel %vm3871_vm6, %v6113_v6, %v5908_v22  ;;  %v5236_v6 = vrot.slane %v5235_v5, 2 }
 0x3a5   :  { %v3912_v8 = vsel %vm3872_vm7, %v6114_v10, %v5909_v43  ;;  %v3919_v25 = vpack.c.bf16 %v3911_v23, %v3911_v23 }
 0x3a6   :  { %v3920_v42 = vpack.c.bf16 %v3912_v8, %v3912_v8  ;;  %v5237_v7 = vadd.f32 %v5236_v6, %v5235_v5 }
 0x3a8   :  { %4855 = vmatprep.mubr.bf16.mxu0 %v3920_v42  ;;  %v5238_v10 = vrot.slane %v5237_v7, 1 }
 0x3a9   :  { %4856 = vmatmul.mubr.bf16.vlgmr.msra.gmra.mrb[8].mxu0 %v3919_v25 }
 0x3aa   :  { %6063 = vmatpush3.bf16.msra.mxu0 %v6381_v24  ;;  %v5239_v44 = vadd.f32 %v5238_v10, %v5237_v7  ;;  %v95_v24 = vld [vmem:[#allocation7 + $0x6] ss:$0 sm:$0xff] }
 0x3ab   :  { %6064 = vmatprep.subr.bf16.mxu0 %v6382_v2 }
 0x3ac   :  { %v5240_v11 = vmul.f32 %v5239_v44, %v88_v36 }
 0x3ae   :  { %6065 = vmatpush3.bf16.msra.mxu0 %v6383_v27  ;;  %v5241_v13 = vsel %vm5232_vm13, %v5240_v11, 0.0 }
 0x3af   :  { %6066 = vmatprep.subr.bf16.mxu0 %v6384_v28  ;;  %5242 = vadd.xlane.f32.xlu0 %v5241_v13 }
 0x3b2   :  { %6067 = vmatpush3.bf16.msra.mxu0 %v6385_v29 }
 0x3b3   :  { %6068 = vmatprep.subr.bf16.mxu0 %v6386_v30 }
 0x3b6   :  { %6069 = vmatpush3.bf16.msra.mxu0 %v6387_v26 }
 0x3b7   :  { %6070 = vmatprep.subr.bf16.mxu0 %v6388_v53 }
 0x3ba   :  { %6071 = vmatpush3.bf16.msra.mxu0 %v6389_v34 }
 0x3bb   :  { %6072 = vmatprep.subr.bf16.mxu0 %v6390_v31 }
 0x3be   :  { %6073 = vmatpush3.bf16.msra.mxu0 %v6391_v45 }
 0x3bf   :  { %6074 = vmatprep.subr.bf16.mxu0 %v6392_v32 }
 0x3c2   :  { %6075 = vmatpush3.bf16.msra.mxu0 %v6393_v58 }
 0x3c3   :  { %6076 = vmatprep.subr.bf16.mxu0 %v6394_v35 }
 0x3c6   :  { %6077 = vmatpush3.bf16.msra.mxu0 %v6395_v50 }
 0x43c   :  { %v5243_v20 = vpop.xlane.xlu0 %5242 }
 0x47c   :  { %v4857_v39 = vpop.f32.mrb[8].mxu0 }
 0x47d   :  { %v6115_v40 = vadd.f32 %v4857_v39, %v4053_v21  ;;  %v4859_v33 = vpop.f32.mrb[9].mxu0 }
 0x47e   :  { %v6116_v41 = vadd.f32 %v4859_v33, %v4057_v38  ;;  %v4861_v46 = vpop.f32.mrb[10].mxu0 }
 0x47f   :  { %v4866_v47 = vmin.f32 %v6115_v40, 0.0  ;;  %v4862_v48 = vpop.f32.mrb[11].mxu0  ;;  %vm4864_vm8 = vcmp.gt.f32.partialorder %v6115_v40, 0.0 }
 0x480   :  { %v4867_v49 = vmin.f32 %v6116_v41, 0.0  ;;  %vm4865_vm9 = vcmp.gt.f32.partialorder %v6116_v41, 0.0 }
 0x481   :  { %v4868_v51 = vmul.f32 1.442695, %v4866_v47 }
 0x482   :  { %v4870_v12 = vmul.f32 1.442695, %v4867_v49 }
 0x483   :  { %6412 = vpow2.f32 %v4868_v51 }
 0x484   :  { %6414 = vpow2.f32 %v4870_v12 }
 0x485   :  { %6416 = vrcp.f32 %v5243_v20 }
 0x48d   :  { %v6413_v63 = vpop.eup %6412 }
 0x48e   :  { %v6415_v14 = vpop.eup %6414  ;;  %v6038_v52 = vadd.f32 -1.0, %v6413_v63 }
 0x48f   :  { %v6039_v9 = vadd.f32 -1.0, %v6415_v14  ;;  %v6417_v22 = vpop.eup %6416 }
 0x490   :  { %v4874_v54 = vsel %vm4864_vm8, %v6115_v40, %v6038_v52 }
 0x491   :  { %v4875_v61 = vsel %vm4865_vm9, %v6116_v41, %v6039_v9  ;;  %v4876_v55 = vpack.c.bf16 %v4874_v54, %v4874_v54 }
 0x492   :  { %v4877_v15 = vpack.c.bf16 %v4875_v61, %v4875_v61 }
 0x494   :  { %5038 = vmatprep.mubr.bf16.mxu0 %v4877_v15 }
 0x495   :  { %5039 = vmatmul.mubr.bf16.vlgmr.msra.gmra.mrb[12].mxu0 %v4876_v55 }
 0x568   :  { %v6078_v57 = vpop.f32.mrb[12].mxu0 }
 0x569   :  { %v6079_v59 = vpop.f32.mrb[13].mxu0 }
 0x56a   :  { %v6080_v60 = vadd.f32 %v6079_v59, %v6078_v57  ;;  %v6081_v62 = vpop.f32.mrb[14].mxu0 }
 0x56b   :  { %v6082_v1 = vpop.f32.mrb[15].mxu0 }
 0x56c   :  { %6091 = vmatpush3.msk.msra.mxu1 %vm5082_vm11, %v6080_v60 }
 0x56d   :  { %6093 = vmatmul.mubr.msk.f32.vlgmr.msra.gmra.mrb[12].mxu1 %vm5078_vm12, %v5062_v0  ;;  %6095 = vmatprep.subr.mxu1 %v6549_v56 }
 0x56e   :  { %6097 = vmatprep.mubr.msk.f32.mxu1 %vm6550_vm10, %v6549_v56 }
 0x640   :  { %v5152_v16 = vpop.f32.mrb[12].mxu1 }
 0x641   :  { %6096 = vmatpush3.msk.msra.mxu1 %vm5082_vm11, %v5152_v16  ;;  %v6094_v17 = vpop.f32.mrb[13].mxu1 }
 0x642   :  { %6098 = vmatmul.mubr.msk.f32.vlgmr.msra.gmra.mrb[14].mxu1 %vm5078_vm12, %v88_v36  ;;  %6100 = vmatprep.subr.mxu1 %v6549_v56 }
 0x643   :  { %6102 = vmatprep.mubr.msk.f32.mxu1 %vm6550_vm10, %v6549_v56 }
 0x648   :  { %6101 = vmatpush3.xpose.msk.msra.mxu1 %vm5273_vm14, %v5272_v19 }
 0x64b   :  { %6103 = vmatmul.mubr.msk.f32.vlgmr.msra.gmra.mrb[16].mxu1 %vm5273_vm14, %v6080_v60 }
 0x715   :  { %v5228_v43 = vpop.f32.mrb[14].mxu1 }
 0x716   :  { %v5245_v23 = vmul.f32 %v6417_v22, %v5228_v43  ;;  %v6099_v8 = vpop.f32.mrb[15].mxu1 }
 0x718   :  { %v5246_v42 = vsub.f32 %v6080_v60, %v5245_v23 }
 0x71a   :  { %v5247_v25 = vadd.f32 1e-06, %v5246_v42 }
 0x71c   :  { %v5248_v30 = vmul.f32 %v5247_v25, %v5247_v25 }
 0x71e   :  { %v5344_v2 = vpop.f32.mrb[16].mxu1  ;;  %v5250_v26 = vsel %vm5249_vm15, %v5248_v30, 0.0 }
 0x71f   :  { %v5345_v27 = vadd.f32 %v5344_v2, %v95_v24  ;;  %v6104_v28 = vpop.f32.mrb[17].mxu1 }
 0x721   :  { %v5348_v29 = vsel %vm5232_vm13, %v5345_v27, -inf }
 0x722   :  { %5349 = vmax.xlane.f32.xlu1 %v5348_v29 }
 0x726   :  { %5251 = vadd.xlane.f32.xlu1 %v5250_v26 }
 0x7af   :  { %v5350_v53 = vpop.xlane.xlu1 %5349 }
 0x7b0   :  { %v5351_v34 = vsub.f32 %v5345_v27, %v5350_v53 }
 0x7b2   :  { %v5352_v31 = vmul.f32 1.442695, %v5351_v34 }
 0x7b3   :  { %v5252_v45 = vpop.xlane.xlu1 %5251 }
 0x7b4   :  { %6418 = vpow2.f32 %v5352_v31  ;;  %vm5255_vm0 = vcmp.eq.f32.partialorder %v5252_v45, inf  ;;  %v5258_v36 = vand.u32 2147483648, %v5252_v45  ;;  %vm5257_vm1 = vcmp.eq.f32.partialorder %v5252_v45, 0.0 }
 0x7b5   :  { %6420 = vrsqrt.f32 %v5252_v45 }
 0x7be   :  { %v6419_v32 = vpop.eup %6418 }
 0x7bf   :  { %v6421_v58 = vpop.eup %6420  ;;  %v5354_v35 = vsel %vm5232_vm13, %v6419_v32, 0.0 }
 0x7c0   :  { %v5254_v50 = vmul.f32 %v6421_v58, %v5252_v45  ;;  %5355 = vadd.xlane.f32.xlu1 %v5354_v35 }
 0x7c2   :  { %v5256_v37 = vsel %vm5255_vm0, %v5252_v45, %v5254_v50 }
 0x7c3   :  { %v5259_v21 = vsel %vm5257_vm1, %v5258_v36, %v5256_v37 }
 0x7c4   :  { %v5260_v38 = vsel %vm5082_vm11, %v5259_v21, 0.0 }
 0x7c5   :  { %v5261_v39 = vrot.slane %v5260_v38, 4 }
 0x7c7   :  { %v5262_v40 = vadd.f32 %v5261_v39, %v5260_v38 }
 0x7c9   :  { %v5263_v33 = vrot.slane %v5262_v40, 2 }
 0x7cb   :  { %v5264_v41 = vadd.f32 %v5263_v33, %v5262_v40 }
 0x7cd   :  { %v5265_v46 = vrot.slane %v5264_v41, 1 }
 0x7cf   :  { %v5266_v47 = vadd.f32 %v5265_v46, %v5264_v41 }
 0x7d1   :  { %v5268_v48 = vmul.f32 0.25, %v5266_v47 }
 0x7d3   :  { %5270 = vst.msk [vmem:[#allocation9] sm:$0x1] %vm5269_vm2, %v5268_v48 }
 0x7d4   :  { %6501 = shalt.err (!%p6498_p0)
}
 0x7d5   :  { %s6502_s28 = scalar_lea.hbm %s6843_s6, 16 }
 0x7d6   :  { %p6503_p1 = scmp.ne.s32.totalorder %s6843_s6, %s6502_s28  ;;  %p6506_p2 = scmp.lt.u32.totalorder %s6502_s28, %s6843_s6 }
 0x7d8   :  { %p6508_p3 = pnand %p6506_p2, %p6503_p1 }
 0x7da   :  { %6511 = shalt.err (!%p6508_p3)
}
 0x7db   :  { %5379 = dma.vmem_to_hbm [thread:$0]  %s5377_s3, 16, %s6843_s6, [#allocation10]  }
 0x7dc   :  { %s6552_s10 = smov [#allocation8]  }
 0x7dd   :  { %s5366_s4 = sshll.u32 %s6552_s10, 4  ;;  %s5367_s4 = int_to_ptr.vmem [resolvable:$true] %s5366_s4 }
 0x7de   :  { %s6512_s11 = scalar_lea.vmem %s5367_s4, 64  ;;  %p6517_p5 = scmp.lt.s32.totalorder %s5367_s4, %s5367_s4 }
 0x7df   :  { %p6513_p4 = scmp.ne.s32.totalorder %s5367_s4, %s6512_s11  ;;  %p6518_p6 = scmp.lt.s32.totalorder %s6512_s11, %s6512_s11 }
 0x7e1   :  { %p6519_p7 = por %p6518_p6, %p6517_p5 }
 0x7e3   :  { %p6520_p8 = pnand %p6519_p7, %p6513_p4 }
 0x84d   :  { %v5356_v49 = vpop.xlane.xlu1 %5355 }
 0x84e   :  { %6422 = vrcp.f32 %v5356_v49 }
 0x858   :  { %v6423_v51 = vpop.eup %6422 }
 0x859   :  { %v5358_v12 = vmul.f32 %v6423_v51, %v6419_v32 }
 0x85b   :  { %5359 = vst.msk [vmem:[#allocation8] sm:$0xf] %vm5232_vm13, %v5358_v12 }
 0x85c   :  { %6523 = shalt.err (!%p6520_p8)
}
 0x85d   :  { %s6524_s6 = scalar_lea.hbm %s6842_s5, 64 }
 0x85e   :  { %p6525_p9 = scmp.ne.s32.totalorder %s6842_s5, %s6524_s6  ;;  %p6528_p10 = scmp.lt.u32.totalorder %s6524_s6, %s6842_s5 }
 0x860   :  { %p6530_p11 = pnand %p6528_p10, %p6525_p9 }
 0x862   :  { %6533 = shalt.err (!%p6530_p11)
}
 0x863   :  { %5369 = dma.vmem_to_hbm [thread:$0]  %s5367_s4, 64, %s6842_s5, [#allocation4]  }
 0x864   :  { %6538 = dma.done.wait [#allocation4], 64  }
 0x865   :  { %6539 = vsyncadd [#allocation4], 4294967232 }
 0x866   :  { %6540 = dma.done.wait [#allocation10], 16  }
 0x867   :  { %6541 = vsyncadd [#allocation10], 4294967280 }
 0x868   :  { %5386 = vsyncpa [#allocation3], 1 }
 0x869   :  { %5387 = vsyncpa [#allocation6], 1 }
 0x86a   :  { %5388 = vsyncpa [#allocation4], 1 }
 0x86b   :  { %5389 = vsyncpa [#allocation10], 1 }

</bundles_post_ra>
